<compile_context>
chip_gen: v7x
topology: tpu7x:2x2x1
jax: 0.10.0
libtpu: 0.0.40
codegen_flags: <defaults>
</compile_context>

<pallas_src>
import functools

import jax
import jax.numpy as jnp
from jax import lax
from jax.experimental import pallas as pl
from jax.experimental.pallas import tpu as pltpu

EPS = 1e-5                       # nn.BatchNorm2d default
_MATMUL_DTYPE = jnp.bfloat16     # MXU operand / intermediate-activation dtype
_LANE = 128                      # lane width / MXU N alignment


def _round_up(x, m):
    return ((x + m - 1) // m) * m


def _pad_axis(a, axis, target):
    pad = target - a.shape[axis]
    if pad == 0:
        return a
    widths = [(0, 0)] * a.ndim
    widths[axis] = (0, pad)
    return jnp.pad(a, widths)


# --------------------------------------------------------------------------------------
# Generation-aware configuration
# --------------------------------------------------------------------------------------
def _tpu_hw_config():
    """VMEM limit / tile budget / conv strategy derived from the actual chip."""
    try:
        kind = jax.devices()[0].device_kind.lower()
    except Exception:  # pragma: no cover - defensive
        kind = ""
    try:
        vmem_cap = int(pltpu.get_tpu_info().vmem_capacity_bytes)
    except Exception:  # pragma: no cover - defensive
        vmem_cap = 64 * 1024 * 1024          # conservative: v7x per-TC physical VMEM
    vmem_limit = (3 * vmem_cap) // 4         # ~96 MiB on 128 MiB chips, ~48 MiB on v7x
    tile_budget = vmem_limit // 2            # per-step working-set budget
    use_im2col = "v5" in kind                # v5e/v5p: MXU-bound -> single K=9*Ci dot
    return {"vmem_limit": int(vmem_limit), "tile_budget": int(tile_budget),
            "use_im2col": use_im2col}


def _pick_tile_h(H, W, ci_worst, co_worst, budget_bytes, use_im2col):
    """Largest H-tile dividing H that fits the budget, preferring MXU-aligned M."""
    esz = jnp.dtype(_MATMUL_DTYPE).itemsize

    def footprint(th):
        m = th * W
        x_blk = 2 * ((th + 2) * W * ci_worst * esz)       # main + halo rows, 2 buffers
        h_blk = 2 * (m * co_worst * esz)                   # output tile, 2 buffers
        w_blk = 2 * (9 * ci_worst * co_worst * esz)        # weight, 2 buffers
        stats = 2 * (2 * co_worst * 4)
        xpad = (th + 2) * (W + 2) * ci_worst * esz
        pat = m * 9 * ci_worst * esz if use_im2col else 0
        acc = m * co_worst * 4                             # f32 accumulator temporaries
        return x_blk + h_blk + w_blk + stats + xpad + pat + acc + (2 << 20)

    fitting, valid = [], []
    for th in range(1, H + 1):
        if H % th:
            continue
        if (th * W) % 128 and th != H:     # flat NCHW output block needs lane alignment
            continue
        valid.append(th)
        if footprint(th) <= budget_bytes:
            fitting.append(th)
    if fitting:
        return max(fitting, key=lambda t: ((t * W) % 256 == 0, (t * W) % 128 == 0, t))
    return min(valid) if valid else H


# --------------------------------------------------------------------------------------
# Kernels
# --------------------------------------------------------------------------------------
def _conv3x3_stats_kernel(apply_act, use_im2col, *refs):
    """3x3 conv over one (batch n, H-tile i) block + per-tile centered BN partials.

    If `apply_act` is True the input is the stored pre-BN activation of the previous
    layer and (scale, shift) of that layer's BatchNorm are applied (then ReLU) on the
    fly before the convolution.
    """
    if apply_act:
        xm_ref, xt_ref, xb_ref, scale_ref, shift_ref, w_ref = refs[:6]
        rest = refs[6:]
    else:
        xm_ref, xt_ref, xb_ref, w_ref = refs[:4]
        scale_ref = shift_ref = None
        rest = refs[4:]
    h_ref, stats_ref, xpad_ref = rest[:3]
    pat_ref = rest[3] if use_im2col else None

    _, TH, W, Ci = xm_ref.shape
    Co = w_ref.shape[1]
    cdt = xm_ref.dtype

    def activate(v):
        if not apply_act:
            return v
        # Previous layer's BN affine + ReLU in f32 (v5e VPU has no bf16), cast back.
        v = v.astype(jnp.float32) * scale_ref[...] + shift_ref[...]
        return jnp.maximum(v, 0.0).astype(cdt)

    i = pl.program_id(1)
    last = pl.num_programs(1) - 1

    # ---- assemble zero-padded (TH+2, W+2, Ci) tile in VMEM scratch (no wrapper pad) --
    zcol = jnp.zeros((TH + 2, 1, Ci), cdt)
    xpad_ref[:, 0:1, :] = zcol                                    # left zero column
    xpad_ref[:, W + 1:W + 2, :] = zcol                            # right zero column
    xpad_ref[1:TH + 1, 1:W + 1, :] = activate(xm_ref[0])
    # halo rows from neighboring H-tiles; zeroed (post-activation) at image edges
    xpad_ref[0:1, 1:W + 1, :] = activate(xt_ref[0]) * (i > 0).astype(cdt)
    xpad_ref[TH + 1:TH + 2, 1:W + 1, :] = activate(xb_ref[0]) * (i < last).astype(cdt)

    # ---- convolution -----------------------------------------------------------------
    if use_im2col:
        # v5e: MXU-bound -> single K=9*Ci contraction (store stream hidden by matmul).
        t = 0
        for dy in range(3):
            for dx in range(3):
                pat_ref[:, t * Ci:(t + 1) * Ci] = (
                    xpad_ref[dy:dy + TH, dx:dx + W, :].reshape(TH * W, Ci))
                t += 1
        acc = jnp.dot(pat_ref[...], w_ref[...], preferred_element_type=jnp.float32)
    else:
        # v6e/v7x: store-slot-bound -> 9 shifted-tap dots, f32 accumulation, no pat.
        acc = jnp.zeros((TH * W, Co), jnp.float32)
        t = 0
        for dy in range(3):
            for dx in range(3):
                tap = xpad_ref[dy:dy + TH, dx:dx + W, :].reshape(TH * W, Ci)
                acc = acc + jnp.dot(tap, w_ref[t * Ci:(t + 1) * Ci, :],
                                    preferred_element_type=jnp.float32)
                t += 1

    # ---- mean-centered per-tile BN partials (Welford-combinable on host) -------------
    cnt = jnp.float32(TH * W)
    s = jnp.sum(acc, axis=0, keepdims=True)                       # (1, Co)
    mu = s * (1.0 / cnt)
    c = acc - mu
    stats_ref[0, 0, 0:1, :] = s
    stats_ref[0, 0, 1:2, :] = jnp.sum(c * c, axis=0, keepdims=True)

    # ---- store the pre-BN activation (bf16) ------------------------------------------
    h_ref[0] = acc.reshape(TH, W, Co).astype(h_ref.dtype)


def _bn_relu_nchw_kernel(h_ref, scale_ref, shift_ref, out_ref):
    """Final BN affine + ReLU, written directly in NCHW layout (lane dim = TH*W)."""
    _, TH, W, Cp = h_ref.shape
    Cout = out_ref.shape[1]
    v = h_ref[0].reshape(TH * W, Cp).astype(jnp.float32)
    v = jnp.maximum(v * scale_ref[...] + shift_ref[...], 0.0)
    out_ref[0] = jnp.transpose(v)[:Cout, :]                       # (Cout, TH*W)


# --------------------------------------------------------------------------------------
# pallas_call wrappers
# --------------------------------------------------------------------------------------
def _conv3x3_stats(x, w, in_scale, in_shift, tile_h, use_im2col, vmem_limit):
    """x: (N,H,W,Ci) in _MATMUL_DTYPE, w: (9*Ci, Co). Returns (h, partial_stats)."""
    N, H, W, Ci = x.shape
    Co = w.shape[1]
    TH = tile_h
    nH = H // TH
    apply_act = in_scale is not None

    in_specs = [
        # main H-tile
        pl.BlockSpec((1, TH, W, Ci), lambda n, i: (n, i, 0, 0)),
        # 1-row halos (clamped at the image edges; masked to zero in-kernel)
        pl.BlockSpec((1, 1, W, Ci),
                     lambda n, i: (n, jnp.maximum(i * TH - 1, 0), 0, 0)),
        pl.BlockSpec((1, 1, W, Ci),
                     lambda n, i: (n, jnp.minimum((i + 1) * TH, H - 1), 0, 0)),
    ]
    args = [x, x, x]
    if apply_act:
        in_specs += [pl.BlockSpec((1, Ci), lambda n, i: (0, 0)),
                     pl.BlockSpec((1, Ci), lambda n, i: (0, 0))]
        args += [in_scale, in_shift]
    in_specs.append(pl.BlockSpec((9 * Ci, Co), lambda n, i: (0, 0)))
    args.append(w)

    out_shape = (jax.ShapeDtypeStruct((N, H, W, Co), _MATMUL_DTYPE),
                 jax.ShapeDtypeStruct((N, nH, 2, Co), jnp.float32))
    out_specs = (pl.BlockSpec((1, TH, W, Co), lambda n, i: (n, i, 0, 0)),
                 pl.BlockSpec((1, 1, 2, Co), lambda n, i: (n, i, 0, 0)))

    scratch_shapes = [pltpu.VMEM((TH + 2, W + 2, Ci), x.dtype)]   # zero-padded tile
    if use_im2col:
        scratch_shapes.append(pltpu.VMEM((TH * W, 9 * Ci), x.dtype))  # im2col patches

    return pl.pallas_call(
        functools.partial(_conv3x3_stats_kernel, apply_act, use_im2col),
        grid=(N, nH),
        in_specs=in_specs,
        out_specs=out_specs,
        out_shape=out_shape,
        scratch_shapes=scratch_shapes,
        compiler_params=pltpu.CompilerParams(
            dimension_semantics=("parallel", "parallel"),
            vmem_limit_bytes=int(vmem_limit)),
    )(*args)


def _bn_relu_nchw(h, scale, shift, tile_h, c_out, vmem_limit):
    """BN+ReLU on stored pre-BN h (NHWC, padded channels) -> flat NCHW (N,Cout,H*W)."""
    N, H, W, Cp = h.shape
    TH = tile_h
    return pl.pallas_call(
        _bn_relu_nchw_kernel,
        grid=(N, H // TH),
        in_specs=[pl.BlockSpec((1, TH, W, Cp), lambda n, i: (n, i, 0, 0)),
                  pl.BlockSpec((1, Cp), lambda n, i: (0, 0)),
                  pl.BlockSpec((1, Cp), lambda n, i: (0, 0))],
        out_specs=pl.BlockSpec((1, c_out, TH * W), lambda n, i: (n, 0, i)),
        out_shape=jax.ShapeDtypeStruct((N, c_out, H * W), jnp.float32),
        compiler_params=pltpu.CompilerParams(
            dimension_semantics=("parallel", "parallel"),
            vmem_limit_bytes=int(vmem_limit)),
    )(h, scale, shift)


# --------------------------------------------------------------------------------------
# Host-side glue
# --------------------------------------------------------------------------------------
def _bn_scale_shift(stats, gamma, beta, tile_count):
    """Welford-style combination of per-tile (sum, centered-sum-of-squares) partials.

    Conv bias is intentionally omitted: under training-mode batch statistics it
    cancels exactly inside the normalization.
    """
    sums = stats[:, :, 0, :]                      # (N, nH, C)
    cssq = stats[:, :, 1, :]
    n_tiles = sums.shape[0] * sums.shape[1]
    cnt = jnp.float32(tile_count)
    total = jnp.float32(n_tiles * tile_count)
    mean = jnp.sum(sums, axis=(0, 1)) / total
    tile_mean = sums / cnt
    m2 = jnp.sum(cssq, axis=(0, 1)) + cnt * jnp.sum((tile_mean - mean) ** 2, axis=(0, 1))
    var = jnp.maximum(m2 / total, 0.0)
    scale = gamma * lax.rsqrt(var + jnp.float32(EPS))
    shift = beta - mean * scale
    return (scale.reshape(1, -1).astype(jnp.float32),
            shift.reshape(1, -1).astype(jnp.float32))


def conv_block_nested_forward(x_nchw, params, tile_h=None):
    """PyTorch-equivalent forward (training-mode BN). I/O is NCHW like nn.Conv2d."""
    N, Cin, H, W = x_nchw.shape
    Cmid = params["w1"].shape[-1]
    Cout = params["w2"].shape[-1]
    assert W % 8 == 0, "W must be a multiple of 8 (sublane tiling)"

    Cmid_p = _round_up(Cmid, _LANE)
    Cout_p = _round_up(Cout, _LANE)

    hw = _tpu_hw_config()
    use_im2col = hw["use_im2col"]
    vmem_limit = hw["vmem_limit"]

    if tile_h is None:
        tile_h = _pick_tile_h(H, W, max(Cin, Cmid_p), max(Cmid_p, Cout_p),
                              hw["tile_budget"], use_im2col)
    assert H % tile_h == 0, "tile_h must divide H"
    assert (tile_h * W) % 128 == 0 or tile_h == H, "tile_h*W must be lane-aligned"

    # NCHW -> NHWC + cast to MXU operand dtype (single fused XLA op on the input).
    x = jnp.transpose(x_nchw, (0, 2, 3, 1)).astype(_MATMUL_DTYPE)

    # HWIO -> (9*Cin, C) tap matrices; lane dims padded to multiples of 128.
    w1 = _pad_axis(params["w1"].astype(_MATMUL_DTYPE).reshape(9 * Cin, Cmid), 1, Cmid_p)
    w2 = _pad_axis(params["w2"].astype(_MATMUL_DTYPE), 2, Cmid_p).reshape(9 * Cmid_p, Cout)
    w2 = _pad_axis(w2, 1, Cout_p)
    g1 = _pad_axis(params["g1"].astype(jnp.float32), 0, Cmid_p)
    be1 = _pad_axis(params["beta1"].astype(jnp.float32), 0, Cmid_p)
    g2 = _pad_axis(params["g2"].astype(jnp.float32), 0, Cout_p)
    be2 = _pad_axis(params["beta2"].astype(jnp.float32), 0, Cout_p)

    # Layer 1: conv1 + centered batch-stat partials (bias cancels in training-mode BN).
    h1, st1 = _conv3x3_stats(x, w1, None, None, tile_h, use_im2col, vmem_limit)
    scale1, shift1 = _bn_scale_shift(st1, g1, be1, tile_h * W)

    # Layer 2: BN1+ReLU fused into the input read, conv2 + batch-stat partials.
    h2, st2 = _conv3x3_stats(h1, w2, scale1, shift1, tile_h, use_im2col, vmem_limit)
    scale2, shift2 = _bn_scale_shift(st2, g2, be2, tile_h * W)

    # Final BN2 + ReLU, written directly as NCHW blocks (free reshape afterwards).
    out = _bn_relu_nchw(h2, scale2, shift2, tile_h, Cout, vmem_limit)  # (N,Cout,H*W)
    return out.reshape(N, Cout, H, W)


# ----------------------- pure-JAX reference (for checking) ---------------------------
def _ref_conv_bn_relu(x_nhwc, w_hwio, b, gamma, beta):
    y = lax.conv_general_dilated(
        x_nhwc, w_hwio, window_strides=(1, 1), padding="SAME",
        dimension_numbers=("NHWC", "HWIO", "NHWC"),
    ) + b
    mu = jnp.mean(y, axis=(0, 1, 2), keepdims=True)
    var = jnp.mean((y - mu) ** 2, axis=(0, 1, 2), keepdims=True)
    y = (y - mu) * lax.rsqrt(var + EPS) * gamma + beta
    return jnp.maximum(y, 0.0)


def _ref_forward(x_nchw, p):
    x = jnp.transpose(x_nchw, (0, 2, 3, 1))
    h = _ref_conv_bn_relu(x, p["w1"], p["b1"], p["g1"], p["beta1"])
    h = _ref_conv_bn_relu(h, p["w2"], p["b2"], p["g2"], p["beta2"])
    return jnp.transpose(h, (0, 3, 1, 2))


if __name__ == "__main__":
    N, in_ch, mid_ch, out_ch, H, W = 2, 4, 8, 4, 16, 16

    key = jax.random.PRNGKey(0)
    ks = jax.random.split(key, 9)

    x = jax.random.normal(ks[0], (N, in_ch, H, W), jnp.float32)

    # Deterministic synthetic parameters (shapes match nn.Conv2d / nn.BatchNorm2d;
    # PyTorch (out,in,3,3) conv weights are stored here in HWIO layout).
    params = {
        "w1": 0.2 * jax.random.normal(ks[1], (3, 3, in_ch, mid_ch), jnp.float32),
        "b1": 0.1 * jax.random.normal(ks[2], (mid_ch,), jnp.float32),
        "g1": 1.0 + 0.1 * jax.random.normal(ks[3], (mid_ch,), jnp.float32),
        "beta1": 0.1 * jax.random.normal(ks[4], (mid_ch,), jnp.float32),
        "w2": 0.2 * jax.random.normal(ks[5], (3, 3, mid_ch, out_ch), jnp.float32),
        "b2": 0.1 * jax.random.normal(ks[6], (out_ch,), jnp.float32),
        "g2": 1.0 + 0.1 * jax.random.normal(ks[7], (out_ch,), jnp.float32),
        "beta2": 0.1 * jax.random.normal(ks[8], (out_ch,), jnp.float32),
    }

    # tile_h=8 -> two H-tiles per image so the halo / edge-masking path is exercised.
    fwd = jax.jit(functools.partial(conv_block_nested_forward, tile_h=8))
    out = jax.block_until_ready(fwd(x, params))
    ref = jax.block_until_ready(_ref_forward(x, params))

    assert out.shape == (N, out_ch, H, W), out.shape
    # Tolerance reflects bf16 MXU operands / bf16 intermediate activations
    # (set _MATMUL_DTYPE = jnp.float32 for full-f32 numerics).
    max_err = float(jnp.max(jnp.abs(out - ref)))
    assert jnp.allclose(out, ref, rtol=3e-2, atol=3e-2), max_err
    print("KERNEL_OK")
</pallas_src>

<mosaic_0001>
module attributes {stable_mosaic.version = 11 : i64} {
  func.func @_conv3x3_stats_kernel(%arg0: i32, %arg1: i32, %arg2: memref<1x8x16x4xbf16, #tpu.memory_space<vmem>>, %arg3: memref<1x1x16x4xbf16, #tpu.memory_space<vmem>>, %arg4: memref<1x1x16x4xbf16, #tpu.memory_space<vmem>>, %arg5: memref<36x128xbf16, #tpu.memory_space<vmem>>, %arg6: memref<1x8x16x128xbf16, #tpu.memory_space<vmem>>, %arg7: memref<1x1x2x128xf32, #tpu.memory_space<vmem>>, %arg8: memref<10x18x4xbf16, #tpu.memory_space<vmem>>) attributes {dimension_semantics = [#tpu.dimension_semantics<parallel>, #tpu.dimension_semantics<parallel>], iteration_bounds = array<i64: 2, 2>, scalar_prefetch = 0 : i64, scratch_operands = 1 : i64, tpu.core_type = #tpu.core_type<tc>, window_params = [{transform_indices = @transform_0, window_bounds = array<i64: 1, 8, 16, 4>}, {transform_indices = @transform_1, window_bounds = array<i64: 1, 1, 16, 4>}, {transform_indices = @transform_2, window_bounds = array<i64: 1, 1, 16, 4>}, {pipeline_mode = #tpu.pipeline_mode<synchronous>, transform_indices = @transform_3, window_bounds = array<i64: 36, 128>}, {transform_indices = @transform_4, window_bounds = array<i64: 1, 8, 16, 128>}, {transform_indices = @transform_5, window_bounds = array<i64: 1, 1, 2, 128>}]} {
    %cst = arith.constant 0.000000e+00 : bf16
    %0 = vector.broadcast %cst : bf16 to vector<10x1x4xbf16>
    %c0 = arith.constant 0 : index
    %c0_0 = arith.constant 0 : index
    %c0_1 = arith.constant 0 : index
    %1 = vector.load %arg8[%c0, %c0_0, %c0_1] : memref<10x18x4xbf16, #tpu.memory_space<vmem>>, vector<10x1x4xbf16>
    tpu.vector_store %arg8[%c0, %c0_0, %c0_1], %0 {strides = array<i32>} : memref<10x18x4xbf16, #tpu.memory_space<vmem>>, vector<10x1x4xbf16>,
    %c0_2 = arith.constant 0 : index
    %c17 = arith.constant 17 : index
    %c0_3 = arith.constant 0 : index
    %2 = vector.load %arg8[%c0_2, %c17, %c0_3] : memref<10x18x4xbf16, #tpu.memory_space<vmem>>, vector<10x1x4xbf16>
    tpu.vector_store %arg8[%c0_2, %c17, %c0_3], %0 {strides = array<i32>} : memref<10x18x4xbf16, #tpu.memory_space<vmem>>, vector<10x1x4xbf16>,
    %c0_4 = arith.constant 0 : index
    %c0_5 = arith.constant 0 : index
    %c0_6 = arith.constant 0 : index
    %c0_7 = arith.constant 0 : index
    %3 = vector.load %arg2[%c0_4, %c0_5, %c0_6, %c0_7] : memref<1x8x16x4xbf16, #tpu.memory_space<vmem>>, vector<1x8x16x4xbf16>
    %4 = vector.shape_cast %3 : vector<1x8x16x4xbf16> to vector<8x16x4xbf16>
    %c1 = arith.constant 1 : index
    %c1_8 = arith.constant 1 : index
    %c0_9 = arith.constant 0 : index
    %5 = vector.load %arg8[%c1, %c1_8, %c0_9] : memref<10x18x4xbf16, #tpu.memory_space<vmem>>, vector<8x16x4xbf16>
    tpu.vector_store %arg8[%c1, %c1_8, %c0_9], %4 {strides = array<i32>} : memref<10x18x4xbf16, #tpu.memory_space<vmem>>, vector<8x16x4xbf16>,
    %c0_10 = arith.constant 0 : index
    %c0_11 = arith.constant 0 : index
    %c0_12 = arith.constant 0 : index
    %c0_13 = arith.constant 0 : index
    %6 = vector.load %arg3[%c0_10, %c0_11, %c0_12, %c0_13] : memref<1x1x16x4xbf16, #tpu.memory_space<vmem>>, vector<1x1x16x4xbf16>
    %7 = vector.shape_cast %6 : vector<1x1x16x4xbf16> to vector<1x16x4xbf16>
    %c0_i32 = arith.constant 0 : i32
    %8 = arith.cmpi sgt, %arg1, %c0_i32 : i32
    %9 = arith.extui %8 : i1 to i32
    %10 = arith.sitofp %9 : i32 to f32
    %11 = arith.truncf %10 : f32 to bf16
    %12 = vector.broadcast %11 : bf16 to vector<1x16x4xbf16>
    %13 = arith.mulf %7, %12 : vector<1x16x4xbf16>
    %c0_14 = arith.constant 0 : index
    %c1_15 = arith.constant 1 : index
    %c0_16 = arith.constant 0 : index
    %14 = vector.load %arg8[%c0_14, %c1_15, %c0_16] : memref<10x18x4xbf16, #tpu.memory_space<vmem>>, vector<1x16x4xbf16>
    tpu.vector_store %arg8[%c0_14, %c1_15, %c0_16], %13 {strides = array<i32>} : memref<10x18x4xbf16, #tpu.memory_space<vmem>>, vector<1x16x4xbf16>,
    %c0_17 = arith.constant 0 : index
    %c0_18 = arith.constant 0 : index
    %c0_19 = arith.constant 0 : index
    %c0_20 = arith.constant 0 : index
    %15 = vector.load %arg4[%c0_17, %c0_18, %c0_19, %c0_20] : memref<1x1x16x4xbf16, #tpu.memory_space<vmem>>, vector<1x1x16x4xbf16>
    %16 = vector.shape_cast %15 : vector<1x1x16x4xbf16> to vector<1x16x4xbf16>
    %c1_i32 = arith.constant 1 : i32
    %17 = arith.cmpi slt, %arg1, %c1_i32 : i32
    %18 = arith.extui %17 : i1 to i32
    %19 = arith.sitofp %18 : i32 to f32
    %20 = arith.truncf %19 : f32 to bf16
    %21 = vector.broadcast %20 : bf16 to vector<1x16x4xbf16>
    %22 = arith.mulf %16, %21 : vector<1x16x4xbf16>
    %c9 = arith.constant 9 : index
    %c1_21 = arith.constant 1 : index
    %c0_22 = arith.constant 0 : index
    %23 = vector.load %arg8[%c9, %c1_21, %c0_22] : memref<10x18x4xbf16, #tpu.memory_space<vmem>>, vector<1x16x4xbf16>
    tpu.vector_store %arg8[%c9, %c1_21, %c0_22], %22 {strides = array<i32>} : memref<10x18x4xbf16, #tpu.memory_space<vmem>>, vector<1x16x4xbf16>,
    %cst_23 = arith.constant 0.000000e+00 : f32
    %24 = vector.broadcast %cst_23 : f32 to vector<128x128xf32>
    %c0_24 = arith.constant 0 : index
    %c0_25 = arith.constant 0 : index
    %c0_26 = arith.constant 0 : index
    %25 = vector.load %arg8[%c0_24, %c0_25, %c0_26] : memref<10x18x4xbf16, #tpu.memory_space<vmem>>, vector<8x16x4xbf16>
    %26 = vector.shape_cast %25 : vector<8x16x4xbf16> to vector<128x4xbf16>
    %c0_27 = arith.constant 0 : index
    %c0_28 = arith.constant 0 : index
    %27 = vector.load %arg5[%c0_27, %c0_28] : memref<36x128xbf16, #tpu.memory_space<vmem>>, vector<4x128xbf16>
    %cst_29 = arith.constant dense<0.000000e+00> : vector<128x128xf32>
    %28 = tpu.matmul %26, %27, %cst_29 {dimension_numbers = #tpu.dot_dimension_numbers<[1], [0], [0], [1], [0, 0, 1, 1], [], []>} : vector<128x4xbf16>, vector<4x128xbf16>, vector<128x128xf32> -> vector<128x128xf32>
    %29 = arith.addf %24, %28 : vector<128x128xf32>
    %c0_30 = arith.constant 0 : index
    %c1_31 = arith.constant 1 : index
    %c0_32 = arith.constant 0 : index
    %30 = vector.load %arg8[%c0_30, %c1_31, %c0_32] : memref<10x18x4xbf16, #tpu.memory_space<vmem>>, vector<8x16x4xbf16>
    %31 = vector.shape_cast %30 : vector<8x16x4xbf16> to vector<128x4xbf16>
    %c4 = arith.constant 4 : index
    %c0_33 = arith.constant 0 : index
    %32 = vector.load %arg5[%c4, %c0_33] : memref<36x128xbf16, #tpu.memory_space<vmem>>, vector<4x128xbf16>
    %cst_34 = arith.constant dense<0.000000e+00> : vector<128x128xf32>
    %33 = tpu.matmul %31, %32, %cst_34 {dimension_numbers = #tpu.dot_dimension_numbers<[1], [0], [0], [1], [0, 0, 1, 1], [], []>} : vector<128x4xbf16>, vector<4x128xbf16>, vector<128x128xf32> -> vector<128x128xf32>
    %34 = arith.addf %29, %33 : vector<128x128xf32>
    %c0_35 = arith.constant 0 : index
    %c2 = arith.constant 2 : index
    %c0_36 = arith.constant 0 : index
    %35 = vector.load %arg8[%c0_35, %c2, %c0_36] : memref<10x18x4xbf16, #tpu.memory_space<vmem>>, vector<8x16x4xbf16>
    %36 = vector.shape_cast %35 : vector<8x16x4xbf16> to vector<128x4xbf16>
    %c8 = arith.constant 8 : index
    %c0_37 = arith.constant 0 : index
    %37 = vector.load %arg5[%c8, %c0_37] : memref<36x128xbf16, #tpu.memory_space<vmem>>, vector<4x128xbf16>
    %cst_38 = arith.constant dense<0.000000e+00> : vector<128x128xf32>
    %38 = tpu.matmul %36, %37, %cst_38 {dimension_numbers = #tpu.dot_dimension_numbers<[1], [0], [0], [1], [0, 0, 1, 1], [], []>} : vector<128x4xbf16>, vector<4x128xbf16>, vector<128x128xf32> -> vector<128x128xf32>
    %39 = arith.addf %34, %38 : vector<128x128xf32>
    %c1_39 = arith.constant 1 : index
    %c0_40 = arith.constant 0 : index
    %c0_41 = arith.constant 0 : index
    %40 = vector.load %arg8[%c1_39, %c0_40, %c0_41] : memref<10x18x4xbf16, #tpu.memory_space<vmem>>, vector<8x16x4xbf16>
    %41 = vector.shape_cast %40 : vector<8x16x4xbf16> to vector<128x4xbf16>
    %c12 = arith.constant 12 : index
    %c0_42 = arith.constant 0 : index
    %42 = vector.load %arg5[%c12, %c0_42] : memref<36x128xbf16, #tpu.memory_space<vmem>>, vector<4x128xbf16>
    %cst_43 = arith.constant dense<0.000000e+00> : vector<128x128xf32>
    %43 = tpu.matmul %41, %42, %cst_43 {dimension_numbers = #tpu.dot_dimension_numbers<[1], [0], [0], [1], [0, 0, 1, 1], [], []>} : vector<128x4xbf16>, vector<4x128xbf16>, vector<128x128xf32> -> vector<128x128xf32>
    %44 = arith.addf %39, %43 : vector<128x128xf32>
    %c1_44 = arith.constant 1 : index
    %c1_45 = arith.constant 1 : index
    %c0_46 = arith.constant 0 : index
    %45 = vector.load %arg8[%c1_44, %c1_45, %c0_46] : memref<10x18x4xbf16, #tpu.memory_space<vmem>>, vector<8x16x4xbf16>
    %46 = vector.shape_cast %45 : vector<8x16x4xbf16> to vector<128x4xbf16>
    %c16 = arith.constant 16 : index
    %c0_47 = arith.constant 0 : index
    %47 = vector.load %arg5[%c16, %c0_47] : memref<36x128xbf16, #tpu.memory_space<vmem>>, vector<4x128xbf16>
    %cst_48 = arith.constant dense<0.000000e+00> : vector<128x128xf32>
    %48 = tpu.matmul %46, %47, %cst_48 {dimension_numbers = #tpu.dot_dimension_numbers<[1], [0], [0], [1], [0, 0, 1, 1], [], []>} : vector<128x4xbf16>, vector<4x128xbf16>, vector<128x128xf32> -> vector<128x128xf32>
    %49 = arith.addf %44, %48 : vector<128x128xf32>
    %c1_49 = arith.constant 1 : index
    %c2_50 = arith.constant 2 : index
    %c0_51 = arith.constant 0 : index
    %50 = vector.load %arg8[%c1_49, %c2_50, %c0_51] : memref<10x18x4xbf16, #tpu.memory_space<vmem>>, vector<8x16x4xbf16>
    %51 = vector.shape_cast %50 : vector<8x16x4xbf16> to vector<128x4xbf16>
    %c20 = arith.constant 20 : index
    %c0_52 = arith.constant 0 : index
    %52 = vector.load %arg5[%c20, %c0_52] : memref<36x128xbf16, #tpu.memory_space<vmem>>, vector<4x128xbf16>
    %cst_53 = arith.constant dense<0.000000e+00> : vector<128x128xf32>
    %53 = tpu.matmul %51, %52, %cst_53 {dimension_numbers = #tpu.dot_dimension_numbers<[1], [0], [0], [1], [0, 0, 1, 1], [], []>} : vector<128x4xbf16>, vector<4x128xbf16>, vector<128x128xf32> -> vector<128x128xf32>
    %54 = arith.addf %49, %53 : vector<128x128xf32>
    %c2_54 = arith.constant 2 : index
    %c0_55 = arith.constant 0 : index
    %c0_56 = arith.constant 0 : index
    %55 = vector.load %arg8[%c2_54, %c0_55, %c0_56] : memref<10x18x4xbf16, #tpu.memory_space<vmem>>, vector<8x16x4xbf16>
    %56 = vector.shape_cast %55 : vector<8x16x4xbf16> to vector<128x4xbf16>
    %c24 = arith.constant 24 : index
    %c0_57 = arith.constant 0 : index
    %57 = vector.load %arg5[%c24, %c0_57] : memref<36x128xbf16, #tpu.memory_space<vmem>>, vector<4x128xbf16>
    %cst_58 = arith.constant dense<0.000000e+00> : vector<128x128xf32>
    %58 = tpu.matmul %56, %57, %cst_58 {dimension_numbers = #tpu.dot_dimension_numbers<[1], [0], [0], [1], [0, 0, 1, 1], [], []>} : vector<128x4xbf16>, vector<4x128xbf16>, vector<128x128xf32> -> vector<128x128xf32>
    %59 = arith.addf %54, %58 : vector<128x128xf32>
    %c2_59 = arith.constant 2 : index
    %c1_60 = arith.constant 1 : index
    %c0_61 = arith.constant 0 : index
    %60 = vector.load %arg8[%c2_59, %c1_60, %c0_61] : memref<10x18x4xbf16, #tpu.memory_space<vmem>>, vector<8x16x4xbf16>
    %61 = vector.shape_cast %60 : vector<8x16x4xbf16> to vector<128x4xbf16>
    %c28 = arith.constant 28 : index
    %c0_62 = arith.constant 0 : index
    %62 = vector.load %arg5[%c28, %c0_62] : memref<36x128xbf16, #tpu.memory_space<vmem>>, vector<4x128xbf16>
    %cst_63 = arith.constant dense<0.000000e+00> : vector<128x128xf32>
    %63 = tpu.matmul %61, %62, %cst_63 {dimension_numbers = #tpu.dot_dimension_numbers<[1], [0], [0], [1], [0, 0, 1, 1], [], []>} : vector<128x4xbf16>, vector<4x128xbf16>, vector<128x128xf32> -> vector<128x128xf32>
    %64 = arith.addf %59, %63 : vector<128x128xf32>
    %c2_64 = arith.constant 2 : index
    %c2_65 = arith.constant 2 : index
    %c0_66 = arith.constant 0 : index
    %65 = vector.load %arg8[%c2_64, %c2_65, %c0_66] : memref<10x18x4xbf16, #tpu.memory_space<vmem>>, vector<8x16x4xbf16>
    %66 = vector.shape_cast %65 : vector<8x16x4xbf16> to vector<128x4xbf16>
    %c32 = arith.constant 32 : index
    %c0_67 = arith.constant 0 : index
    %67 = vector.load %arg5[%c32, %c0_67] : memref<36x128xbf16, #tpu.memory_space<vmem>>, vector<4x128xbf16>
    %cst_68 = arith.constant dense<0.000000e+00> : vector<128x128xf32>
    %68 = tpu.matmul %66, %67, %cst_68 {dimension_numbers = #tpu.dot_dimension_numbers<[1], [0], [0], [1], [0, 0, 1, 1], [], []>} : vector<128x4xbf16>, vector<4x128xbf16>, vector<128x128xf32> -> vector<128x128xf32>
    %69 = arith.addf %64, %68 : vector<128x128xf32>
    %cst_69 = arith.constant dense<0.000000e+00> : vector<128xf32>
    %70 = vector.multi_reduction <add>, %69, %cst_69 [0] : vector<128x128xf32> to vector<128xf32>
    %71 = vector.shape_cast %70 : vector<128xf32> to vector<1x128xf32>
    %cst_70 = arith.constant 1.000000e+00 : f32
    %cst_71 = arith.constant 1.280000e+02 : f32
    %72 = arith.divf %cst_70, %cst_71 : f32
    %73 = vector.broadcast %72 : f32 to vector<1x128xf32>
    %74 = arith.mulf %71, %73 : vector<1x128xf32>
    %75 = vector.broadcast %74 : vector<1x128xf32> to vector<128x128xf32>
    %76 = arith.subf %69, %75 : vector<128x128xf32>
    %c0_72 = arith.constant 0 : index
    %c0_73 = arith.constant 0 : index
    %c0_74 = arith.constant 0 : index
    %c0_75 = arith.constant 0 : index
    %77 = vector.load %arg7[%c0_72, %c0_73, %c0_74, %c0_75] : memref<1x1x2x128xf32, #tpu.memory_space<vmem>>, vector<1x1x1x128xf32>
    %78 = vector.shape_cast %77 : vector<1x1x1x128xf32> to vector<1x128xf32>
    %79 = vector.shape_cast %71 : vector<1x128xf32> to vector<1x1x1x128xf32>
    tpu.vector_store %arg7[%c0_72, %c0_73, %c0_74, %c0_75], %79 {strides = array<i32>} : memref<1x1x2x128xf32, #tpu.memory_space<vmem>>, vector<1x1x1x128xf32>,
    %80 = arith.mulf %76, %76 : vector<128x128xf32>
    %cst_76 = arith.constant dense<0.000000e+00> : vector<128xf32>
    %81 = vector.multi_reduction <add>, %80, %cst_76 [0] : vector<128x128xf32> to vector<128xf32>
    %82 = vector.shape_cast %81 : vector<128xf32> to vector<1x128xf32>
    %c0_77 = arith.constant 0 : index
    %c0_78 = arith.constant 0 : index
    %c1_79 = arith.constant 1 : index
    %c0_80 = arith.constant 0 : index
    %83 = vector.load %arg7[%c0_77, %c0_78, %c1_79, %c0_80] : memref<1x1x2x128xf32, #tpu.memory_space<vmem>>, vector<1x1x1x128xf32>
    %84 = vector.shape_cast %83 : vector<1x1x1x128xf32> to vector<1x128xf32>
    %85 = vector.shape_cast %82 : vector<1x128xf32> to vector<1x1x1x128xf32>
    tpu.vector_store %arg7[%c0_77, %c0_78, %c1_79, %c0_80], %85 {strides = array<i32>} : memref<1x1x2x128xf32, #tpu.memory_space<vmem>>, vector<1x1x1x128xf32>,
    %86 = vector.shape_cast %69 : vector<128x128xf32> to vector<8x16x128xf32>
    %87 = arith.truncf %86 : vector<8x16x128xf32> to vector<8x16x128xbf16>
    %c0_81 = arith.constant 0 : index
    %c0_82 = arith.constant 0 : index
    %c0_83 = arith.constant 0 : index
    %c0_84 = arith.constant 0 : index
    %88 = vector.load %arg6[%c0_81, %c0_82, %c0_83, %c0_84] : memref<1x8x16x128xbf16, #tpu.memory_space<vmem>>, vector<1x8x16x128xbf16>
    %89 = vector.shape_cast %88 : vector<1x8x16x128xbf16> to vector<8x16x128xbf16>
    %90 = vector.shape_cast %87 : vector<8x16x128xbf16> to vector<1x8x16x128xbf16>
    tpu.vector_store %arg6[%c0_81, %c0_82, %c0_83, %c0_84], %90 {strides = array<i32>} : memref<1x8x16x128xbf16, #tpu.memory_space<vmem>>, vector<1x8x16x128xbf16>,
    return
  }
  func.func @transform_0(%arg0: i32, %arg1: i32) -> (i32, i32, i32, i32) {
    %c0_i32 = arith.constant 0 : i32
    %c0_i32_0 = arith.constant 0 : i32
    %c0_i32_1 = arith.constant 0 : i32
    return %arg0, %arg1, %c0_i32, %c0_i32_0 : i32, i32, i32, i32
  }
  func.func @transform_1(%arg0: i32, %arg1: i32) -> (i32, i32, i32, i32) {
    %c8_i32 = arith.constant 8 : i32
    %0 = arith.muli %arg1, %c8_i32 : i32
    %c1_i32 = arith.constant 1 : i32
    %1 = arith.subi %0, %c1_i32 : i32
    %c0_i32 = arith.constant 0 : i32
    %2 = arith.maxsi %1, %c0_i32 : i32
    %c0_i32_0 = arith.constant 0 : i32
    %c0_i32_1 = arith.constant 0 : i32
    %c0_i32_2 = arith.constant 0 : i32
    return %arg0, %2, %c0_i32_0, %c0_i32_1 : i32, i32, i32, i32
  }
  func.func @transform_2(%arg0: i32, %arg1: i32) -> (i32, i32, i32, i32) {
    %c1_i32 = arith.constant 1 : i32
    %0 = arith.addi %arg1, %c1_i32 : i32
    %c8_i32 = arith.constant 8 : i32
    %1 = arith.muli %0, %c8_i32 : i32
    %c15_i32 = arith.constant 15 : i32
    %2 = arith.minsi %1, %c15_i32 : i32
    %c0_i32 = arith.constant 0 : i32
    %c0_i32_0 = arith.constant 0 : i32
    %c0_i32_1 = arith.constant 0 : i32
    return %arg0, %2, %c0_i32, %c0_i32_0 : i32, i32, i32, i32
  }
  func.func @transform_3(%arg0: i32, %arg1: i32) -> (i32, i32) {
    %c0_i32 = arith.constant 0 : i32
    %c0_i32_0 = arith.constant 0 : i32
    %c0_i32_1 = arith.constant 0 : i32
    return %c0_i32, %c0_i32_0 : i32, i32
  }
  func.func @transform_4(%arg0: i32, %arg1: i32) -> (i32, i32, i32, i32) {
    %c0_i32 = arith.constant 0 : i32
    %c0_i32_0 = arith.constant 0 : i32
    %c0_i32_1 = arith.constant 0 : i32
    return %arg0, %arg1, %c0_i32, %c0_i32_0 : i32, i32, i32, i32
  }
  func.func @transform_5(%arg0: i32, %arg1: i32) -> (i32, i32, i32, i32) {
    %c0_i32 = arith.constant 0 : i32
    %c0_i32_0 = arith.constant 0 : i32
    %c0_i32_1 = arith.constant 0 : i32
    return %arg0, %arg1, %c0_i32, %c0_i32_0 : i32, i32, i32, i32
  }
}

module attributes {stable_mosaic.version = 11 : i64} {
  func.func @_conv3x3_stats_kernel(%arg0: i32, %arg1: i32, %arg2: memref<1x8x16x128xbf16, #tpu.memory_space<vmem>>, %arg3: memref<1x1x16x128xbf16, #tpu.memory_space<vmem>>, %arg4: memref<1x1x16x128xbf16, #tpu.memory_space<vmem>>, %arg5: memref<1x128xf32, #tpu.memory_space<vmem>>, %arg6: memref<1x128xf32, #tpu.memory_space<vmem>>, %arg7: memref<1152x128xbf16, #tpu.memory_space<vmem>>, %arg8: memref<1x8x16x128xbf16, #tpu.memory_space<vmem>>, %arg9: memref<1x1x2x128xf32, #tpu.memory_space<vmem>>, %arg10: memref<10x18x128xbf16, #tpu.memory_space<vmem>>) attributes {dimension_semantics = [#tpu.dimension_semantics<parallel>, #tpu.dimension_semantics<parallel>], iteration_bounds = array<i64: 2, 2>, scalar_prefetch = 0 : i64, scratch_operands = 1 : i64, tpu.core_type = #tpu.core_type<tc>, window_params = [{transform_indices = @transform_0, window_bounds = array<i64: 1, 8, 16, 128>}, {transform_indices = @transform_1, window_bounds = array<i64: 1, 1, 16, 128>}, {transform_indices = @transform_2, window_bounds = array<i64: 1, 1, 16, 128>}, {pipeline_mode = #tpu.pipeline_mode<synchronous>, transform_indices = @transform_3, window_bounds = array<i64: 1, 128>}, {pipeline_mode = #tpu.pipeline_mode<synchronous>, transform_indices = @transform_4, window_bounds = array<i64: 1, 128>}, {pipeline_mode = #tpu.pipeline_mode<synchronous>, transform_indices = @transform_5, window_bounds = array<i64: 1152, 128>}, {transform_indices = @transform_6, window_bounds = array<i64: 1, 8, 16, 128>}, {transform_indices = @transform_7, window_bounds = array<i64: 1, 1, 2, 128>}]} {
    %cst = arith.constant 0.000000e+00 : bf16
    %0 = vector.broadcast %cst : bf16 to vector<10x1x128xbf16>
    %c0 = arith.constant 0 : index
    %c0_0 = arith.constant 0 : index
    %c0_1 = arith.constant 0 : index
    %1 = vector.load %arg10[%c0, %c0_0, %c0_1] : memref<10x18x128xbf16, #tpu.memory_space<vmem>>, vector<10x1x128xbf16>
    tpu.vector_store %arg10[%c0, %c0_0, %c0_1], %0 {strides = array<i32>} : memref<10x18x128xbf16, #tpu.memory_space<vmem>>, vector<10x1x128xbf16>,
    %c0_2 = arith.constant 0 : index
    %c17 = arith.constant 17 : index
    %c0_3 = arith.constant 0 : index
    %2 = vector.load %arg10[%c0_2, %c17, %c0_3] : memref<10x18x128xbf16, #tpu.memory_space<vmem>>, vector<10x1x128xbf16>
    tpu.vector_store %arg10[%c0_2, %c17, %c0_3], %0 {strides = array<i32>} : memref<10x18x128xbf16, #tpu.memory_space<vmem>>, vector<10x1x128xbf16>,
    %c0_4 = arith.constant 0 : index
    %c0_5 = arith.constant 0 : index
    %c0_6 = arith.constant 0 : index
    %c0_7 = arith.constant 0 : index
    %3 = vector.load %arg2[%c0_4, %c0_5, %c0_6, %c0_7] : memref<1x8x16x128xbf16, #tpu.memory_space<vmem>>, vector<1x8x16x128xbf16>
    %4 = vector.shape_cast %3 : vector<1x8x16x128xbf16> to vector<8x16x128xbf16>
    %5 = arith.extf %4 : vector<8x16x128xbf16> to vector<8x16x128xf32>
    %c0_8 = arith.constant 0 : index
    %c0_9 = arith.constant 0 : index
    %6 = vector.load %arg5[%c0_8, %c0_9] : memref<1x128xf32, #tpu.memory_space<vmem>>, vector<1x128xf32>
    %7 = vector.shape_cast %6 : vector<1x128xf32> to vector<1x1x128xf32>
    %8 = vector.broadcast %7 : vector<1x1x128xf32> to vector<8x16x128xf32>
    %9 = arith.mulf %5, %8 : vector<8x16x128xf32>
    %c0_10 = arith.constant 0 : index
    %c0_11 = arith.constant 0 : index
    %10 = vector.load %arg6[%c0_10, %c0_11] : memref<1x128xf32, #tpu.memory_space<vmem>>, vector<1x128xf32>
    %11 = vector.shape_cast %10 : vector<1x128xf32> to vector<1x1x128xf32>
    %12 = vector.broadcast %11 : vector<1x1x128xf32> to vector<8x16x128xf32>
    %13 = arith.addf %9, %12 : vector<8x16x128xf32>
    %cst_12 = arith.constant 0.000000e+00 : f32
    %14 = vector.broadcast %cst_12 : f32 to vector<8x16x128xf32>
    %15 = arith.maximumf %13, %14 : vector<8x16x128xf32>
    %16 = arith.truncf %15 : vector<8x16x128xf32> to vector<8x16x128xbf16>
    %c1 = arith.constant 1 : index
    %c1_13 = arith.constant 1 : index
    %c0_14 = arith.constant 0 : index
    %17 = vector.load %arg10[%c1, %c1_13, %c0_14] : memref<10x18x128xbf16, #tpu.memory_space<vmem>>, vector<8x16x128xbf16>
    tpu.vector_store %arg10[%c1, %c1_13, %c0_14], %16 {strides = array<i32>} : memref<10x18x128xbf16, #tpu.memory_space<vmem>>, vector<8x16x128xbf16>,
    %c0_15 = arith.constant 0 : index
    %c0_16 = arith.constant 0 : index
    %c0_17 = arith.constant 0 : index
    %c0_18 = arith.constant 0 : index
    %18 = vector.load %arg3[%c0_15, %c0_16, %c0_17, %c0_18] : memref<1x1x16x128xbf16, #tpu.memory_space<vmem>>, vector<1x1x16x128xbf16>
    %19 = vector.shape_cast %18 : vector<1x1x16x128xbf16> to vector<1x16x128xbf16>
    %20 = arith.extf %19 : vector<1x16x128xbf16> to vector<1x16x128xf32>
    %c0_19 = arith.constant 0 : index
    %c0_20 = arith.constant 0 : index
    %21 = vector.load %arg5[%c0_19, %c0_20] : memref<1x128xf32, #tpu.memory_space<vmem>>, vector<1x128xf32>
    %22 = vector.shape_cast %21 : vector<1x128xf32> to vector<1x1x128xf32>
    %23 = vector.broadcast %22 : vector<1x1x128xf32> to vector<1x16x128xf32>
    %24 = arith.mulf %20, %23 : vector<1x16x128xf32>
    %c0_21 = arith.constant 0 : index
    %c0_22 = arith.constant 0 : index
    %25 = vector.load %arg6[%c0_21, %c0_22] : memref<1x128xf32, #tpu.memory_space<vmem>>, vector<1x128xf32>
    %26 = vector.shape_cast %25 : vector<1x128xf32> to vector<1x1x128xf32>
    %27 = vector.broadcast %26 : vector<1x1x128xf32> to vector<1x16x128xf32>
    %28 = arith.addf %24, %27 : vector<1x16x128xf32>
    %cst_23 = arith.constant 0.000000e+00 : f32
    %29 = vector.broadcast %cst_23 : f32 to vector<1x16x128xf32>
    %30 = arith.maximumf %28, %29 : vector<1x16x128xf32>
    %31 = arith.truncf %30 : vector<1x16x128xf32> to vector<1x16x128xbf16>
    %c0_i32 = arith.constant 0 : i32
    %32 = arith.cmpi sgt, %arg1, %c0_i32 : i32
    %33 = arith.extui %32 : i1 to i32
    %34 = arith.sitofp %33 : i32 to f32
    %35 = arith.truncf %34 : f32 to bf16
    %36 = vector.broadcast %35 : bf16 to vector<1x16x128xbf16>
    %37 = arith.mulf %31, %36 : vector<1x16x128xbf16>
    %c0_24 = arith.constant 0 : index
    %c1_25 = arith.constant 1 : index
    %c0_26 = arith.constant 0 : index
    %38 = vector.load %arg10[%c0_24, %c1_25, %c0_26] : memref<10x18x128xbf16, #tpu.memory_space<vmem>>, vector<1x16x128xbf16>
    tpu.vector_store %arg10[%c0_24, %c1_25, %c0_26], %37 {strides = array<i32>} : memref<10x18x128xbf16, #tpu.memory_space<vmem>>, vector<1x16x128xbf16>,
    %c0_27 = arith.constant 0 : index
    %c0_28 = arith.constant 0 : index
    %c0_29 = arith.constant 0 : index
    %c0_30 = arith.constant 0 : index
    %39 = vector.load %arg4[%c0_27, %c0_28, %c0_29, %c0_30] : memref<1x1x16x128xbf16, #tpu.memory_space<vmem>>, vector<1x1x16x128xbf16>
    %40 = vector.shape_cast %39 : vector<1x1x16x128xbf16> to vector<1x16x128xbf16>
    %41 = arith.extf %40 : vector<1x16x128xbf16> to vector<1x16x128xf32>
    %c0_31 = arith.constant 0 : index
    %c0_32 = arith.constant 0 : index
    %42 = vector.load %arg5[%c0_31, %c0_32] : memref<1x128xf32, #tpu.memory_space<vmem>>, vector<1x128xf32>
    %43 = vector.shape_cast %42 : vector<1x128xf32> to vector<1x1x128xf32>
    %44 = vector.broadcast %43 : vector<1x1x128xf32> to vector<1x16x128xf32>
    %45 = arith.mulf %41, %44 : vector<1x16x128xf32>
    %c0_33 = arith.constant 0 : index
    %c0_34 = arith.constant 0 : index
    %46 = vector.load %arg6[%c0_33, %c0_34] : memref<1x128xf32, #tpu.memory_space<vmem>>, vector<1x128xf32>
    %47 = vector.shape_cast %46 : vector<1x128xf32> to vector<1x1x128xf32>
    %48 = vector.broadcast %47 : vector<1x1x128xf32> to vector<1x16x128xf32>
    %49 = arith.addf %45, %48 : vector<1x16x128xf32>
    %cst_35 = arith.constant 0.000000e+00 : f32
    %50 = vector.broadcast %cst_35 : f32 to vector<1x16x128xf32>
    %51 = arith.maximumf %49, %50 : vector<1x16x128xf32>
    %52 = arith.truncf %51 : vector<1x16x128xf32> to vector<1x16x128xbf16>
    %c1_i32 = arith.constant 1 : i32
    %53 = arith.cmpi slt, %arg1, %c1_i32 : i32
    %54 = arith.extui %53 : i1 to i32
    %55 = arith.sitofp %54 : i32 to f32
    %56 = arith.truncf %55 : f32 to bf16
    %57 = vector.broadcast %56 : bf16 to vector<1x16x128xbf16>
    %58 = arith.mulf %52, %57 : vector<1x16x128xbf16>
    %c9 = arith.constant 9 : index
    %c1_36 = arith.constant 1 : index
    %c0_37 = arith.constant 0 : index
    %59 = vector.load %arg10[%c9, %c1_36, %c0_37] : memref<10x18x128xbf16, #tpu.memory_space<vmem>>, vector<1x16x128xbf16>
    tpu.vector_store %arg10[%c9, %c1_36, %c0_37], %58 {strides = array<i32>} : memref<10x18x128xbf16, #tpu.memory_space<vmem>>, vector<1x16x128xbf16>,
    %cst_38 = arith.constant 0.000000e+00 : f32
    %60 = vector.broadcast %cst_38 : f32 to vector<128x128xf32>
    %c0_39 = arith.constant 0 : index
    %c0_40 = arith.constant 0 : index
    %c0_41 = arith.constant 0 : index
    %61 = vector.load %arg10[%c0_39, %c0_40, %c0_41] : memref<10x18x128xbf16, #tpu.memory_space<vmem>>, vector<8x16x128xbf16>
    %62 = vector.shape_cast %61 : vector<8x16x128xbf16> to vector<128x128xbf16>
    %c0_42 = arith.constant 0 : index
    %c0_43 = arith.constant 0 : index
    %63 = vector.load %arg7[%c0_42, %c0_43] : memref<1152x128xbf16, #tpu.memory_space<vmem>>, vector<128x128xbf16>
    %cst_44 = arith.constant dense<0.000000e+00> : vector<128x128xf32>
    %64 = tpu.matmul %62, %63, %cst_44 {dimension_numbers = #tpu.dot_dimension_numbers<[1], [0], [0], [1], [0, 0, 1, 1], [], []>} : vector<128x128xbf16>, vector<128x128xbf16>, vector<128x128xf32> -> vector<128x128xf32>
    %65 = arith.addf %60, %64 : vector<128x128xf32>
    %c0_45 = arith.constant 0 : index
    %c1_46 = arith.constant 1 : index
    %c0_47 = arith.constant 0 : index
    %66 = vector.load %arg10[%c0_45, %c1_46, %c0_47] : memref<10x18x128xbf16, #tpu.memory_space<vmem>>, vector<8x16x128xbf16>
    %67 = vector.shape_cast %66 : vector<8x16x128xbf16> to vector<128x128xbf16>
    %c128 = arith.constant 128 : index
    %c0_48 = arith.constant 0 : index
    %68 = vector.load %arg7[%c128, %c0_48] : memref<1152x128xbf16, #tpu.memory_space<vmem>>, vector<128x128xbf16>
    %cst_49 = arith.constant dense<0.000000e+00> : vector<128x128xf32>
    %69 = tpu.matmul %67, %68, %cst_49 {dimension_numbers = #tpu.dot_dimension_numbers<[1], [0], [0], [1], [0, 0, 1, 1], [], []>} : vector<128x128xbf16>, vector<128x128xbf16>, vector<128x128xf32> -> vector<128x128xf32>
    %70 = arith.addf %65, %69 : vector<128x128xf32>
    %c0_50 = arith.constant 0 : index
    %c2 = arith.constant 2 : index
    %c0_51 = arith.constant 0 : index
    %71 = vector.load %arg10[%c0_50, %c2, %c0_51] : memref<10x18x128xbf16, #tpu.memory_space<vmem>>, vector<8x16x128xbf16>
    %72 = vector.shape_cast %71 : vector<8x16x128xbf16> to vector<128x128xbf16>
    %c256 = arith.constant 256 : index
    %c0_52 = arith.constant 0 : index
    %73 = vector.load %arg7[%c256, %c0_52] : memref<1152x128xbf16, #tpu.memory_space<vmem>>, vector<128x128xbf16>
    %cst_53 = arith.constant dense<0.000000e+00> : vector<128x128xf32>
    %74 = tpu.matmul %72, %73, %cst_53 {dimension_numbers = #tpu.dot_dimension_numbers<[1], [0], [0], [1], [0, 0, 1, 1], [], []>} : vector<128x128xbf16>, vector<128x128xbf16>, vector<128x128xf32> -> vector<128x128xf32>
    %75 = arith.addf %70, %74 : vector<128x128xf32>
    %c1_54 = arith.constant 1 : index
    %c0_55 = arith.constant 0 : index
    %c0_56 = arith.constant 0 : index
    %76 = vector.load %arg10[%c1_54, %c0_55, %c0_56] : memref<10x18x128xbf16, #tpu.memory_space<vmem>>, vector<8x16x128xbf16>
    %77 = vector.shape_cast %76 : vector<8x16x128xbf16> to vector<128x128xbf16>
    %c384 = arith.constant 384 : index
    %c0_57 = arith.constant 0 : index
    %78 = vector.load %arg7[%c384, %c0_57] : memref<1152x128xbf16, #tpu.memory_space<vmem>>, vector<128x128xbf16>
    %cst_58 = arith.constant dense<0.000000e+00> : vector<128x128xf32>
    %79 = tpu.matmul %77, %78, %cst_58 {dimension_numbers = #tpu.dot_dimension_numbers<[1], [0], [0], [1], [0, 0, 1, 1], [], []>} : vector<128x128xbf16>, vector<128x128xbf16>, vector<128x128xf32> -> vector<128x128xf32>
    %80 = arith.addf %75, %79 : vector<128x128xf32>
    %c1_59 = arith.constant 1 : index
    %c1_60 = arith.constant 1 : index
    %c0_61 = arith.constant 0 : index
    %81 = vector.load %arg10[%c1_59, %c1_60, %c0_61] : memref<10x18x128xbf16, #tpu.memory_space<vmem>>, vector<8x16x128xbf16>
    %82 = vector.shape_cast %81 : vector<8x16x128xbf16> to vector<128x128xbf16>
    %c512 = arith.constant 512 : index
    %c0_62 = arith.constant 0 : index
    %83 = vector.load %arg7[%c512, %c0_62] : memref<1152x128xbf16, #tpu.memory_space<vmem>>, vector<128x128xbf16>
    %cst_63 = arith.constant dense<0.000000e+00> : vector<128x128xf32>
    %84 = tpu.matmul %82, %83, %cst_63 {dimension_numbers = #tpu.dot_dimension_numbers<[1], [0], [0], [1], [0, 0, 1, 1], [], []>} : vector<128x128xbf16>, vector<128x128xbf16>, vector<128x128xf32> -> vector<128x128xf32>
    %85 = arith.addf %80, %84 : vector<128x128xf32>
    %c1_64 = arith.constant 1 : index
    %c2_65 = arith.constant 2 : index
    %c0_66 = arith.constant 0 : index
    %86 = vector.load %arg10[%c1_64, %c2_65, %c0_66] : memref<10x18x128xbf16, #tpu.memory_space<vmem>>, vector<8x16x128xbf16>
    %87 = vector.shape_cast %86 : vector<8x16x128xbf16> to vector<128x128xbf16>
    %c640 = arith.constant 640 : index
    %c0_67 = arith.constant 0 : index
    %88 = vector.load %arg7[%c640, %c0_67] : memref<1152x128xbf16, #tpu.memory_space<vmem>>, vector<128x128xbf16>
    %cst_68 = arith.constant dense<0.000000e+00> : vector<128x128xf32>
    %89 = tpu.matmul %87, %88, %cst_68 {dimension_numbers = #tpu.dot_dimension_numbers<[1], [0], [0], [1], [0, 0, 1, 1], [], []>} : vector<128x128xbf16>, vector<128x128xbf16>, vector<128x128xf32> -> vector<128x128xf32>
    %90 = arith.addf %85, %89 : vector<128x128xf32>
    %c2_69 = arith.constant 2 : index
    %c0_70 = arith.constant 0 : index
    %c0_71 = arith.constant 0 : index
    %91 = vector.load %arg10[%c2_69, %c0_70, %c0_71] : memref<10x18x128xbf16, #tpu.memory_space<vmem>>, vector<8x16x128xbf16>
    %92 = vector.shape_cast %91 : vector<8x16x128xbf16> to vector<128x128xbf16>
    %c768 = arith.constant 768 : index
    %c0_72 = arith.constant 0 : index
    %93 = vector.load %arg7[%c768, %c0_72] : memref<1152x128xbf16, #tpu.memory_space<vmem>>, vector<128x128xbf16>
    %cst_73 = arith.constant dense<0.000000e+00> : vector<128x128xf32>
    %94 = tpu.matmul %92, %93, %cst_73 {dimension_numbers = #tpu.dot_dimension_numbers<[1], [0], [0], [1], [0, 0, 1, 1], [], []>} : vector<128x128xbf16>, vector<128x128xbf16>, vector<128x128xf32> -> vector<128x128xf32>
    %95 = arith.addf %90, %94 : vector<128x128xf32>
    %c2_74 = arith.constant 2 : index
    %c1_75 = arith.constant 1 : index
    %c0_76 = arith.constant 0 : index
    %96 = vector.load %arg10[%c2_74, %c1_75, %c0_76] : memref<10x18x128xbf16, #tpu.memory_space<vmem>>, vector<8x16x128xbf16>
    %97 = vector.shape_cast %96 : vector<8x16x128xbf16> to vector<128x128xbf16>
    %c896 = arith.constant 896 : index
    %c0_77 = arith.constant 0 : index
    %98 = vector.load %arg7[%c896, %c0_77] : memref<1152x128xbf16, #tpu.memory_space<vmem>>, vector<128x128xbf16>
    %cst_78 = arith.constant dense<0.000000e+00> : vector<128x128xf32>
    %99 = tpu.matmul %97, %98, %cst_78 {dimension_numbers = #tpu.dot_dimension_numbers<[1], [0], [0], [1], [0, 0, 1, 1], [], []>} : vector<128x128xbf16>, vector<128x128xbf16>, vector<128x128xf32> -> vector<128x128xf32>
    %100 = arith.addf %95, %99 : vector<128x128xf32>
    %c2_79 = arith.constant 2 : index
    %c2_80 = arith.constant 2 : index
    %c0_81 = arith.constant 0 : index
    %101 = vector.load %arg10[%c2_79, %c2_80, %c0_81] : memref<10x18x128xbf16, #tpu.memory_space<vmem>>, vector<8x16x128xbf16>
    %102 = vector.shape_cast %101 : vector<8x16x128xbf16> to vector<128x128xbf16>
    %c1024 = arith.constant 1024 : index
    %c0_82 = arith.constant 0 : index
    %103 = vector.load %arg7[%c1024, %c0_82] : memref<1152x128xbf16, #tpu.memory_space<vmem>>, vector<128x128xbf16>
    %cst_83 = arith.constant dense<0.000000e+00> : vector<128x128xf32>
    %104 = tpu.matmul %102, %103, %cst_83 {dimension_numbers = #tpu.dot_dimension_numbers<[1], [0], [0], [1], [0, 0, 1, 1], [], []>} : vector<128x128xbf16>, vector<128x128xbf16>, vector<128x128xf32> -> vector<128x128xf32>
    %105 = arith.addf %100, %104 : vector<128x128xf32>
    %cst_84 = arith.constant dense<0.000000e+00> : vector<128xf32>
    %106 = vector.multi_reduction <add>, %105, %cst_84 [0] : vector<128x128xf32> to vector<128xf32>
    %107 = vector.shape_cast %106 : vector<128xf32> to vector<1x128xf32>
    %cst_85 = arith.constant 1.000000e+00 : f32
    %cst_86 = arith.constant 1.280000e+02 : f32
    %108 = arith.divf %cst_85, %cst_86 : f32
    %109 = vector.broadcast %108 : f32 to vector<1x128xf32>
    %110 = arith.mulf %107, %109 : vector<1x128xf32>
    %111 = vector.broadcast %110 : vector<1x128xf32> to vector<128x128xf32>
    %112 = arith.subf %105, %111 : vector<128x128xf32>
    %c0_87 = arith.constant 0 : index
    %c0_88 = arith.constant 0 : index
    %c0_89 = arith.constant 0 : index
    %c0_90 = arith.constant 0 : index
    %113 = vector.load %arg9[%c0_87, %c0_88, %c0_89, %c0_90] : memref<1x1x2x128xf32, #tpu.memory_space<vmem>>, vector<1x1x1x128xf32>
    %114 = vector.shape_cast %113 : vector<1x1x1x128xf32> to vector<1x128xf32>
    %115 = vector.shape_cast %107 : vector<1x128xf32> to vector<1x1x1x128xf32>
    tpu.vector_store %arg9[%c0_87, %c0_88, %c0_89, %c0_90], %115 {strides = array<i32>} : memref<1x1x2x128xf32, #tpu.memory_space<vmem>>, vector<1x1x1x128xf32>,
    %116 = arith.mulf %112, %112 : vector<128x128xf32>
    %cst_91 = arith.constant dense<0.000000e+00> : vector<128xf32>
    %117 = vector.multi_reduction <add>, %116, %cst_91 [0] : vector<128x128xf32> to vector<128xf32>
    %118 = vector.shape_cast %117 : vector<128xf32> to vector<1x128xf32>
    %c0_92 = arith.constant 0 : index
    %c0_93 = arith.constant 0 : index
    %c1_94 = arith.constant 1 : index
    %c0_95 = arith.constant 0 : index
    %119 = vector.load %arg9[%c0_92, %c0_93, %c1_94, %c0_95] : memref<1x1x2x128xf32, #tpu.memory_space<vmem>>, vector<1x1x1x128xf32>
    %120 = vector.shape_cast %119 : vector<1x1x1x128xf32> to vector<1x128xf32>
    %121 = vector.shape_cast %118 : vector<1x128xf32> to vector<1x1x1x128xf32>
    tpu.vector_store %arg9[%c0_92, %c0_93, %c1_94, %c0_95], %121 {strides = array<i32>} : memref<1x1x2x128xf32, #tpu.memory_space<vmem>>, vector<1x1x1x128xf32>,
    %122 = vector.shape_cast %105 : vector<128x128xf32> to vector<8x16x128xf32>
    %123 = arith.truncf %122 : vector<8x16x128xf32> to vector<8x16x128xbf16>
    %c0_96 = arith.constant 0 : index
    %c0_97 = arith.constant 0 : index
    %c0_98 = arith.constant 0 : index
    %c0_99 = arith.constant 0 : index
    %124 = vector.load %arg8[%c0_96, %c0_97, %c0_98, %c0_99] : memref<1x8x16x128xbf16, #tpu.memory_space<vmem>>, vector<1x8x16x128xbf16>
    %125 = vector.shape_cast %124 : vector<1x8x16x128xbf16> to vector<8x16x128xbf16>
    %126 = vector.shape_cast %123 : vector<8x16x128xbf16> to vector<1x8x16x128xbf16>
    tpu.vector_store %arg8[%c0_96, %c0_97, %c0_98, %c0_99], %126 {strides = array<i32>} : memref<1x8x16x128xbf16, #tpu.memory_space<vmem>>, vector<1x8x16x128xbf16>,
    return
  }
  func.func @transform_0(%arg0: i32, %arg1: i32) -> (i32, i32, i32, i32) {
    %c0_i32 = arith.constant 0 : i32
    %c0_i32_0 = arith.constant 0 : i32
    %c0_i32_1 = arith.constant 0 : i32
    return %arg0, %arg1, %c0_i32, %c0_i32_0 : i32, i32, i32, i32
  }
  func.func @transform_1(%arg0: i32, %arg1: i32) -> (i32, i32, i32, i32) {
    %c8_i32 = arith.constant 8 : i32
    %0 = arith.muli %arg1, %c8_i32 : i32
    %c1_i32 = arith.constant 1 : i32
    %1 = arith.subi %0, %c1_i32 : i32
    %c0_i32 = arith.constant 0 : i32
    %2 = arith.maxsi %1, %c0_i32 : i32
    %c0_i32_0 = arith.constant 0 : i32
    %c0_i32_1 = arith.constant 0 : i32
    %c0_i32_2 = arith.constant 0 : i32
    return %arg0, %2, %c0_i32_0, %c0_i32_1 : i32, i32, i32, i32
  }
  func.func @transform_2(%arg0: i32, %arg1: i32) -> (i32, i32, i32, i32) {
    %c1_i32 = arith.constant 1 : i32
    %0 = arith.addi %arg1, %c1_i32 : i32
    %c8_i32 = arith.constant 8 : i32
    %1 = arith.muli %0, %c8_i32 : i32
    %c15_i32 = arith.constant 15 : i32
    %2 = arith.minsi %1, %c15_i32 : i32
    %c0_i32 = arith.constant 0 : i32
    %c0_i32_0 = arith.constant 0 : i32
    %c0_i32_1 = arith.constant 0 : i32
    return %arg0, %2, %c0_i32, %c0_i32_0 : i32, i32, i32, i32
  }
  func.func @transform_3(%arg0: i32, %arg1: i32) -> (i32, i32) {
    %c0_i32 = arith.constant 0 : i32
    %c0_i32_0 = arith.constant 0 : i32
    %c0_i32_1 = arith.constant 0 : i32
    return %c0_i32, %c0_i32_0 : i32, i32
  }
  func.func @transform_4(%arg0: i32, %arg1: i32) -> (i32, i32) {
    %c0_i32 = arith.constant 0 : i32
    %c0_i32_0 = arith.constant 0 : i32
    %c0_i32_1 = arith.constant 0 : i32
    return %c0_i32, %c0_i32_0 : i32, i32
  }
  func.func @transform_5(%arg0: i32, %arg1: i32) -> (i32, i32) {
    %c0_i32 = arith.constant 0 : i32
    %c0_i32_0 = arith.constant 0 : i32
    %c0_i32_1 = arith.constant 0 : i32
    return %c0_i32, %c0_i32_0 : i32, i32
  }
  func.func @transform_6(%arg0: i32, %arg1: i32) -> (i32, i32, i32, i32) {
    %c0_i32 = arith.constant 0 : i32
    %c0_i32_0 = arith.constant 0 : i32
    %c0_i32_1 = arith.constant 0 : i32
    return %arg0, %arg1, %c0_i32, %c0_i32_0 : i32, i32, i32, i32
  }
  func.func @transform_7(%arg0: i32, %arg1: i32) -> (i32, i32, i32, i32) {
    %c0_i32 = arith.constant 0 : i32
    %c0_i32_0 = arith.constant 0 : i32
    %c0_i32_1 = arith.constant 0 : i32
    return %arg0, %arg1, %c0_i32, %c0_i32_0 : i32, i32, i32, i32
  }
}

module attributes {stable_mosaic.version = 11 : i64} {
  func.func @_bn_relu_nchw_kernel(%arg0: i32, %arg1: i32, %arg2: memref<1x8x16x128xbf16, #tpu.memory_space<vmem>>, %arg3: memref<1x128xf32, #tpu.memory_space<vmem>>, %arg4: memref<1x128xf32, #tpu.memory_space<vmem>>, %arg5: memref<1x4x128xf32, #tpu.memory_space<vmem>>) attributes {dimension_semantics = [#tpu.dimension_semantics<parallel>, #tpu.dimension_semantics<parallel>], iteration_bounds = array<i64: 2, 2>, scalar_prefetch = 0 : i64, scratch_operands = 0 : i64, tpu.core_type = #tpu.core_type<tc>, window_params = [{transform_indices = @transform_0, window_bounds = array<i64: 1, 8, 16, 128>}, {pipeline_mode = #tpu.pipeline_mode<synchronous>, transform_indices = @transform_1, window_bounds = array<i64: 1, 128>}, {pipeline_mode = #tpu.pipeline_mode<synchronous>, transform_indices = @transform_2, window_bounds = array<i64: 1, 128>}, {transform_indices = @transform_3, window_bounds = array<i64: 1, 4, 128>}]} {
    %c0 = arith.constant 0 : index
    %c0_0 = arith.constant 0 : index
    %c0_1 = arith.constant 0 : index
    %c0_2 = arith.constant 0 : index
    %0 = vector.load %arg2[%c0, %c0_0, %c0_1, %c0_2] : memref<1x8x16x128xbf16, #tpu.memory_space<vmem>>, vector<1x8x16x128xbf16>
    %1 = vector.shape_cast %0 : vector<1x8x16x128xbf16> to vector<8x16x128xbf16>
    %2 = vector.shape_cast %1 : vector<8x16x128xbf16> to vector<128x128xbf16>
    %3 = arith.extf %2 : vector<128x128xbf16> to vector<128x128xf32>
    %c0_3 = arith.constant 0 : index
    %c0_4 = arith.constant 0 : index
    %4 = vector.load %arg3[%c0_3, %c0_4] : memref<1x128xf32, #tpu.memory_space<vmem>>, vector<1x128xf32>
    %5 = vector.broadcast %4 : vector<1x128xf32> to vector<128x128xf32>
    %6 = arith.mulf %3, %5 : vector<128x128xf32>
    %c0_5 = arith.constant 0 : index
    %c0_6 = arith.constant 0 : index
    %7 = vector.load %arg4[%c0_5, %c0_6] : memref<1x128xf32, #tpu.memory_space<vmem>>, vector<1x128xf32>
    %8 = vector.broadcast %7 : vector<1x128xf32> to vector<128x128xf32>
    %9 = arith.addf %6, %8 : vector<128x128xf32>
    %cst = arith.constant 0.000000e+00 : f32
    %10 = vector.broadcast %cst : f32 to vector<128x128xf32>
    %11 = arith.maximumf %9, %10 : vector<128x128xf32>
    %12 = tpu.transpose %11, [1, 0] : vector<128x128xf32> -> vector<128x128xf32>
    %13 = vector.extract_strided_slice %12 {offsets = [0, 0], sizes = [4, 128], strides = [1, 1]} : vector<128x128xf32> to vector<4x128xf32>
    %c0_7 = arith.constant 0 : index
    %c0_8 = arith.constant 0 : index
    %c0_9 = arith.constant 0 : index
    %14 = vector.load %arg5[%c0_7, %c0_8, %c0_9] : memref<1x4x128xf32, #tpu.memory_space<vmem>>, vector<1x4x128xf32>
    %15 = vector.shape_cast %14 : vector<1x4x128xf32> to vector<4x128xf32>
    %16 = vector.shape_cast %13 : vector<4x128xf32> to vector<1x4x128xf32>
    tpu.vector_store %arg5[%c0_7, %c0_8, %c0_9], %16 {strides = array<i32>} : memref<1x4x128xf32, #tpu.memory_space<vmem>>, vector<1x4x128xf32>,
    return
  }
  func.func @transform_0(%arg0: i32, %arg1: i32) -> (i32, i32, i32, i32) {
    %c0_i32 = arith.constant 0 : i32
    %c0_i32_0 = arith.constant 0 : i32
    %c0_i32_1 = arith.constant 0 : i32
    return %arg0, %arg1, %c0_i32, %c0_i32_0 : i32, i32, i32, i32
  }
  func.func @transform_1(%arg0: i32, %arg1: i32) -> (i32, i32) {
    %c0_i32 = arith.constant 0 : i32
    %c0_i32_0 = arith.constant 0 : i32
    %c0_i32_1 = arith.constant 0 : i32
    return %c0_i32, %c0_i32_0 : i32, i32
  }
  func.func @transform_2(%arg0: i32, %arg1: i32) -> (i32, i32) {
    %c0_i32 = arith.constant 0 : i32
    %c0_i32_0 = arith.constant 0 : i32
    %c0_i32_1 = arith.constant 0 : i32
    return %c0_i32, %c0_i32_0 : i32, i32
  }
  func.func @transform_3(%arg0: i32, %arg1: i32) -> (i32, i32, i32) {
    %c0_i32 = arith.constant 0 : i32
    %c0_i32_0 = arith.constant 0 : i32
    return %arg0, %c0_i32, %arg1 : i32, i32, i32
  }
}

</mosaic_0001>

<bundles_post_ra>
// kernel: conv_block_nested_forward.5
= control target key start
LH: loop header
LB: loop body
LE: loop exit
PB: predicated region body
PF: predicated region fallthrough
CT: control target
= control target key end

     0   :  { %s580_s12 = smov 0   ;;  %s582_s13 = smov 0   ;;  %s692_s0 = inlined_call_operand.vmem [shape: bf16[2,16,16,128], index: 0, kind: input, shape index: {}]   ;;  %s693_s1 = inlined_call_operand.vmem [shape: f32[1,128], index: 1, kind: input, shape index: {}]   ;;  %s694_s2 = inlined_call_operand.vmem [shape: f32[1,128], index: 2, kind: input, shape index: {}]   ;;  %s695_s3 = inlined_call_operand.vmem [shape: f32[2,4,256], index: 3, kind: output, shape index: {}]  }
   0x1   :  { %s584_s14 = smov 0   ;;  %s586_s15 = smov 0  }
   0x2   :  { %s588_s16 = smov 0  }
   0x3 LB: > { %s22_s17 = sadd.s32 1, %s550_s14  ;;  %s25_s18 = sadd.s32 1, %s554_s15  ;;  %s558_s16 = sphi %s588_s16, %s13_s16   ;;  %s554_s15 = sphi %s586_s15, %s699_s15   ;;  %s550_s14 = sphi %s584_s14, %s698_s14   ;;  %s546_s13 = sphi %s582_s13, %s697_s13   ;;  %s542_s12 = sphi %s580_s12, %s696_s12  }
   0x4   : > { %p23_p0 = scmp.ge.s32.totalorder %s22_s17, 2  ;;  %p430_p1 = scmp.ge.s32.totalorder %s558_s16, 1 }
   0x5   : > { %p159_p2 = scmp.lt.s32.totalorder %s558_s16, 5 }
   0x6   : > { %s701_s17 = smov (%p23_p0, %s22_s17), 0  ;;  %s703_s18 = smov (!%p23_p0, %s25_s18), %s554_s15 }
   0x7   : > { %p160_p3 = pnand %p430_p1, %p159_p2  ;;  %p27_p4 = scmp.ge.s32.totalorder %s703_s18, 2 }
   0x8   : > { %s431_s19 = sshll.u32 (!%p160_p3), %s542_s12, 3  ;;  %p192_p5 = scmp.lt.s32.totalorder (!%p160_p3), %s546_s13, 1  ;;  %v625_v1 = vld [vmem:[%s693_s1] ss:$0 sm:$0xff] (!%p160_p3) }
   0x9   : > { %s705_s18 = smov (%p27_p4, %s703_s18), 0  ;;  %163 = sbr.rel (%p160_p3) target bundleno = 160 (0xa0), region = 32 }
   0xa   : > { %p194_p6 = scmp.lt.s32.totalorder (!%p160_p3), %s431_s19, 15  ;;  %v631_v6 = vld [vmem:[%s694_s2] ss:$0 sm:$0xff] (!%p160_p3)  ;;  %p204_p7 = scmp.lt.s32.totalorder (!%p160_p3), %s542_s12, 1 }
  0x10   : > { %s707_s13 = smov (!%p192_p5, %s546_s13), 1  ;;  %s709_s19 = smov (!%p194_p6, %s431_s19), 15 }
  0x11   : > { %s433_s20 = sshll.u32 %s707_s13, 5  ;;  %s432_s21 = sshll.u32 %s709_s19, 1 }
  0x12   : > { %s198_s22 = sadd.s32 %s433_s20, %s432_s21  ;;  %s711_s12 = smov (!%p204_p7, %s542_s12), 1 }
  0x13   : > { %s434_s23 = sshll.u32 %s198_s22, 2  ;;  %s435_s4 = sshll.u32 %s707_s13, 1 }
  0x14   : > { %s619_s26 = scalar_lea.vmem %s692_s0, %s434_s23  ;;  %s207_s5 = sadd.s32 %s435_s4, %s711_s12 }
  0x15   : > { %v442_v0 = vld [vmem:[%s619_s26] sm:$0xff]   ;;  %v473_v2 = vld [vmem:[%s619_s26 + $0x8] sm:$0xff]   ;;  %v474_v13 = vld [vmem:[%s619_s26 + $0x10] sm:$0xff]   ;;  %s436_s6 = sshll.u32 %s207_s5, 2 }
  0x16   : > { %v443_v3 = vunpack.c.l.bf16 %v442_v0  ;;  %v444_v4 = vunpack.c.h.bf16 %v442_v0  ;;  %v447_v5 = vunpack.c.l.bf16 %v473_v2  ;;  %v448_v12 = vunpack.c.h.bf16 %v473_v2  ;;  %v475_v23 = vld [vmem:[%s619_s26 + $0x18] sm:$0xff]   ;;  %v476_v32 = vld [vmem:[%s619_s26 + $0x20] sm:$0xff]   ;;  %v477_v41 = vld [vmem:[%s619_s26 + $0x28] sm:$0xff]   ;;  %s209_s9 = scalar_lea.vmem %s695_s3, %s436_s6 }
  0x17   : > { %v451_v18 = vunpack.c.l.bf16 %v474_v13  ;;  %v452_v22 = vunpack.c.h.bf16 %v474_v13  ;;  %v455_v27 = vunpack.c.l.bf16 %v475_v23  ;;  %v456_v31 = vunpack.c.h.bf16 %v475_v23  ;;  %v478_v50 = vld [vmem:[%s619_s26 + $0x30] sm:$0xff]   ;;  %v479_v59 = vld [vmem:[%s619_s26 + $0x38] sm:$0xff]  }
  0x18   : > { %v249_v7 = vmul.f32 %v443_v3, %v625_v1  ;;  %v250_v8 = vmul.f32 %v444_v4, %v625_v1  ;;  %v251_v11 = vmul.f32 %v447_v5, %v625_v1  ;;  %v252_v17 = vmul.f32 %v448_v12, %v625_v1 }
  0x19   : > { %v253_v21 = vmul.f32 %v451_v18, %v625_v1  ;;  %v254_v26 = vmul.f32 %v452_v22, %v625_v1  ;;  %v255_v30 = vmul.f32 %v455_v27, %v625_v1  ;;  %v256_v35 = vmul.f32 %v456_v31, %v625_v1 }
  0x1a   : > { %v272_v9 = vadd.f32 %v631_v6, %v249_v7  ;;  %v273_v10 = vadd.f32 %v631_v6, %v250_v8  ;;  %v274_v16 = vadd.f32 %v631_v6, %v251_v11  ;;  %v275_v20 = vadd.f32 %v631_v6, %v252_v17 }
  0x1b   : > { %v276_v25 = vadd.f32 %v631_v6, %v253_v21  ;;  %v277_v29 = vadd.f32 %v631_v6, %v254_v26  ;;  %v278_v34 = vadd.f32 %v631_v6, %v255_v30  ;;  %v459_v36 = vunpack.c.l.bf16 %v476_v32 }
  0x1c   : > { %v288_v14 = vmax.f32 %v272_v9, 0.0  ;;  %v289_v15 = vmax.f32 %v273_v10, 0.0  ;;  %v290_v19 = vmax.f32 %v274_v16, 0.0  ;;  %v291_v24 = vmax.f32 %v275_v20, 0.0 }
  0x1d   : > { %v292_v28 = vmax.f32 %v276_v25, 0.0  ;;  %v293_v33 = vmax.f32 %v277_v29, 0.0  ;;  %v294_v37 = vmax.f32 %v278_v34, 0.0  ;;  %v279_v38 = vadd.f32 %v631_v6, %v256_v35 }
  0x1e   : > { %304 = vxpose.xlu0.b32.start [1/16] (narrow) %v288_v14, 8  ;;  %v257_v39 = vmul.f32 %v459_v36, %v625_v1  ;;  %v460_v40 = vunpack.c.h.bf16 %v476_v32  ;;  %v463_v45 = vunpack.c.l.bf16 %v477_v41  ;;  %v464_v49 = vunpack.c.h.bf16 %v477_v41 }
  0x1f   : > { %v295_v42 = vmax.f32 %v279_v38, 0.0  ;;  %v467_v54 = vunpack.c.l.bf16 %v478_v50  ;;  %v468_v58 = vunpack.c.h.bf16 %v478_v50  ;;  %v471_v63 = vunpack.c.l.bf16 %v479_v59 }
  0x20   : > { %v280_v43 = vadd.f32 %v631_v6, %v257_v39  ;;  %v258_v44 = vmul.f32 %v460_v40, %v625_v1  ;;  %v259_v48 = vmul.f32 %v463_v45, %v625_v1  ;;  %v260_v53 = vmul.f32 %v464_v49, %v625_v1 }
  0x21   : > { %v261_v57 = vmul.f32 %v467_v54, %v625_v1  ;;  %v262_v62 = vmul.f32 %v468_v58, %v625_v1  ;;  %v263_v3 = vmul.f32 %v471_v63, %v625_v1  ;;  %v472_v4 = vunpack.c.h.bf16 %v479_v59 }
  0x22   : > { %305 = vxpose.xlu0.b32.cont [2/16] (narrow) %v289_v15, 8  ;;  %v296_v46 = vmax.f32 %v280_v43, 0.0  ;;  %v281_v47 = vadd.f32 %v631_v6, %v258_v44  ;;  %v282_v52 = vadd.f32 %v631_v6, %v259_v48  ;;  %v283_v56 = vadd.f32 %v631_v6, %v260_v53 }
  0x23   : > { %v284_v61 = vadd.f32 %v631_v6, %v261_v57  ;;  %v285_v2 = vadd.f32 %v631_v6, %v262_v62  ;;  %v286_v7 = vadd.f32 %v631_v6, %v263_v3  ;;  %v264_v8 = vmul.f32 %v472_v4, %v625_v1 }
  0x24   : > { %v297_v51 = vmax.f32 %v281_v47, 0.0  ;;  %v298_v55 = vmax.f32 %v282_v52, 0.0  ;;  %v299_v60 = vmax.f32 %v283_v56, 0.0 }
  0x25   : > { %v300_v0 = vmax.f32 %v284_v61, 0.0  ;;  %v301_v5 = vmax.f32 %v285_v2, 0.0  ;;  %v302_v9 = vmax.f32 %v286_v7, 0.0  ;;  %v287_v10 = vadd.f32 %v631_v6, %v264_v8 }
  0x26   : > { %306 = vxpose.xlu0.b32.cont [3/16] (narrow) %v290_v19, 8 }
  0x27   : > { %v303_v11 = vmax.f32 %v287_v10, 0.0 }
  0x2a   : > { %307 = vxpose.xlu0.b32.cont [4/16] (narrow) %v291_v24, 8 }
  0x2e   : > { %308 = vxpose.xlu0.b32.cont [5/16] (narrow) %v292_v28, 8 }
  0x32   : > { %309 = vxpose.xlu0.b32.cont [6/16] (narrow) %v293_v33, 8 }
  0x36   : > { %310 = vxpose.xlu0.b32.cont [7/16] (narrow) %v294_v37, 8 }
  0x3a   : > { %311 = vxpose.xlu0.b32.cont [8/16] (narrow) %v295_v42, 8 }
  0x3e   : > { %312 = vxpose.xlu0.b32.cont [9/16] (narrow) %v296_v46, 8 }
  0x42   : > { %313 = vxpose.xlu0.b32.cont [10/16] (narrow) %v297_v51, 8 }
  0x46   : > { %314 = vxpose.xlu0.b32.cont [11/16] (narrow) %v298_v55, 8 }
  0x4a   : > { %315 = vxpose.xlu0.b32.cont [12/16] (narrow) %v299_v60, 8 }
  0x4e   : > { %316 = vxpose.xlu0.b32.cont [13/16] (narrow) %v300_v0, 8 }
  0x52   : > { %317 = vxpose.xlu0.b32.cont [14/16] (narrow) %v301_v5, 8 }
  0x56   : > { %318 = vxpose.xlu0.b32.cont [15/16] (narrow) %v302_v9, 8 }
  0x5a   : > { %319 = vxpose.xlu0.b32.end [16/16] (narrow) %v303_v11, 8 }
  0x9e   : > { %v320_v12 = vpop.trf.xlu0 }
  0x9f   : > { %336 = vst [vmem:[%s209_s9] sm:$0xf] %v320_v12 }
  0xa0 PF: > { %s13_s16 = sadd.s32 1, %s558_s16   ;;  %s696_s12 = smov %s550_s14 }
  0xa1   : > { %p10_p8 = scmp.ge.s32.totalorder %s13_s16, 6   ;;  %s697_s13 = smov %s554_s15 }
  0xa2   : > { %s698_s14 = smov %s701_s17  ;;  %s699_s15 = smov %s705_s18 }
  0xa3   :  { %12 = sbr.rel (!%p10_p8) target bundleno = 3 (0x3), region = 62 }

// kernel: conv_block_nested_forward.3
= control target key start
LH: loop header
LB: loop body
LE: loop exit
PB: predicated region body
PF: predicated region fallthrough
CT: control target
= control target key end

     0   :  { %s4436_s18 = smov 0   ;;  %s4438_s19 = smov 0   ;;  %s5641_s0 = inlined_call_operand.vmem [shape: bf16[2,16,16,4], index: 0, kind: input, shape index: {}, may-alias: {0,1,2}]   ;;  %s5642_s1 = inlined_call_operand.vmem [shape: bf16[2,16,16,4], index: 1, kind: input, shape index: {}, may-alias: {0,1,2}]   ;;  %s5643_s2 = inlined_call_operand.vmem [shape: bf16[2,16,16,4], index: 2, kind: input, shape index: {}, may-alias: {0,1,2}]   ;;  %s5644_s3 = inlined_call_operand.vmem [shape: bf16[36,128], index: 3, kind: input, shape index: {}]   ;;  %s5645_s4 = inlined_call_operand.vmem [shape: bf16[2,16,16,128], index: 4, kind: output, shape index: {0}]   ;;  %s5646_s5 = inlined_call_operand.vmem [shape: f32[2,2,2,128], index: 5, kind: output, shape index: {1}]  }
   0x1   :  { %s4440_s20 = smov 0   ;;  %s4442_s21 = smov 0  }
   0x2   :  { %s4444_s22 = smov 0  }
   0x3 LB: > { %s25_s23 = sadd.s32 1, %s4396_s20  ;;  %s28_s24 = sadd.s32 1, %s4400_s21  ;;  %s4404_s22 = sphi %s4444_s22, %s16_s22   ;;  %s4400_s21 = sphi %s4442_s21, %s5692_s21   ;;  %s4396_s20 = sphi %s4440_s20, %s5691_s20   ;;  %s4392_s19 = sphi %s4438_s19, %s5690_s19   ;;  %s4388_s18 = sphi %s4436_s18, %s5689_s18  }
   0x4   : > { %p26_p0 = scmp.ge.s32.totalorder %s25_s23, 2  ;;  %p3632_p1 = scmp.ge.s32.totalorder %s4404_s22, 1 }
   0x5   : > { %p278_p2 = scmp.lt.s32.totalorder %s4404_s22, 5 }
   0x6   : > { %s5694_s23 = smov (%p26_p0, %s25_s23), 0  ;;  %s5696_s24 = smov (!%p26_p0, %s28_s24), %s4400_s21 }
   0x7   : > { %p279_p3 = pnand %p3632_p1, %p278_p2  ;;  %p30_p4 = scmp.ge.s32.totalorder %s5696_s24, 2 }
   0x9   : > { %s5698_s24 = smov (%p30_p4, %s5696_s24), 0  ;;  %282 = sbr.rel (%p279_p3) target bundleno = 537 (0x219), region = 36 }
  0x10   : > { %vm1089_vm0 = vcmask 1041408   ;;  %v2019_v0 = vld [vmem:[%s5644_s3 + $0x8] sm:$0x3]  ;;  %s4472_s27 = sshll.u32 %s4388_s18, 3  ;;  %p351_p5 = scmp.lt.s32.totalorder %s4392_s19, 1  ;;  %vm415_vm1 = vcmask 24576  }
  0x11   : > { %4298 = vmatprep.subr.msk.bf16.mxu0 %vm1089_vm0, %v2019_v0  ;;  %v4476_v1 = vsel %vm1089_vm0, %v2019_v0, 0  ;;  %p353_p6 = scmp.lt.s32.totalorder %s4472_s27, 15  ;;  %vm416_vm2 = vsmask.f32 256  ;;  %v421_v2 = vld [vmem:[#allocation2 + $0xc] sm:$0x1] }
  0x12   : > { %4075 = vmatpush3.bf16.msra.mxu0 %v4476_v1  ;;  %s5700_s19 = smov (!%p351_p5, %s4392_s19), 1  ;;  %vm4483_vm3 = vmand %vm415_vm1, %vm416_vm2  ;;  %vm448_vm4 = vsmask.f32 7938  ;;  %v453_v4 = vld [vmem:[#allocation2 + $0x14] sm:$0x1]  ;;  %vm659_vm7 = vcmask 27648  }
  0x13   : > { %s354_s28 = scalar_select %p353_p6, %s4472_s27, 15  ;;  %v422_v5 = vsel %vm4483_vm3, 0, %v421_v2  ;;  %vm4491_vm5 = vmand %vm415_vm1, %vm448_vm4  ;;  %v424_v8 = vld [vmem:[#allocation2 + $0x18] sm:$0x1]  ;;  %v456_v9 = vld [vmem:[#allocation2 + $0x20] sm:$0x1] }
  0x14   : > { %s4496_s29 = sshll.u32 %s5700_s19, 5  ;;  %423 = vst [vmem:[#allocation2 + $0xc] sm:$0x1] %v422_v5  ;;  %v454_v7 = vsel %vm4491_vm5, 0, %v453_v4  ;;  %v425_v10 = vsel %vm4483_vm3, 0, %v424_v8  ;;  %v457_v11 = vsel %vm4491_vm5, 0, %v456_v9  ;;  %vm4539_vm9 = vmand %vm659_vm7, %vm448_vm4 }
  0x15   : > { %s3634_s30 = sshll.u32 %s354_s28, 1  ;;  %455 = vst [vmem:[#allocation2 + $0x14] sm:$0x1] %v454_v7  ;;  %v427_v12 = vld [vmem:[#allocation2 + $0x24] sm:$0x1]  ;;  %s4521_s13 = sadd.s32 4294967295, %s4472_s27 }
  0x16   : > { %s4501_s6 = sadd.s32 %s4496_s29, %s3634_s30  ;;  %vm496_vm6 = vsmask.f32 4368  ;;  %426 = vst [vmem:[#allocation2 + $0x18] sm:$0x1] %v425_v10  ;;  %458 = vst [vmem:[#allocation2 + $0x20] sm:$0x1] %v457_v11 }
  0x17   : > { %s3636_s7 = sshll.u32 %s4501_s6, 2  ;;  %v428_v13 = vsel %vm4483_vm3, 0, %v427_v12  ;;  %v4344_v14 = vld [vmem:[%s5644_s3] ss:$0 sps:$4 sm:$0xcc]   ;;  %p363_p7 = scmp.gt.s32.totalorder %s4521_s13, 0  ;;  %vm4531_vm8 = vmor %vm416_vm2, %vm496_vm6 }
  0x18   : > { %s4515_s10 = scalar_lea.vmem %s5641_s0, %s3636_s7  ;;  %429 = vst [vmem:[#allocation2 + $0x24] sm:$0x1] %v428_v13  ;;  %v459_v15 = vld [vmem:[#allocation2 + $0x2c] sm:$0x1]  ;;  %p3639_p8 = scmp.lt.s32.totalorder %s4521_s13, 15  ;;  %v1063_v32 = vrot.slane %v4344_v14, 2 }
  0x19   : > { %v480_v16 = vld [vmem:[%s4515_s10] sm:$0xf]  ;;  %v481_v17 = vld [vmem:[%s4515_s10 + $0x4] sm:$0xf]  ;;  %v482_v18 = vld [vmem:[%s4515_s10 + $0x8] sm:$0xf] }
  0x1a   : > { %v499_v19 = vshrl.u32 %v480_v16, 16  ;;  %v502_v20 = vshll.u32 %v480_v16, 16  ;;  %v507_v21 = vshrl.u32 %v481_v17, 16  ;;  %v510_v22 = vshll.u32 %v481_v17, 16  ;;  %v483_v23 = vld [vmem:[%s4515_s10 + $0xc] sm:$0xf]  ;;  %4294 = vmatprep.subr.msk.bf16.mxu1 %vm1089_vm0, %v1063_v32 }
  0x1b   : > { %v516_v24 = vshrl.u32 %v482_v18, 16  ;;  %v519_v25 = vshll.u32 %v482_v18, 16  ;;  %v524_v26 = vshrl.u32 %v483_v23, 16  ;;  %v527_v27 = vshll.u32 %v483_v23, 16  ;;  %v661_v31 = vld [vmem:[#allocation2 + $0xc] sm:$0xf] }
  0x1c   : > { %v501_v29 = vrot.slane %v499_v19, 7  ;;  %v509_v30 = vrot.slane %v507_v21, 7  ;;  %v460_v33 = vsel %vm4491_vm5, 0, %v459_v15  ;;  %v666_v35 = vld [vmem:[#allocation2 + $0x14] sm:$0x1]  ;;  %s364_s14 = scalar_select %p363_p7, %s4521_s13, 0 }
  0x1d   : > { %v518_v36 = vrot.slane %v516_v24, 7  ;;  %v526_v37 = vrot.slane %v524_v26, 7  ;;  %461 = vst [vmem:[#allocation2 + $0x2c] sm:$0x1] %v460_v33  ;;  %v484_v38 = vld [vmem:[%s4515_s10 + $0x10] sm:$0xf] }
  0x1e   : > { %v418_v39 = vld [vmem:[#allocation2] sm:$0x1]  ;;  %v504_v40 = vor.u32 %v502_v20, %v501_v29  ;;  %v505_v41 = vrot.slane %v501_v29, 4  ;;  %v512_v42 = vor.u32 %v510_v22, %v509_v30  ;;  %v514_v43 = vrot.slane %v509_v30, 4  ;;  %v669_v44 = vld [vmem:[#allocation2 + $0x18] sm:$0xf] }
  0x1f   : > { %v673_v45 = vld [vmem:[#allocation2 + $0x20] sm:$0x1]  ;;  %v450_v46 = vld [vmem:[#allocation2 + $0x8] sm:$0x1]  ;;  %v521_v47 = vor.u32 %v519_v25, %v518_v36  ;;  %v522_v48 = vrot.slane %v518_v36, 4  ;;  %v529_v49 = vor.u32 %v527_v27, %v526_v37  ;;  %v531_v50 = vrot.slane %v526_v37, 4 }
  0x20   : > { %v485_v51 = vld [vmem:[%s4515_s10 + $0x14] sm:$0xf]  ;;  %v513_v52 = vsel %vm4531_vm8, %v505_v41, %v512_v42  ;;  %v662_v53 = vsel %vm4539_vm9, %v504_v40, %v661_v31  ;;  %v667_v54 = vsel %vm4483_vm3, %v514_v43, %v666_v35  ;;  %v1091_v55 = vsel %vm1089_vm0, %v1063_v32, 0  ;;  %p720_p9 = scmp.gt.s32.totalorder %s4388_s18, 0  ;;  %v4560_v56 = vld [vmem:[%s5644_s3] sm:$0x3] }
  0x21   : > { %v430_v57 = vld [vmem:[#allocation2 + $0x30] sm:$0x1]  ;;  %663 = vst [vmem:[#allocation2 + $0xc] sm:$0xf] %v662_v53  ;;  %665 = vst.msk [vmem:[#allocation2 + $0x10] sm:$0xf] %vm659_vm7, %v513_v52  ;;  %v530_v58 = vsel %vm4531_vm8, %v522_v48, %v529_v49  ;;  %v670_v59 = vsel %vm4539_vm9, %v521_v47, %v669_v44  ;;  %v674_v60 = vsel %vm4483_vm3, %v531_v50, %v673_v45  ;;  %4003 = vmatpush3.bf16.msra.mxu1 %v1091_v55 }
  0x22   : > { %668 = vst [vmem:[#allocation2 + $0x14] sm:$0x1] %v667_v54  ;;  %v533_v61 = vshrl.u32 %v484_v38, 16  ;;  %v462_v62 = vld [vmem:[#allocation2 + $0x38] sm:$0x1]  ;;  %v536_v0 = vshll.u32 %v484_v38, 16  ;;  %4295 = vmatprep.subr.msk.bf16.mxu1 %vm1089_vm0, %v4560_v56 }
  0x23   : > { %v486_v63 = vld [vmem:[%s4515_s10 + $0x18] sm:$0xf]  ;;  %671 = vst [vmem:[#allocation2 + $0x18] sm:$0xf] %v670_v59  ;;  %672 = vst.msk [vmem:[#allocation2 + $0x1c] sm:$0xf] %vm659_vm7, %v530_v58 }
  0x24   : > { %675 = vst [vmem:[#allocation2 + $0x20] sm:$0x1] %v674_v60  ;;  %v541_v2 = vshrl.u32 %v485_v51, 16  ;;  %v544_v4 = vshll.u32 %v485_v51, 16  ;;  %v419_v5 = vsel %vm4483_vm3, 0, %v418_v39  ;;  %v535_v7 = vrot.slane %v533_v61, 7 }
  0x25   : > { %s721_s17 = scalar_select %p720_p9, 1, 0  ;;  %vm840_vm10 = vsmask.f32 3328  ;;  %420 = vst [vmem:[#allocation2] sm:$0x1] %v419_v5 }
  0x26   : > { %s5702_s14 = smov (!%p3639_p8, %s364_s14), 15  ;;  %v451_v8 = vsel %vm4491_vm5, 0, %v450_v46  ;;  %v431_v9 = vsel %vm4483_vm3, 0, %v430_v57  ;;  %v463_v10 = vsel %vm4491_vm5, 0, %v462_v62  ;;  %v543_v11 = vrot.slane %v541_v2, 7  ;;  %p408_p12 = scmp.lt.s32.totalorder %s4388_s18, 1 }
  0x27   : > { %v676_v12 = vld [vmem:[#allocation2 + $0x24] sm:$0xf]  ;;  %452 = vst [vmem:[#allocation2 + $0x8] sm:$0x1] %v451_v8  ;;  %s4587_s25 = scvt.s32.f32 %s721_s17  ;;  %432 = vst [vmem:[#allocation2 + $0x30] sm:$0x1] %v431_v9  ;;  %v538_v15 = vor.u32 %v536_v0, %v535_v7 }
  0x28   : > { %464 = vst [vmem:[#allocation2 + $0x38] sm:$0x1] %v463_v10  ;;  %v4590_v13 = vld [vmem:[%s4515_s10 + $0x1c] sm:$0xf]  ;;  %v550_v14 = vshrl.u32 %v486_v63, 16  ;;  %v539_v16 = vrot.slane %v535_v7, 4  ;;  %v546_v19 = vor.u32 %v544_v4, %v543_v11 }
  0x29   : > { %v680_v17 = vld [vmem:[#allocation2 + $0x2c] sm:$0x1]  ;;  %v553_v18 = vshll.u32 %v486_v63, 16  ;;  %v548_v20 = vrot.slane %v543_v11, 4  ;;  %v558_v22 = vshrl.u32 %v4590_v13, 16  ;;  %v677_v23 = vsel %vm4539_vm9, %v538_v15, %v676_v12  ;;  %s3644_s26 = sshll.u32 %s5702_s14, 1  ;;  %p724_p10 = scmp.ne.f32.partialorder %s4587_s25, %s4587_s25 }
  0x2a   : > { %v4592_v21 = vrot.slane %v550_v14, 7  ;;  %vm841_vm11 = vsmask.f32 7440  ;;  %s725_s28 = sshrl.u32 %s4587_s25, 16  ;;  %v561_v24 = vshll.u32 %v4590_v13, 16  ;;  %v547_v29 = vsel %vm4531_vm8, %v539_v16, %v546_v19  ;;  %s4615_s30 = sadd.s32 %s3644_s26, %s4496_s29 }
  0x2b   : > { %v1803_v25 = vld [vmem:[#allocation2 + $0xc] sm:$0xf]  ;;  %v4600_v26 = vld [vmem:[#allocation2 + $0x10] sm:$0xf]  ;;  %v4602_v27 = vld [vmem:[#allocation2 + $0x14] sm:$0x1]  ;;  %v681_v30 = vsel %vm4483_vm3, %v548_v20, %v680_v17 }
  0x2c   : > { %678 = vst [vmem:[#allocation2 + $0x24] sm:$0xf] %v677_v23  ;;  %vm1064_vm12 = vcmask 31744   ;;  %v1828_v31 = vshrl.u32 %v1803_v25, 16  ;;  %v1831_v32 = vshll.u32 %v1803_v25, 16  ;;  %v1837_v33 = vshll.u32 %v4600_v26, 16  ;;  %vm4632_vm13 = vmor %vm840_vm10, %vm841_vm11 }
  0x2d   : > { %v1841_v35 = vshrl.u32 %v4600_v26, 16  ;;  %v1806_v36 = vld [vmem:[#allocation2 + $0x18] sm:$0xf]  ;;  %679 = vst.msk [vmem:[#allocation2 + $0x28] sm:$0xf] %vm659_vm7, %v547_v29  ;;  %v1847_v37 = vshll.u32 %v4602_v27, 16  ;;  %v4618_v40 = vor.u32 %v553_v18, %v4592_v21 }
  0x2e   : > { %682 = vst [vmem:[#allocation2 + $0x2c] sm:$0x1] %v681_v30  ;;  %v4612_v38 = vld [vmem:[#allocation2 + $0x1c] sm:$0xf]  ;;  %v1852_v39 = vshrl.u32 %v1806_v36, 16  ;;  %v4620_v41 = vrot.slane %v558_v22, 7 }
  0x2f   : > { %v1830_v42 = vrot.slane %v1828_v31, 4  ;;  %v1833_v43 = vrot.slane %v1831_v32, 5  ;;  %v1839_v44 = vrot.slane %v1837_v33, 5  ;;  %v1843_v45 = vrot.slane %v1841_v35, 4  ;;  %v4622_v46 = vld [vmem:[#allocation2 + $0x20] sm:$0x1] }
  0x30   : > { %v1849_v47 = vrot.slane %v1847_v37, 5  ;;  %v1854_v48 = vrot.slane %v1852_v39, 4  ;;  %v1855_v49 = vshll.u32 %v1806_v36, 16  ;;  %v1861_v50 = vshll.u32 %v4612_v38, 16  ;;  %s726_s8 = sand.u32 1, %s725_s28  ;;  %s3646_s9 = sshll.u32 %s4615_s30, 2 }
  0x31   : > { %v1834_v51 = vor.u32 %v1833_v43, %v1830_v42  ;;  %v1844_v52 = vor.u32 %v1843_v45, %v1839_v44  ;;  %v1865_v53 = vshrl.u32 %v4612_v38, 16  ;;  %v1871_v54 = vshll.u32 %v4622_v46, 16  ;;  %s727_s11 = sadd.s32 32767, %s726_s8  ;;  %s373_s15 = scalar_lea.vmem %s5642_s1, %s3646_s9  ;;  %v4657_v15 = vld [vmem:[%s5644_s3 + $0x8] ss:$0 sps:$4 sm:$0xcc]  }
  0x32   : > { %v2218_v57 = vrot.slane %v4600_v26, 5  ;;  %v2221_v58 = vrot.slane %v4602_v27, 5  ;;  %v1857_v59 = vrot.slane %v1855_v49, 5  ;;  %v1863_v60 = vrot.slane %v1861_v50, 5  ;;  %s728_s12 = sadd.s32 %s727_s11, %s4587_s25  ;;  %s3857_s28 = sadd.s32 8, %s4472_s27 }
  0x33   : > { %v1835_v61 = vrot.slane %v1834_v51, 4  ;;  %v1845_v62 = vrot.slane %v1844_v52, 4  ;;  %v1867_v63 = vrot.slane %v1865_v53, 4  ;;  %v2225_v0 = vrot.slane %v4612_v38, 5  ;;  %v1809_v2 = vld [vmem:[#allocation2 + $0x24] sm:$0xf] }
  0x34   : > { %v1858_v4 = vor.u32 %v1857_v59, %v1854_v48  ;;  %v1873_v5 = vrot.slane %v1871_v54, 5  ;;  %v4642_v7 = vld [vmem:[#allocation2 + $0x28] sm:$0xf]  ;;  %v1876_v9 = vshrl.u32 %v1809_v2, 16  ;;  %v563_v10 = vor.u32 %v561_v24, %v4620_v41  ;;  %s729_s16 = sand.u32 4294901760, %s728_s12  ;;  %p4677_p11 = scmp.lt.s32.totalorder %s3857_s28, 15 }
  0x35   : > { %v4644_v8 = vld [vmem:[#allocation2 + $0x2c] sm:$0x1]  ;;  %v1840_v11 = vsel %vm4632_vm13, %v1835_v61, %v1839_v44  ;;  %v1850_v12 = vsel %vm4632_vm13, %v1845_v62, %v1849_v47  ;;  %v1868_v13 = vor.u32 %v1867_v63, %v1863_v60  ;;  %v1879_v14 = vshll.u32 %v1809_v2, 16  ;;  %s5704_s16 = smov (%p724_p10, %s729_s16), 2143289344  ;;  %v683_v20 = vld [vmem:[#allocation2 + $0x30] sm:$0xf] }
  0x36   : > { %v3734_v16 = vcombine.low %v1840_v11, %v1850_v12  ;;  %v1859_v17 = vrot.slane %v1858_v4, 4  ;;  %v1878_v18 = vrot.slane %v1876_v9, 4  ;;  %v1885_v19 = vshll.u32 %v4642_v7, 16  ;;  %v718_v29 = vld [vmem:[%s373_s15] sm:$0xf]  ;;  %s732_s30 = sshrl.u32 %s5704_s16, 16 }
  0x37   : > { %v1869_v22 = vrot.slane %v1868_v13, 4  ;;  %v1881_v23 = vrot.slane %v1879_v14, 5  ;;  %v1889_v24 = vshrl.u32 %v4642_v7, 16  ;;  %v1895_v25 = vshll.u32 %v4644_v8, 16  ;;  %v687_v30 = vld [vmem:[#allocation2 + $0x38] sm:$0x1] }
  0x38   : > { %4076 = vmatprep.mubr.msk.bf16.mxu0 %vm1064_vm12, %v3734_v16  ;;  %v1864_v31 = vsel %vm4632_vm13, %v1859_v17, %v1863_v60  ;;  %v1887_v32 = vrot.slane %v1885_v19, 5  ;;  %v719_v33 = vld [vmem:[%s373_s15 + $0x4] sm:$0xf]  ;;  %v556_v35 = vrot.slane %v4592_v21, 4  ;;  %v565_v36 = vrot.slane %v4620_v41, 4  ;;  %s733_s25 = sshll.u32 %s732_s30, 16 }
  0x39   : > { %v1874_v37 = vsel %vm4632_vm13, %v1869_v22, %v1873_v5  ;;  %v1882_v39 = vor.u32 %v1881_v23, %v1878_v18  ;;  %v1891_v42 = vrot.slane %v1889_v24, 4  ;;  %v1897_v43 = vrot.slane %v1895_v25, 5  ;;  %v4673_v44 = vld [vmem:[#allocation2 + $0xc] sm:$0xf]  ;;  %s734_s9 = sor.u32 %s733_s25, %s732_s30  ;;  %v4688_v48 = vld [vmem:[#allocation2 + $0x10] sm:$0xf] }
  0x3a   : > { %v3735_v45 = vcombine.low %v1864_v31, %v1874_v37  ;;  %v564_v21 = vsel %vm4531_vm8, %v556_v35, %v563_v10  ;;  %v684_v41 = vsel %vm4539_vm9, %v4618_v40, %v683_v20  ;;  %v688_v47 = vsel %vm4483_vm3, %v565_v36, %v687_v30  ;;  %s5706_s28 = smov (!%p4677_p11, %s3857_s28), 15  ;;  %v4706_v10 = vld [vmem:[#allocation2 + $0x14] sm:$0x1]  ;;  %v759_v20 = vld [vmem:[#allocation2] sm:$0xf]  ;;  %s5712_s18 = smov (!%p408_p12, %s4388_s18), 1 }
  0x3b   : > { %v1883_v49 = vrot.slane %v1882_v39, 4  ;;  %v1892_v50 = vor.u32 %v1891_v42, %v1887_v32  ;;  %v735_v51 = vstv %s734_s9  ;;  %685 = vst [vmem:[#allocation2 + $0x30] sm:$0xf] %v684_v41  ;;  %686 = vst.msk [vmem:[#allocation2 + $0x34] sm:$0xf] %vm659_vm7, %v564_v21  ;;  %v2300_v52 = vrot.slane %v4657_v15, 2 }
  0x3c   : > { %689 = vst [vmem:[#allocation2 + $0x38] sm:$0x1] %v688_v47  ;;  %4077 = vmatmul.mubr.msk.bf16.vlgmr.msra.gmra.mrb[0].mxu0 %vm1064_vm12, %v3735_v45  ;;  %v737_v53 = vmul.bf16 %v735_v51, %v718_v29  ;;  %v738_v40 = vmul.bf16 %v735_v51, %v719_v33  ;;  %v868_v54 = vshrl.u32 %v4673_v44, 16  ;;  %v871_v59 = vshll.u32 %v4673_v44, 16  ;;  %s5708_s28 = smov (!%p4677_p11, %s5706_s28), 15  ;;  %s3658_s6 = sshll.u32 %s5700_s19, 1 }
  0x3d   : > { %v1888_v60 = vsel %vm4632_vm13, %v1883_v49, %v1887_v32  ;;  %v1893_v61 = vrot.slane %v1892_v50, 4  ;;  %4300 = vmatprep.subr.msk.bf16.mxu0 %vm1089_vm0, %v2300_v52  ;;  %v877_v62 = vshll.u32 %v4688_v48, 16  ;;  %v881_v63 = vshrl.u32 %v4688_v48, 16  ;;  %v763_v22 = vld [vmem:[#allocation2 + $0x8] sm:$0x1]  ;;  %s4720_s27 = sshll.u32 %s5708_s28, 1 }
  0x3e   : > { %v740_v2 = vshrl.u32 %v737_v53, 16  ;;  %v743_v4 = vshll.u32 %v737_v53, 16  ;;  %v748_v5 = vshrl.u32 %v738_v40, 16  ;;  %v751_v9 = vshll.u32 %v738_v40, 16  ;;  %s388_s11 = sadd.s32 %s4720_s27, %s4496_s29  ;;  %v4800_v27 = vld [vmem:[#allocation2 + $0x20] sm:$0x1] }
  0x3f   : > { %v2228_v11 = vrot.slane %v4622_v46, 5  ;;  %v1898_v12 = vsel %vm4632_vm13, %v1893_v61, %v1897_v43  ;;  %v870_v13 = vrot.slane %v868_v54, 4  ;;  %v873_v14 = vrot.slane %v871_v59, 5  ;;  %v2184_v61 = vld [vmem:[#allocation2 + $0xc] sm:$0xe]  ;;  %s3653_s13 = sshll.u32 %s388_s11, 2 }
  0x40   : > { %v4715_v16 = vrot.slane %v2225_v0, 4  ;;  %v3736_v17 = vcombine.low %v1888_v60, %v1898_v12  ;;  %v742_v18 = vrot.slane %v740_v2, 7  ;;  %v750_v19 = vrot.slane %v748_v5, 7  ;;  %s769_s16 = scalar_select %p408_p12, 1, 0 }
  0x41   : > { %v874_v23 = vor.u32 %v873_v14, %v870_v13  ;;  %v4717_v24 = vrot.slane %v877_v62, 5  ;;  %v883_v25 = vrot.slane %v881_v63, 4  ;;  %v887_v29 = vshll.u32 %v4706_v10, 16  ;;  %v4743_v62 = vld [vmem:[%s5644_s3 + $0xc] sm:$0x3]  ;;  %s5044_s15 = scalar_lea.vmem %s5643_s2, %s3653_s13 }
  0x42   : > { %4080 = vmatprep.mubr.msk.bf16.mxu0 %vm1064_vm12, %v3736_v17  ;;  %v745_v30 = vor.u32 %v743_v4, %v742_v18  ;;  %v746_v31 = vrot.slane %v742_v18, 4  ;;  %v753_v32 = vor.u32 %v751_v9, %v750_v19  ;;  %v755_v33 = vrot.slane %v750_v19, 4  ;;  %v1812_v35 = vld [vmem:[#allocation2 + $0x30] sm:$0xf]  ;;  %v4723_v36 = vld [vmem:[#allocation2 + $0x34] sm:$0xf]  ;;  %s4873_s17 = scvt.s32.f32 %s769_s16 }
  0x43   : > { %v4727_v37 = vld [vmem:[#allocation2 + $0x38] sm:$0x1]  ;;  %v1900_v39 = vshrl.u32 %v1812_v35, 16  ;;  %v1903_v42 = vshll.u32 %v1812_v35, 16  ;;  %v1909_v43 = vshll.u32 %v4723_v36, 16  ;;  %v1913_v45 = vshrl.u32 %v4723_v36, 16 }
  0x44   : > { %v754_v21 = vsel %vm4531_vm8, %v746_v31, %v753_v32  ;;  %v760_v41 = vsel %vm4539_vm9, %v745_v30, %v759_v20  ;;  %v764_v47 = vsel %vm4483_vm3, %v755_v33, %v763_v22  ;;  %v1919_v49 = vshll.u32 %v4727_v37, 16  ;;  %v4748_v9 = vld [vmem:[#allocation2 + $0x18] sm:$0xf]  ;;  %v4753_v14 = vld [vmem:[#allocation2 + $0x1c] sm:$0xf]  ;;  %s773_s26 = sshrl.u32 %s4873_s17, 16  ;;  %p772_p13 = scmp.ne.f32.partialorder %s4873_s17, %s4873_s17 }
  0x45   : > { %761 = vst [vmem:[#allocation2] sm:$0xf] %v760_v41  ;;  %762 = vst.msk [vmem:[#allocation2 + $0x4] sm:$0xf] %vm659_vm7, %v754_v21  ;;  %v1902_v50 = vrot.slane %v1900_v39, 4  ;;  %v1905_v51 = vrot.slane %v1903_v42, 5  ;;  %v884_v59 = vor.u32 %v883_v25, %v4717_v24 }
  0x46   : > { %765 = vst [vmem:[#allocation2 + $0x8] sm:$0x1] %v764_v47  ;;  %v1911_v53 = vrot.slane %v1909_v43, 5  ;;  %v1915_v40 = vrot.slane %v1913_v45, 4  ;;  %v875_v54 = vrot.slane %v874_v23, 4  ;;  %v889_v60 = vrot.slane %v887_v29, 5 }
  0x47   : > { %v1906_v63 = vor.u32 %v1905_v51, %v1902_v50  ;;  %v1921_v4 = vrot.slane %v1919_v49, 5  ;;  %v2326_v5 = vsel %vm1089_vm0, %v2300_v52, 0  ;;  %v885_v13 = vrot.slane %v884_v59, 4  ;;  %v4807_v59 = vld [vmem:[#allocation2 + $0x24] sm:$0xf]  ;;  %s774_s28 = sand.u32 1, %s773_s26 }
  0x48   : > { %v1916_v2 = vor.u32 %v1915_v40, %v1911_v53  ;;  %v880_v12 = vsel %vm4632_vm13, %v875_v54, %v4717_v24  ;;  %4093 = vmatpush3.bf16.msra.mxu0 %v2326_v5  ;;  %vm1378_vm14 = vcmask 1042432   ;;  %vm1379_vm15 = vcmask 1046532   ;;  %s775_s30 = sadd.s32 32767, %s774_s28  ;;  %v2642_v34 = vld [vmem:[#allocation2 + $0x24] sm:$0xf] }
  0x49   : > { %v1907_v17 = vrot.slane %v1906_v63, 4  ;;  %vm4755_vm1 = vmor %vm1378_vm14, %vm1379_vm15  ;;  %v3750_v15 = vrot.slane %v2184_v61, 9  ;;  %v2220_v52 = vrot.slane %v2218_v57, 4  ;;  %4301 = vmatprep.subr.msk.bf16.mxu0 %vm1089_vm0, %v4743_v62  ;;  %v890_v20 = vsel %vm4632_vm13, %v885_v13, %v889_v60  ;;  %v4812_v13 = vld [vmem:[#allocation2 + $0x28] sm:$0xf]  ;;  %s4896_s25 = sadd.s32 %s775_s30, %s4873_s17 }
  0x4a   : > { %v1917_v18 = vrot.slane %v1916_v2, 4  ;;  %v4767_v22 = vsel %vm1089_vm0, %v4560_v56, 0  ;;  %v892_v23 = vshrl.u32 %v4748_v9, 16  ;;  %v895_v24 = vshll.u32 %v4748_v9, 16  ;;  %s777_s8 = sand.u32 4294901760, %s4896_s25 }
  0x4b   : > { %v1912_v25 = vsel %vm4632_vm13, %v1907_v17, %v1911_v53  ;;  %v2219_v30 = vsel %vm4755_vm1, %v3750_v15, %v2218_v57  ;;  %v901_v31 = vshll.u32 %v4753_v14, 16  ;;  %v4786_v39 = vcombine.low %v880_v12, %v890_v20  ;;  %v4814_v17 = vld [vmem:[#allocation2 + $0x2c] sm:$0x1]  ;;  %s5710_s8 = smov (%p772_p13, %s777_s8), 2143289344 }
  0x4c   : > { %v1922_v29 = vsel %vm4632_vm13, %v1917_v18, %v1921_v4  ;;  %v4780_v32 = vld [vmem:[#allocation2] sm:$0xf]  ;;  %v4782_v56 = vld [vmem:[#allocation2 + $0x4] sm:$0xf]  ;;  %v2222_v42 = vsel %vm4755_vm1, %v2220_v52, %v2221_v58  ;;  %v894_v49 = vrot.slane %v892_v23, 4  ;;  %v2229_v50 = vsel %vm4755_vm1, %v4715_v16, %v2228_v11 }
  0x4d   : > { %v4784_v33 = vld [vmem:[#allocation2 + $0x8] sm:$0x1]  ;;  %v3737_v35 = vcombine.low %v1912_v25, %v1922_v29  ;;  %v844_v57 = vshrl.u32 %v4780_v32, 16  ;;  %v847_v43 = vshll.u32 %v4780_v32, 16  ;;  %v853_v45 = vshll.u32 %v4782_v56, 16 }
  0x4e   : > { %v857_v21 = vshrl.u32 %v4782_v56, 16  ;;  %v863_v41 = vshll.u32 %v4784_v33, 16  ;;  %v3758_v47 = vcombine.low %v2219_v30, %v2222_v42  ;;  %v2185_v58 = vld [vmem:[#allocation2 + $0x18] sm:$0xe]  ;;  %v897_v61 = vrot.slane %v895_v24, 5 }
  0x4f   : > { %4081 = vmatmul.mubr.msk.bf16.gmra.mrb[4].mxu0 %vm1064_vm12, %v3737_v35  ;;  %v846_v51 = vrot.slane %v844_v57, 4  ;;  %v849_v53 = vrot.slane %v847_v43, 5  ;;  %v855_v40 = vrot.slane %v853_v45, 5  ;;  %v903_v63 = vrot.slane %v901_v31, 5  ;;  %v2186_v52 = vld [vmem:[#allocation2 + $0x24] sm:$0xe] }
  0x50   : > { %v859_v54 = vrot.slane %v857_v21, 4  ;;  %v865_v60 = vrot.slane %v863_v41, 5  ;;  %4094 = vmatprep.mubr.msk.bf16.mxu0 %vm1064_vm12, %v3758_v47  ;;  %v905_v2 = vshrl.u32 %v4753_v14, 16  ;;  %v911_v46 = vshll.u32 %v4800_v27, 16  ;;  %v4822_v42 = vld [vmem:[#allocation2 + $0x30] sm:$0xf] }
  0x51   : > { %v850_v4 = vor.u32 %v849_v53, %v846_v51  ;;  %v3751_v12 = vrot.slane %v2185_v58, 9  ;;  %v898_v11 = vor.u32 %v897_v61, %v894_v49  ;;  %v916_v18 = vshrl.u32 %v4807_v59, 16  ;;  %v4833_v49 = vld [vmem:[#allocation2 + $0x34] sm:$0xf] }
  0x52   : > { %v860_v5 = vor.u32 %v859_v54, %v855_v40  ;;  %v907_v16 = vrot.slane %v905_v2, 4  ;;  %v919_v15 = vshll.u32 %v4807_v59, 16  ;;  %v913_v24 = vrot.slane %v911_v46, 5  ;;  %v4849_v46 = vld [vmem:[#allocation2 + $0x38] sm:$0x1] }
  0x53   : > { %v851_v20 = vrot.slane %v850_v4, 4  ;;  %v2226_v25 = vsel %vm4755_vm1, %v3751_v12, %v2225_v0  ;;  %v899_v29 = vrot.slane %v898_v11, 4  ;;  %v918_v35 = vrot.slane %v916_v18, 4  ;;  %v2187_v18 = vld [vmem:[#allocation2 + $0x30] sm:$0xe] }
  0x54   : > { %v861_v23 = vrot.slane %v860_v5, 4  ;;  %v908_v30 = vor.u32 %v907_v16, %v903_v63  ;;  %v3759_v31 = vcombine.low %v2226_v25, %v2229_v50  ;;  %v921_v45 = vrot.slane %v919_v15, 5 }
  0x55   : > { %v856_v57 = vsel %vm4632_vm13, %v851_v20, %v855_v40  ;;  %v925_v21 = vshll.u32 %v4812_v13, 16  ;;  %v904_v38 = vsel %vm4632_vm13, %v899_v29, %v903_v63  ;;  %v929_v47 = vshrl.u32 %v4812_v13, 16  ;;  %v4839_v40 = vld [vmem:[%s5644_s3 + $0x4] sm:$0x3] }
  0x56   : > { %v866_v43 = vsel %vm4632_vm13, %v861_v23, %v865_v60  ;;  %v909_v0 = vrot.slane %v908_v30, 4  ;;  %v922_v58 = vor.u32 %v921_v45, %v918_v35  ;;  %v935_v51 = vshll.u32 %v4814_v17, 16 }
  0x57   : > { %v3660_v41 = vcombine.low %v856_v57, %v866_v43  ;;  %4095 = vmatmul.mubr.msk.bf16.vlgmr.msra.gmra.mrb[0].mxu0 %vm1064_vm12, %v3759_v31  ;;  %v927_v50 = vrot.slane %v925_v21, 5  ;;  %v3752_v53 = vrot.slane %v2186_v52, 9  ;;  %v931_v60 = vrot.slane %v929_v47, 4  ;;  %v465_v43 = vld [vmem:[#allocation2 + $0x44] sm:$0x1] }
  0x58   : > { %v914_v54 = vsel %vm4632_vm13, %v909_v0, %v913_v24  ;;  %v2232_v61 = vrot.slane %v4642_v7, 5  ;;  %v2235_v63 = vrot.slane %v4644_v8, 5  ;;  %v923_v4 = vrot.slane %v922_v58, 4  ;;  %v488_v0 = vld [vmem:[%s4515_s10 + $0x20] sm:$0xf] }
  0x59   : > { %4004 = vmatprep.mubr.msk.bf16.mxu1 %vm1064_vm12, %v3660_v41  ;;  %v3662_v2 = vcombine.low %v904_v38, %v914_v54  ;;  %v937_v5 = vrot.slane %v935_v51, 5  ;;  %v940_v12 = vshrl.u32 %v4822_v42, 16  ;;  %v932_v11 = vor.u32 %v931_v60, %v927_v50  ;;  %v489_v47 = vld [vmem:[%s4515_s10 + $0x24] sm:$0xf]  ;;  %v436_v54 = vld [vmem:[#allocation2 + $0x48] sm:$0x1] }
  0x5a   : > { %4005 = vmatmul.mubr.msk.bf16.vlgmr.msra.gmra.mrb[0].mxu1 %vm1064_vm12, %v4786_v39  ;;  %v2233_v7 = vsel %vm4755_vm1, %v3752_v53, %v2232_v61  ;;  %v2234_v16 = vrot.slane %v2232_v61, 4  ;;  %v943_v8 = vshll.u32 %v4822_v42, 16  ;;  %v928_v39 = vsel %vm4632_vm13, %v923_v4, %v927_v50  ;;  %v468_v60 = vld [vmem:[#allocation2 + $0x50] sm:$0x1]  ;;  %v490_v4 = vld [vmem:[%s4515_s10 + $0x28] sm:$0xf] }
  0x5b   : > { %4021 = vmatpush3.bf16.msra.mxu1 %v4767_v22  ;;  %4008 = vmatprep.mubr.msk.bf16.mxu1 %vm1064_vm12, %v3662_v2  ;;  %v942_v15 = vrot.slane %v940_v12, 4  ;;  %v949_v52 = vshll.u32 %v4833_v49, 16  ;;  %v953_v20 = vshrl.u32 %v4833_v49, 16  ;;  %v433_v22 = vld [vmem:[#allocation2 + $0x3c] sm:$0x1]  ;;  %v933_v23 = vrot.slane %v932_v11, 4 }
  0x5c   : > { %4296 = vmatprep.subr.msk.bf16.mxu1 %vm1089_vm0, %v4839_v40  ;;  %v2236_v24 = vsel %vm4755_vm1, %v2234_v16, %v2235_v63  ;;  %v945_v25 = vrot.slane %v943_v8, 5  ;;  %v959_v29 = vshll.u32 %v4849_v46, 16  ;;  %v3753_v57 = vrot.slane %v2187_v18, 9 }
  0x5d   : > { %v3760_v30 = vcombine.low %v2233_v7, %v2236_v24  ;;  %v951_v31 = vrot.slane %v949_v52, 5  ;;  %v955_v35 = vrot.slane %v953_v20, 4  ;;  %v938_v45 = vsel %vm4632_vm13, %v933_v23, %v937_v5  ;;  %v439_v23 = vld [vmem:[#allocation2 + $0x54] sm:$0x1]  ;;  %v471_v24 = vld [vmem:[#allocation2 + $0x5c] sm:$0x1] }
  0x5e   : > { %v946_v21 = vor.u32 %v945_v25, %v942_v15  ;;  %v961_v41 = vrot.slane %v959_v29, 5  ;;  %v2239_v38 = vrot.slane %v4723_v36, 5  ;;  %v3663_v58 = vcombine.low %v928_v39, %v938_v45  ;;  %v491_v39 = vld [vmem:[%s4515_s10 + $0x2c] sm:$0xf] }
  0x5f   : > { %4098 = vmatprep.mubr.msk.bf16.mxu0 %vm1064_vm12, %v3760_v30  ;;  %v956_v50 = vor.u32 %v955_v35, %v951_v31  ;;  %v2242_v51 = vrot.slane %v4727_v37, 5  ;;  %v434_v53 = vsel %vm4483_vm3, 0, %v433_v22  ;;  %v466_v2 = vsel %vm4491_vm5, 0, %v465_v43 }
  0x60   : > { %v947_v61 = vrot.slane %v946_v21, 4  ;;  %v2240_v36 = vsel %vm4755_vm1, %v3753_v57, %v2239_v38  ;;  %v2241_v63 = vrot.slane %v2239_v38, 4  ;;  %435 = vst [vmem:[#allocation2 + $0x3c] sm:$0x1] %v434_v53  ;;  %467 = vst [vmem:[#allocation2 + $0x44] sm:$0x1] %v466_v2 }
  0x61   : > { %v957_v37 = vrot.slane %v956_v50, 4  ;;  %v567_v5 = vshrl.u32 %v488_v0, 16  ;;  %v570_v12 = vshll.u32 %v488_v0, 16  ;;  %v575_v11 = vshrl.u32 %v489_v47, 16  ;;  %v493_v21 = vld [vmem:[%s4515_s10 + $0x34] sm:$0xf] }
  0x62   : > { %4009 = vmatmul.mubr.msk.bf16.gmra.mrb[4].mxu1 %vm1064_vm12, %v3663_v58  ;;  %v952_v7 = vsel %vm4632_vm13, %v947_v61, %v951_v31  ;;  %v2243_v16 = vsel %vm4755_vm1, %v2241_v63, %v2242_v51  ;;  %v578_v8 = vshll.u32 %v489_v47, 16  ;;  %v2524_v18 = vsel %vm1089_vm0, %v4743_v62, 0  ;;  %v492_v31 = vld [vmem:[%s4515_s10 + $0x30] sm:$0xf]  ;;  %v442_v58 = vld [vmem:[#allocation2 + $0x60] sm:$0x1] }
  0x63   : > { %v962_v15 = vsel %vm4632_vm13, %v957_v37, %v961_v41  ;;  %v3761_v52 = vcombine.low %v2240_v36, %v2243_v16  ;;  %v569_v20 = vrot.slane %v567_v5, 7  ;;  %v577_v22 = vrot.slane %v575_v11, 7  ;;  %4111 = vmatpush3.bf16.msra.mxu0 %v2524_v18  ;;  %v474_v37 = vld [vmem:[#allocation2 + $0x68] sm:$0x1]  ;;  %v4921_v16 = vld [vmem:[%s4515_s10 + $0x38] sm:$0xf] }
  0x64   : > { %v3664_v25 = vcombine.low %v952_v7, %v962_v15  ;;  %v437_v29 = vsel %vm4483_vm3, 0, %v436_v54  ;;  %v469_v62 = vsel %vm4491_vm5, 0, %v468_v60  ;;  %v584_v30 = vshrl.u32 %v490_v4, 16  ;;  %v4929_v15 = vld [vmem:[%s4515_s10 + $0x3c] sm:$0xf]  ;;  %s780_s10 = sshrl.u32 %s5710_s8, 16 }
  0x65   : > { %4099 = vmatmul.mubr.msk.bf16.gmra.mrb[4].mxu0 %vm1064_vm12, %v3761_v52  ;;  %v572_v35 = vor.u32 %v570_v12, %v569_v20  ;;  %v573_v57 = vrot.slane %v569_v20, 4  ;;  %v580_v43 = vor.u32 %v578_v8, %v577_v22  ;;  %v582_v45 = vrot.slane %v577_v22, 4  ;;  %438 = vst [vmem:[#allocation2 + $0x48] sm:$0x1] %v437_v29  ;;  %470 = vst [vmem:[#allocation2 + $0x50] sm:$0x1] %v469_v62 }
  0x66   : > { %4012 = vmatprep.mubr.msk.bf16.mxu1 %vm1064_vm12, %v3664_v25  ;;  %v586_v41 = vrot.slane %v584_v30, 7  ;;  %v587_v38 = vshll.u32 %v490_v4, 16  ;;  %v592_v0 = vshrl.u32 %v491_v39, 16  ;;  %v595_v47 = vshll.u32 %v491_v39, 16  ;;  %s781_s9 = sshll.u32 %s780_s10, 16 }
  0x67   : > { %v581_v50 = vsel %vm4531_vm8, %v573_v57, %v580_v43  ;;  %v690_v51 = vld [vmem:[#allocation2 + $0x3c] sm:$0xf]  ;;  %v440_v53 = vsel %vm4483_vm3, 0, %v439_v23  ;;  %v472_v54 = vsel %vm4491_vm5, 0, %v471_v24  ;;  %v601_v60 = vshrl.u32 %v492_v31, 16  ;;  %s4990_s12 = sor.u32 %s781_s9, %s780_s10  ;;  %s5571_s9 = scalar_lea.vmem %s5645_s4, %s3636_s7 }
  0x68   : > { %v691_v61 = vsel %vm4539_vm9, %v572_v35, %v690_v51  ;;  %693 = vst.msk [vmem:[#allocation2 + $0x40] sm:$0xf] %vm659_vm7, %v581_v50  ;;  %v694_v36 = vld [vmem:[#allocation2 + $0x44] sm:$0x1]  ;;  %v589_v63 = vor.u32 %v587_v38, %v586_v41  ;;  %v590_v2 = vrot.slane %v586_v41, 4  ;;  %v594_v4 = vrot.slane %v592_v0, 7  ;;  %s411_s7 = sadd.s32 %s3658_s6, %s5712_s18 }
  0x69   : > { %441 = vst [vmem:[#allocation2 + $0x54] sm:$0x1] %v440_v53  ;;  %473 = vst [vmem:[#allocation2 + $0x5c] sm:$0x1] %v472_v54  ;;  %v695_v5 = vsel %vm4483_vm3, %v582_v45, %v694_v36  ;;  %v603_v12 = vrot.slane %v601_v60, 7  ;;  %v604_v11 = vshll.u32 %v492_v31, 16 }
  0x6a   : > { %692 = vst [vmem:[#allocation2 + $0x3c] sm:$0xf] %v691_v61  ;;  %v609_v7 = vshrl.u32 %v493_v21, 16  ;;  %696 = vst [vmem:[#allocation2 + $0x44] sm:$0x1] %v695_v5  ;;  %v597_v8 = vor.u32 %v595_v47, %v594_v4  ;;  %v599_v18 = vrot.slane %v594_v4, 4 }
  0x6b   : > { %v612_v39 = vshll.u32 %v493_v21, 16  ;;  %v607_v20 = vrot.slane %v603_v12, 4  ;;  %v443_v23 = vsel %vm4483_vm3, 0, %v442_v58  ;;  %v606_v62 = vor.u32 %v604_v11, %v603_v12 }
  0x6c   : > { %v611_v22 = vrot.slane %v609_v7, 7  ;;  %v598_v24 = vsel %vm4531_vm8, %v590_v2, %v597_v8  ;;  %v697_v25 = vld [vmem:[#allocation2 + $0x48] sm:$0xf]  ;;  %v701_v29 = vld [vmem:[#allocation2 + $0x50] sm:$0x1]  ;;  %v475_v30 = vsel %vm4491_vm5, 0, %v474_v37 }
  0x6d   : > { %444 = vst [vmem:[#allocation2 + $0x60] sm:$0x1] %v443_v23  ;;  %v618_v31 = vshrl.u32 %v4921_v16, 16  ;;  %v698_v57 = vsel %vm4539_vm9, %v589_v63, %v697_v25  ;;  %700 = vst.msk [vmem:[#allocation2 + $0x4c] sm:$0xf] %vm659_vm7, %v598_v24  ;;  %v702_v43 = vsel %vm4483_vm3, %v599_v18, %v701_v29  ;;  %v621_v38 = vshll.u32 %v4921_v16, 16 }
  0x6e   : > { %v614_v45 = vor.u32 %v612_v39, %v611_v22  ;;  %476 = vst [vmem:[#allocation2 + $0x68] sm:$0x1] %v475_v30  ;;  %699 = vst [vmem:[#allocation2 + $0x48] sm:$0xf] %v698_v57  ;;  %v616_v21 = vrot.slane %v611_v22, 4  ;;  %v626_v0 = vshrl.u32 %v4929_v15, 16 }
  0x6f   : > { %703 = vst [vmem:[#allocation2 + $0x50] sm:$0x1] %v702_v43  ;;  %v4946_v41 = vrot.slane %v618_v31, 7  ;;  %v4950_v47 = vld [vmem:[#allocation2 + $0x40] sm:$0xf] }
  0x70   : > { %v4952_v58 = vld [vmem:[#allocation2 + $0x40] sm:$0xf]  ;;  %v615_v50 = vsel %vm4531_vm8, %v607_v20, %v614_v45  ;;  %v704_v51 = vld [vmem:[#allocation2 + $0x54] sm:$0xf]  ;;  %v973_v54 = vshll.u32 %v4950_v47, 16  ;;  %v977_v60 = vshrl.u32 %v4950_v47, 16 }
  0x71   : > { %v4956_v53 = vld [vmem:[#allocation2 + $0x3c] sm:$0xf]  ;;  %v705_v36 = vsel %vm4539_vm9, %v606_v62, %v704_v51  ;;  %707 = vst.msk [vmem:[#allocation2 + $0x58] sm:$0xf] %vm659_vm7, %v615_v50  ;;  %v4963_v63 = vld [vmem:[#allocation2 + $0x44] sm:$0x1] }
  0x72   : > { %v2188_v61 = vld [vmem:[#allocation2 + $0x3c] sm:$0xe]  ;;  %v964_v2 = vshrl.u32 %v4956_v53, 16  ;;  %v967_v4 = vshll.u32 %v4956_v53, 16  ;;  %v1817_v37 = vld [vmem:[#allocation2 + $0x44] sm:$0x1] }
  0x73   : > { %706 = vst [vmem:[#allocation2 + $0x54] sm:$0xf] %v705_v36  ;;  %v975_v12 = vrot.slane %v973_v54, 5  ;;  %v979_v11 = vrot.slane %v977_v60, 4  ;;  %v983_v7 = vshll.u32 %v4963_v63, 16  ;;  %v3754_v8 = vrot.slane %v2188_v61, 9 }
  0x74   : > { %v708_v18 = vld [vmem:[#allocation2 + $0x5c] sm:$0x1]  ;;  %v966_v39 = vrot.slane %v964_v2, 4  ;;  %v969_v20 = vrot.slane %v967_v4, 5  ;;  %v2246_v22 = vrot.slane %v4952_v58, 5  ;;  %v2249_v23 = vrot.slane %v1817_v37, 5 }
  0x75   : > { %v980_v24 = vor.u32 %v979_v11, %v975_v12  ;;  %v985_v25 = vrot.slane %v983_v7, 5  ;;  %v4973_v29 = vld [vmem:[#allocation2 + $0x4c] sm:$0xf]  ;;  %v709_v62 = vsel %vm4483_vm3, %v616_v21, %v708_v18  ;;  %v4980_v45 = vld [vmem:[#allocation2 + $0x48] sm:$0xf] }
  0x76   : > { %v970_v31 = vor.u32 %v969_v20, %v966_v39  ;;  %v2247_v57 = vsel %vm4755_vm1, %v3754_v8, %v2246_v22  ;;  %v2248_v43 = vrot.slane %v2246_v22, 4  ;;  %v4982_v50 = vld [vmem:[#allocation2 + $0x50] sm:$0x1]  ;;  %v997_v51 = vshll.u32 %v4973_v29, 16  ;;  %710 = vst [vmem:[#allocation2 + $0x5c] sm:$0x1] %v709_v62 }
  0x77   : > { %v981_v54 = vrot.slane %v980_v24, 4  ;;  %v988_v60 = vshrl.u32 %v4980_v45, 16  ;;  %v991_v61 = vshll.u32 %v4980_v45, 16  ;;  %v1001_v21 = vshrl.u32 %v4973_v29, 16  ;;  %v1819_v39 = vld [vmem:[#allocation2 + $0x4c] sm:$0xf] }
  0x78   : > { %v971_v36 = vrot.slane %v970_v31, 4  ;;  %v2250_v2 = vsel %vm4755_vm1, %v2248_v43, %v2249_v23  ;;  %v999_v4 = vrot.slane %v997_v51, 5  ;;  %v1007_v37 = vshll.u32 %v4982_v50, 16  ;;  %v2189_v20 = vld [vmem:[#allocation2 + $0x48] sm:$0xe] }
  0x79   : > { %v986_v11 = vsel %vm4632_vm13, %v981_v54, %v985_v25  ;;  %v3762_v7 = vcombine.low %v2247_v57, %v2250_v2  ;;  %v990_v8 = vrot.slane %v988_v60, 4  ;;  %v993_v18 = vrot.slane %v991_v61, 5  ;;  %v4999_v62 = vld [vmem:[#allocation2 + $0x50] sm:$0x1]  ;;  %v5005_v54 = vld [vmem:[#allocation2 + $0x58] sm:$0xf] }
  0x7a   : > { %v976_v22 = vsel %vm4632_vm13, %v971_v36, %v975_v12  ;;  %v1003_v24 = vrot.slane %v1001_v21, 4  ;;  %v1957_v23 = vshll.u32 %v1819_v39, 16  ;;  %v1961_v25 = vshrl.u32 %v1819_v39, 16  ;;  %v5003_v57 = vld [vmem:[#allocation2 + $0x54] sm:$0xf] }
  0x7b   : > { %v3665_v43 = vcombine.low %v976_v22, %v986_v11  ;;  %4102 = vmatprep.mubr.msk.bf16.mxu0 %vm1064_vm12, %v3762_v7  ;;  %v994_v51 = vor.u32 %v993_v18, %v990_v8  ;;  %v1009_v12 = vrot.slane %v1007_v37, 5  ;;  %v3755_v36 = vrot.slane %v2189_v20, 9  ;;  %v2190_v22 = vld [vmem:[#allocation2 + $0x54] sm:$0xe]  ;;  %v5020_v20 = vld [vmem:[#allocation2 + $0x58] sm:$0xf] }
  0x7c   : > { %v1004_v61 = vor.u32 %v1003_v24, %v999_v4  ;;  %v2253_v2 = vrot.slane %v1819_v39, 5  ;;  %v5012_v11 = vrot.slane %v1957_v23, 5  ;;  %v1963_v7 = vrot.slane %v1961_v25, 4  ;;  %5666 = vst [vmem:[#allocation3_spill] sm:$0xff] %v5020_v20 }
  0x7d   : > { %4013 = vmatmul.mubr.msk.bf16.gmra.mrb[8].mxu1 %vm1064_vm12, %v3665_v43  ;;  %v995_v21 = vrot.slane %v994_v51, 4  ;;  %v2256_v8 = vrot.slane %v4999_v62, 5  ;;  %v5015_v18 = vld [vmem:[#allocation2 + $0x5c] sm:$0x1]  ;;  %v1012_v39 = vshrl.u32 %v5003_v57, 16  ;;  %v1015_v43 = vshll.u32 %v5003_v57, 16 }
  0x7e   : > { %v1005_v26 = vrot.slane %v1004_v61, 4  ;;  %v2254_v24 = vsel %vm4755_vm1, %v3755_v36, %v2253_v2  ;;  %v2255_v37 = vrot.slane %v2253_v2, 4  ;;  %v5022_v35 = vld [vmem:[#allocation2 + $0x5c] sm:$0x1]  ;;  %v1021_v51 = vshll.u32 %v5005_v54, 16 }
  0x7f   : > { %5667 = vst [vmem:[#allocation4_spill] sm:$0xff] %v5022_v35  ;;  %v1000_v23 = vsel %vm4632_vm13, %v995_v21, %v999_v4  ;;  %v623_v25 = vor.u32 %v621_v38, %v4946_v41  ;;  %v1014_v2 = vrot.slane %v1012_v39, 4  ;;  %v1025_v5 = vshrl.u32 %v5005_v54, 16  ;;  %v5039_v4 = vld [vmem:[%s5644_s3 + $0xc] ss:$0 sps:$4 sm:$0xcc]  }
  0x80   : > { %v1010_v61 = vsel %vm4632_vm13, %v1005_v26, %v1009_v12  ;;  %v2257_v36 = vsel %vm4755_vm1, %v2255_v37, %v2256_v8  ;;  %v1967_v26 = vshll.u32 %v4999_v62, 16  ;;  %v1017_v12 = vrot.slane %v1015_v43, 5  ;;  %v711_v21 = vld [vmem:[#allocation2 + $0x60] sm:$0xf] }
  0x81   : > { %v3666_v16 = vcombine.low %v1000_v23, %v1010_v61  ;;  %v3763_v38 = vcombine.low %v2254_v24, %v2257_v36  ;;  %v1023_v8 = vrot.slane %v1021_v51, 5  ;;  %v1027_v37 = vrot.slane %v1025_v5, 4  ;;  %v766_v24 = vld [vmem:[%s5044_s15] sm:$0xf] }
  0x82   : > { %v1031_v39 = vshll.u32 %v5015_v18, 16  ;;  %v3756_v52 = vrot.slane %v2190_v22, 9  ;;  %v1018_v60 = vor.u32 %v1017_v12, %v1014_v2  ;;  %v2260_v31 = vrot.slane %v5020_v20, 5 }
  0x83   : > { %4016 = vmatprep.mubr.msk.bf16.mxu1 %vm1064_vm12, %v3666_v16  ;;  %4103 = vmatmul.mubr.msk.bf16.gmra.mrb[8].mxu0 %vm1064_vm12, %v3763_v38  ;;  %v2263_v30 = vrot.slane %v5022_v35, 5  ;;  %v628_v62 = vrot.slane %v626_v0, 7  ;;  %v1964_v23 = vor.u32 %v1963_v7, %v5012_v11  ;;  %v1028_v5 = vor.u32 %v1027_v37, %v1023_v8  ;;  %v715_v0 = vld [vmem:[#allocation2 + $0x68] sm:$0x1]  ;;  %v1354_v37 = vld [vmem:[#allocation2] sm:$0xe] }
  0x84   : > { %v1033_v43 = vrot.slane %v1031_v39, 5  ;;  %v712_v22 = vsel %vm4539_vm9, %v623_v25, %v711_v21  ;;  %v1019_v51 = vrot.slane %v1018_v60, 4  ;;  %v2261_v61 = vsel %vm4755_vm1, %v3756_v52, %v2260_v31  ;;  %v445_v25 = vld [vmem:[#allocation2 + $0x6c] sm:$0x1]  ;;  %v767_v21 = vld [vmem:[%s5044_s15 + $0x4] sm:$0xf] }
  0x85   : > { %v2262_v36 = vrot.slane %v2260_v31, 4  ;;  %v5668_v2 = vshll.u32 %v4929_v15, 16  ;;  %713 = vst [vmem:[#allocation2 + $0x60] sm:$0xf] %v712_v22  ;;  %v1029_v38 = vrot.slane %v1028_v5, 4  ;;  %v633_v12 = vrot.slane %v628_v62, 4 }
  0x86   : > { %v2883_v7 = vrot.slane %v5039_v4, 2  ;;  %v5669_v39 = vstv %s4990_s12  ;;  %v5065_v20 = vrot.slane %v1967_v26, 5  ;;  %v1024_v60 = vsel %vm4632_vm13, %v1019_v51, %v1023_v8  ;;  %s3659_s12 = sshll.u32 %s411_s7, 1 }
  0x87   : > { %v631_v16 = vor.u32 %v5668_v2, %v628_v62  ;;  %v785_v35 = vmul.bf16 %v5669_v39, %v766_v24  ;;  %v2264_v52 = vsel %vm4755_vm1, %v2262_v36, %v2263_v30  ;;  %v5670_v15 = vrot.slane %v4946_v41, 4  ;;  %v1355_v41 = vld [vmem:[#allocation2 + $0xc] sm:$0xe]  ;;  %s5614_s27 = scalar_lea.vmem %s5646_s5, %s3659_s12 }
  0x88   : > { %v5076_v62 = vrot.slane %v1964_v23, 4  ;;  %v1034_v26 = vsel %vm4632_vm13, %v1029_v38, %v1033_v43  ;;  %v3764_v24 = vcombine.low %v2261_v61, %v2264_v52  ;;  %v716_v8 = vsel %vm4483_vm3, %v633_v12, %v715_v0  ;;  %4302 = vmatprep.subr.msk.bf16.mxu0 %vm1089_vm0, %v2883_v7 }
  0x89   : > { %v632_v31 = vsel %vm4531_vm8, %v5670_v15, %v631_v16  ;;  %v1386_v30 = vrot.slane %v4784_v33, 5  ;;  %v3667_v5 = vcombine.low %v1024_v60, %v1034_v26  ;;  %717 = vst [vmem:[#allocation2 + $0x68] sm:$0x1] %v716_v8  ;;  %v3693_v23 = vrot.slane %v1354_v37, 9 }
  0x8a   : > { %714 = vst.msk [vmem:[#allocation2 + $0x64] sm:$0xf] %vm659_vm7, %v632_v31  ;;  %v1383_v22 = vrot.slane %v4782_v56, 5  ;;  %4106 = vmatprep.mubr.msk.bf16.mxu0 %vm1064_vm12, %v3764_v24  ;;  %v446_v43 = vsel %vm4483_vm3, 0, %v445_v25  ;;  %v5671_v51 = vmov %v5669_v39  ;;  %v788_v36 = vshrl.u32 %v785_v35, 16 }
  0x8b   : > { %v786_v61 = vmul.bf16 %v5671_v51, %v767_v21  ;;  %v791_v2 = vshll.u32 %v785_v35, 16  ;;  %4017 = vmatmul.mubr.msk.bf16.gmra.mrb[12].mxu1 %vm1064_vm12, %v3667_v5  ;;  %447 = vst [vmem:[#allocation2 + $0x6c] sm:$0x1] %v446_v43  ;;  %v3694_v0 = vrot.slane %v1355_v41, 9  ;;  %v5672_v38 = vrot.slane %v4688_v48, 5 }
  0x8c   : > { %v5096_v16 = vsel %vm4755_vm1, %v3693_v23, %v1383_v22  ;;  %v1385_v33 = vrot.slane %v1383_v22, 4  ;;  %v5673_v37 = vcombine.low %v4780_v32, %v4782_v56  ;;  %v2191_v39 = vld [vmem:[#allocation2 + $0x60] sm:$0xe]  ;;  %v790_v60 = vrot.slane %v788_v36, 7  ;;  %v1357_v36 = vld [vmem:[#allocation2 + $0x24] sm:$0xe] }
  0x8d   : > { %v1392_v12 = vrot.slane %v5672_v38, 4  ;;  %v796_v35 = vshrl.u32 %v786_v61, 16  ;;  %v5115_v31 = vld [vmem:[%s5644_s3 + $0x4] ss:$0 sps:$4 sm:$0xcc]   ;;  %v799_v32 = vshll.u32 %v786_v61, 16  ;;  %v5674_v56 = vmov %v5672_v38 }
  0x8e   : > { %4022 = vmatprep.mubr.msk.bf16.mxu1 %vm1064_vm12, %v5673_v37  ;;  %v5110_v15 = vsel %vm4755_vm1, %v1385_v33, %v1386_v30  ;;  %v5121_v25 = vsel %vm4755_vm1, %v3694_v0, %v5674_v56  ;;  %v3757_v21 = vrot.slane %v2191_v39, 9  ;;  %v794_v24 = vrot.slane %v790_v60, 4  ;;  %v2639_v33 = vld [vmem:[#allocation2 + $0x18] sm:$0xf]  ;;  %v5147_v38 = vld [vmem:[#allocation2 + $0x1c] sm:$0xf] }
  0x8f   : > { %v5125_v8 = vrot.slane %v796_v35, 7  ;;  %v793_v30 = vor.u32 %v791_v2, %v790_v60  ;;  %v5676_v5 = vrot.slane %v4706_v10, 5  ;;  %v3679_v51 = vcombine.low %v4748_v9, %v4753_v14 }
  0x90   : > { %v5135_v22 = vld [vmem:[#allocation2 + $0x68] sm:$0x1]  ;;  %v1487_v10 = vsel %vm1089_vm0, %v4839_v40, 0  ;;  %v1662_v0 = vrot.slane %v5115_v31, 2  ;;  %v5678_v60 = vcombine.low %v4673_v44, %v4688_v48  ;;  %v2664_v35 = vshrl.u32 %v2639_v33, 16 }
  0x91   : > { %v5127_v41 = vld [vmem:[#allocation2 + $0x64] sm:$0xf]  ;;  %v5133_v23 = vsel %vm4755_vm1, %v1392_v12, %v5676_v5  ;;  %5677 = vst [vmem:[#allocation6_spill] sm:$0xff] %v5135_v22  ;;  %v801_v61 = vor.u32 %v799_v32, %v5125_v8  ;;  %v2270_v2 = vrot.slane %v5135_v22, 5  ;;  %v2667_v32 = vshll.u32 %v2639_v33, 16 }
  0x92   : > { %5675 = vst [vmem:[#allocation5_spill] sm:$0xff] %v5127_v41  ;;  %v2267_v43 = vrot.slane %v5127_v41, 5  ;;  %v808_v39 = vld [vmem:[#allocation2 + $0x6c] sm:$0xf]  ;;  %v2673_v28 = vshll.u32 %v5147_v38, 16  ;;  %v2677_v44 = vshrl.u32 %v5147_v38, 16 }
  0x93   : > { %v802_v9 = vsel %vm4531_vm8, %v794_v24, %v801_v61  ;;  %4023 = vmatmul.mubr.msk.bf16.vlgmr.msra.gmra.mrb[0].mxu1 %vm1064_vm12, %v5678_v60  ;;  %v809_v40 = vsel %vm4539_vm9, %v793_v30, %v808_v39  ;;  %v3680_v24 = vcombine.low %v4807_v59, %v4812_v13  ;;  %v2666_v30 = vrot.slane %v2664_v35, 4 }
  0x94   : > { %v2268_v12 = vsel %vm4755_vm1, %v3757_v21, %v2267_v43  ;;  %v2269_v37 = vrot.slane %v2267_v43, 4  ;;  %811 = vst.msk [vmem:[#allocation2 + $0x70] sm:$0xf] %vm659_vm7, %v802_v9  ;;  %4039 = vmatpush3.bf16.msra.mxu1 %v1487_v10  ;;  %v4346_v21 = vld [vmem:[#allocation2 + $0x18] sm:$0xff]   ;;  %4026 = vmatprep.mubr.msk.bf16.mxu1 %vm1064_vm12, %v3679_v51  ;;  %810 = vst [vmem:[#allocation2 + $0x6c] sm:$0xf] %v809_v40  ;;  %v3681_v51 = vcombine.low %v4822_v42, %v4833_v49 }
  0x95   : > { %4297 = vmatprep.subr.msk.bf16.mxu1 %vm1089_vm0, %v1662_v0  ;;  %v2669_v5 = vrot.slane %v2667_v32, 5  ;;  %v5171_v43 = vld [vmem:[#allocation2 + $0x28] sm:$0xf]  ;;  %v5176_v61 = vrot.slane %v2673_v28, 5  ;;  %v2679_v33 = vrot.slane %v2677_v44, 4  ;;  %v2688_v10 = vshrl.u32 %v2642_v34, 16 }
  0x96   : > { %v2271_v56 = vsel %vm4755_vm1, %v2269_v37, %v2270_v2  ;;  %v5178_v2 = vld [vmem:[#allocation2 + $0x20] sm:$0x1]  ;;  %v2697_v37 = vshll.u32 %v5171_v43, 16  ;;  %v2701_v59 = vshrl.u32 %v5171_v43, 16  ;;  %v4347_v9 = vld [vmem:[#allocation2 + $0x24] sm:$0xff]   ;;  %v1397_v60 = vrot.slane %v4753_v14, 5 }
  0x97   : > { %v3765_v48 = vcombine.low %v2268_v12, %v2271_v56  ;;  %v2691_v12 = vshll.u32 %v2642_v34, 16  ;;  %v2670_v39 = vor.u32 %v2669_v5, %v2666_v30  ;;  %v4348_v40 = vld [vmem:[#allocation2 + $0x30] sm:$0xff]   ;;  %v2680_v42 = vor.u32 %v2679_v33, %v5176_v61  ;;  %v1356_v32 = vld [vmem:[#allocation2 + $0x18] sm:$0xe]  ;;  %v5194_v34 = vld [vmem:[#allocation2 + $0x2c] sm:$0x1] }
  0x98   : > { %v2683_v35 = vshll.u32 %v5178_v2, 16  ;;  %v2645_v56 = vld [vmem:[#allocation2 + $0x30] sm:$0xf]  ;;  %v2690_v28 = vrot.slane %v2688_v10, 4  ;;  %v3683_v14 = vcombine.low %v4980_v45, %v4973_v29  ;;  %v2703_v30 = vrot.slane %v2701_v59, 4 }
  0x99   : > { %4107 = vmatmul.mubr.msk.bf16.gmra.mrb[12].mxu0 %vm1064_vm12, %v3765_v48  ;;  %v2693_v44 = vrot.slane %v2691_v12, 5  ;;  %v3682_v48 = vcombine.low %v4956_v53, %v4950_v47  ;;  %v5201_v5 = vld [vmem:[%s5644_s3 + $0x10] sm:$0x3]  ;;  %v2671_v4 = vrot.slane %v2670_v39, 4  ;;  %v1400_v53 = vrot.slane %v4800_v27, 5 }
  0x9a   : > { %4112 = vmatprep.mubr.msk.bf16.mxu0 %vm1064_vm12, %v4346_v21  ;;  %v2909_v21 = vsel %vm1089_vm0, %v2883_v7, 0  ;;  %v3695_v7 = vrot.slane %v1356_v32, 9  ;;  %v5205_v33 = vld [vmem:[#allocation2 + $0x34] sm:$0xf]  ;;  %v2681_v45 = vrot.slane %v2680_v42, 4  ;;  %v2685_v10 = vrot.slane %v2683_v35, 5 }
  0x9b   : > { %4027 = vmatmul.mubr.msk.bf16.gmra.mrb[4].mxu1 %vm1064_vm12, %v3680_v24  ;;  %v5196_v24 = vrot.slane %v2697_v37, 5  ;;  %v2712_v12 = vshrl.u32 %v2645_v56, 16  ;;  %v2715_v37 = vshll.u32 %v2645_v56, 16  ;;  %v2694_v59 = vor.u32 %v2693_v44, %v2690_v28  ;;  %v4349_v35 = vld [vmem:[#allocation2 + $0x3c] sm:$0xff]   ;;  %v4351_v28 = vld [vmem:[#allocation2 + $0x48] sm:$0xff]  }
  0x9c   : > { %4030 = vmatprep.mubr.msk.bf16.mxu1 %vm1064_vm12, %v3681_v51  ;;  %v1399_v51 = vrot.slane %v1397_v60, 4  ;;  %v2707_v52 = vshll.u32 %v5194_v34, 16  ;;  %v3684_v27 = vcombine.low %v5003_v57, %v5005_v54  ;;  %v2725_v42 = vshrl.u32 %v5205_v33, 16  ;;  %v5399_v6 = vld [vmem:[#allocation2 + $0x70] sm:$0xf] }
  0x9d   : > { %v2704_v39 = vor.u32 %v2703_v30, %v5196_v24  ;;  %v5221_v32 = vsel %vm1089_vm0, %v1662_v0, 0  ;;  %v5228_v57 = vsel %vm4755_vm1, %v3695_v7, %v1397_v60  ;;  %v2686_v31 = vsel %vm4632_vm13, %v2681_v45, %v2685_v10  ;;  %v1358_v10 = vld [vmem:[#allocation2 + $0x30] sm:$0xe]  ;;  %v1361_v45 = vld [vmem:[#allocation2 + $0x54] sm:$0xe] }
  0x9e   : > { %v5232_v56 = vsel %vm4755_vm1, %v1399_v51, %v1400_v53  ;;  %v3696_v0 = vrot.slane %v1357_v36, 9  ;;  %v2714_v44 = vrot.slane %v2712_v12, 4  ;;  %v5239_v30 = vrot.slane %v2694_v59, 4 }
  0x9f   : > { %v5241_v60 = vrot.slane %v2707_v52, 5  ;;  %v1407_v7 = vrot.slane %v4814_v17, 5  ;;  %v5244_v51 = vrot.slane %v2704_v39, 4  ;;  %v2727_v26 = vrot.slane %v2725_v42, 4  ;;  %v2648_v39 = vld [vmem:[#allocation2 + $0x3c] sm:$0xf] }
  0xa0   : > { %v1418_v12 = vrot.slane %v4950_v47, 5  ;;  %v1411_v59 = vrot.slane %v4833_v49, 5  ;;  %v2700_v42 = vsel %vm4632_vm13, %v5239_v30, %v5196_v24  ;;  %v3697_v24 = vrot.slane %v1358_v10, 9 }
  0xa1   : > { %4113 = vmatmul.mubr.msk.bf16.vlgmr.msra.gmra.mrb[0].mxu0 %vm1064_vm12, %v4347_v9  ;;  %v1404_v9 = vrot.slane %v4812_v13, 5  ;;  %v2676_v13 = vsel %vm4632_vm13, %v2671_v4, %v5176_v61  ;;  %v1359_v61 = vld [vmem:[#allocation2 + $0x3c] sm:$0xe]  ;;  %v2710_v49 = vsel %vm4632_vm13, %v5244_v51, %v5241_v60  ;;  %v2739_v30 = vshll.u32 %v2648_v39, 16  ;;  %v4353_v60 = vld [vmem:[#allocation2 + $0x60] sm:$0xff]  }
  0xa2   : > { %4116 = vmatprep.mubr.msk.bf16.mxu0 %vm1064_vm12, %v4348_v40  ;;  %4129 = vmatpush3.bf16.msra.mxu0 %v2909_v21  ;;  %v2721_v40 = vshll.u32 %v5205_v33, 16  ;;  %v5234_v21 = vld [vmem:[#allocation2 + $0x38] sm:$0x1]  ;;  %v5250_v36 = vcombine.low %v2676_v13, %v2686_v31  ;;  %v3698_v52 = vrot.slane %v1359_v61, 9  ;;  %v1420_v13 = vrot.slane %v1418_v12, 4 }
  0xa3   : > { %4303 = vmatprep.subr.msk.bf16.mxu0 %vm1089_vm0, %v5201_v5  ;;  %4031 = vmatmul.mubr.msk.bf16.gmra.mrb[8].mxu1 %vm1064_vm12, %v3682_v48  ;;  %v2717_v48 = vrot.slane %v2715_v37, 5  ;;  %v1406_v4 = vrot.slane %v1404_v9, 4  ;;  %v5258_v17 = vsel %vm4755_vm1, %v3696_v0, %v1404_v9  ;;  %v2651_v31 = vld [vmem:[#allocation2 + $0x48] sm:$0xf]  ;;  %v2736_v61 = vshrl.u32 %v2648_v39, 16 }
  0xa4   : > { %4034 = vmatprep.mubr.msk.bf16.mxu1 %vm1064_vm12, %v3683_v14  ;;  %v5246_v53 = vrot.slane %v2721_v40, 5  ;;  %v2731_v14 = vshll.u32 %v5234_v21, 16  ;;  %v1421_v40 = vrot.slane %v4963_v63, 5  ;;  %v5274_v9 = vsel %vm4755_vm1, %v3698_v52, %v1418_v12  ;;  %v1360_v0 = vld [vmem:[#allocation2 + $0x48] sm:$0xe] }
  0xa5   : > { %v2718_v37 = vor.u32 %v2717_v48, %v2714_v44  ;;  %v5268_v47 = vsel %vm4755_vm1, %v1406_v4, %v1407_v7  ;;  %v4352_v44 = vld [vmem:[#allocation2 + $0x54] sm:$0xff]   ;;  %v1414_v48 = vrot.slane %v4849_v46, 5  ;;  %v5289_v7 = vld [vmem:[#allocation2 + $0x4c] sm:$0xf]  ;;  %v2760_v52 = vshrl.u32 %v2651_v31, 16 }
  0xa6   : > { %v2728_v63 = vor.u32 %v2727_v26, %v5246_v53  ;;  %v5287_v4 = vsel %vm4755_vm1, %v1420_v13, %v1421_v40  ;;  %v5679_v26 = vcombine.low %v5096_v16, %v5110_v15  ;;  %v2763_v12 = vshll.u32 %v2651_v31, 16  ;;  %v5301_v40 = vld [vmem:[#allocation2 + $0x44] sm:$0x1] }
  0xa7   : > { %v5295_v51 = vrot.slane %v2718_v37, 4  ;;  %v3699_v39 = vrot.slane %v1360_v0, 9  ;;  %v2769_v13 = vshll.u32 %v5289_v7, 16  ;;  %v2773_v16 = vshrl.u32 %v5289_v7, 16 }
  0xa8   : > { %v1425_v15 = vrot.slane %v4973_v29, 5  ;;  %v1428_v37 = vrot.slane %v4982_v50, 5  ;;  %v5312_v46 = vsel %vm4755_vm1, %v3697_v24, %v1411_v59  ;;  %v2738_v31 = vrot.slane %v2736_v61, 4 }
  0xa9   : > { %4117 = vmatmul.mubr.msk.bf16.gmra.mrb[4].mxu0 %vm1064_vm12, %v4349_v35  ;;  %v5270_v35 = vld [vmem:[#allocation2 + $0x40] sm:$0xf]  ;;  %v2741_v0 = vrot.slane %v2739_v30, 5  ;;  %v2762_v24 = vrot.slane %v2760_v52, 4  ;;  %v2765_v61 = vrot.slane %v2763_v12, 5  ;;  %v5328_v41 = vrot.slane %v2769_v13, 5 }
  0xaa   : > { %4120 = vmatprep.mubr.msk.bf16.mxu0 %vm1064_vm12, %v4351_v28  ;;  %v5281_v28 = vrot.slane %v2731_v14, 5  ;;  %v1413_v14 = vrot.slane %v1411_v59, 4  ;;  %v2749_v10 = vshrl.u32 %v5270_v35, 16  ;;  %v5323_v50 = vsel %vm4755_vm1, %v3699_v39, %v1425_v15  ;;  %v5326_v30 = vld [vmem:[#allocation2 + $0x50] sm:$0x1] }
  0xab   : > { %4035 = vmatmul.mubr.msk.bf16.gmra.mrb[12].mxu1 %vm1064_vm12, %v3684_v27  ;;  %v2745_v27 = vshll.u32 %v5270_v35, 16  ;;  %v2755_v59 = vshll.u32 %v5301_v40, 16  ;;  %v5680_v39 = vcombine.low %v5121_v25, %v5133_v23  ;;  %v3704_v52 = vcombine.low %v5258_v17, %v5268_v47  ;;  %v2654_v17 = vld [vmem:[#allocation2 + $0x54] sm:$0xf] }
  0xac   : > { %4040 = vmatprep.mubr.msk.bf16.mxu1 %vm1064_vm12, %v5679_v26  ;;  %v5308_v26 = vrot.slane %v2728_v63, 4  ;;  %v5317_v22 = vsel %vm4755_vm1, %v1413_v14, %v1414_v48  ;;  %v1427_v63 = vrot.slane %v1425_v15, 4  ;;  %v3700_v14 = vrot.slane %v1361_v45, 9  ;;  %v477_v15 = vld [vmem:[#allocation2 + $0x74] sm:$0x1] }
  0xad   : > { %v5319_v29 = vrot.slane %v2745_v27, 5  ;;  %v4355_v27 = vld [vmem:[#allocation2 + $0x6c] sm:$0xff]   ;;  %v2724_v12 = vsel %vm4632_vm13, %v5295_v51, %v5246_v53  ;;  %v5681_v25 = vcombine.low %v5228_v57, %v5232_v56  ;;  %v2742_v45 = vor.u32 %v2741_v0, %v2738_v31  ;;  %v2657_v51 = vld [vmem:[#allocation2 + $0x60] sm:$0xf] }
  0xae   : > { %v5332_v48 = vsel %vm4755_vm1, %v1427_v63, %v1428_v37  ;;  %v2734_v23 = vsel %vm4632_vm13, %v5308_v26, %v5281_v28  ;;  %v1432_v53 = vrot.slane %v5005_v54, 5  ;;  %v1435_v47 = vrot.slane %v5015_v18, 5  ;;  %v4364_v28 = vld [vmem:[%s5644_s3 + $0x8] sm:$0x3] }
  0xaf   : > { %v3707_v13 = vcombine.low %v5323_v50, %v5332_v48  ;;  %v5364_v56 = vrot.slane %v2755_v59, 5  ;;  %v2784_v37 = vshrl.u32 %v2654_v17, 16  ;;  %v2787_v26 = vshll.u32 %v2654_v17, 16  ;;  %v4356_v50 = vld [vmem:[#allocation2 + $0xc] sm:$0xff]  }
  0xb0   : > { %v5374_v18 = vsel %vm4755_vm1, %v3700_v14, %v1432_v53  ;;  %v2743_v63 = vrot.slane %v2742_v45, 4  ;;  %v2808_v59 = vshrl.u32 %v2657_v51, 16 }
  0xb1   : > { %4121 = vmatmul.mubr.msk.bf16.gmra.mrb[8].mxu0 %vm1064_vm12, %v4352_v44  ;;  %v2751_v44 = vrot.slane %v2749_v10, 4  ;;  %v5338_v10 = vcombine.low %v2700_v42, %v2710_v49  ;;  %v5357_v42 = vld [vmem:[#allocation2 + $0x58] sm:$0xf]  ;;  %v2779_v49 = vshll.u32 %v5326_v30, 16  ;;  %v2786_v17 = vrot.slane %v2784_v37, 4 }
  0xb2   : > { %4124 = vmatprep.mubr.msk.bf16.mxu0 %vm1064_vm12, %v4353_v60  ;;  %v2775_v60 = vrot.slane %v2773_v16, 4  ;;  %v2766_v16 = vor.u32 %v2765_v61, %v2762_v24  ;;  %v2793_v31 = vshll.u32 %v5357_v42, 16  ;;  %v2797_v0 = vshrl.u32 %v5357_v42, 16  ;;  %v5397_v61 = vld [vmem:[#allocation2 + $0x5c] sm:$0x1] }
  0xb3   : > { %4041 = vmatmul.mubr.msk.bf16.vlgmr.msra.gmra.mrb[0].mxu1 %vm1064_vm12, %v5680_v39  ;;  %v2752_v57 = vor.u32 %v2751_v44, %v5319_v29  ;;  %v2811_v24 = vshll.u32 %v2657_v51, 16  ;;  %v2781_v45 = vrot.slane %v2779_v49, 5 }
  0xb4   : > { %4057 = vmatpush3.bf16.msra.mxu1 %v5221_v32  ;;  %4044 = vmatprep.mubr.msk.bf16.mxu1 %vm1064_vm12, %v5681_v25  ;;  %v3705_v32 = vcombine.low %v5312_v46, %v5317_v22  ;;  %v2776_v54 = vor.u32 %v2775_v60, %v5328_v41  ;;  %v1434_v22 = vrot.slane %v1432_v53, 4  ;;  %v5376_v46 = vld [vmem:[#allocation2 + $0x64] sm:$0xf]  ;;  %v2767_v25 = vrot.slane %v2766_v16, 4 }
  0xb5   : > { %4299 = vmatprep.subr.msk.bf16.mxu1 %vm1089_vm0, %v4364_v28  ;;  %v2817_v60 = vshll.u32 %v5376_v46, 16  ;;  %v2821_v14 = vshrl.u32 %v5376_v46, 16  ;;  %v2753_v39 = vrot.slane %v2752_v57, 4  ;;  %v2789_v53 = vrot.slane %v2787_v26, 5 }
  0xb6   : > { %v5385_v44 = vsel %vm4755_vm1, %v1434_v22, %v1435_v47  ;;  %v2795_v47 = vrot.slane %v2793_v31, 5  ;;  %v2799_v51 = vrot.slane %v2797_v0, 4  ;;  %v3793_v28 = vcombine.low %v2724_v12, %v2734_v23 }
  0xb7   : > { %v3162_v22 = vsel %vm1089_vm0, %v5201_v5, 0  ;;  %v2810_v57 = vrot.slane %v2808_v59, 4  ;;  %v2813_v16 = vrot.slane %v2811_v24, 5  ;;  %v2819_v49 = vrot.slane %v2817_v60, 5 }
  0xb8   : > { %v2748_v12 = vsel %vm4632_vm13, %v2743_v63, %v5319_v29  ;;  %v2758_v23 = vsel %vm4632_vm13, %v2753_v39, %v5364_v56  ;;  %v2772_v5 = vsel %vm4632_vm13, %v2767_v25, %v5328_v41  ;;  %v2790_v37 = vor.u32 %v2789_v53, %v2786_v17 }
  0xb9   : > { %4125 = vmatmul.mubr.msk.bf16.gmra.mrb[12].mxu0 %vm1064_vm12, %v4355_v27  ;;  %v478_v27 = vsel %vm4491_vm5, 0, %v477_v15  ;;  %v2660_v15 = vld [vmem:[#allocation2 + $0x6c] sm:$0xf]  ;;  %v2800_v26 = vor.u32 %v2799_v51, %v2795_v47  ;;  %v2803_v29 = vshll.u32 %v5397_v61, 16  ;;  %v2841_v0 = vshll.u32 %v5399_v6, 16 }
  0xba   : > { %4130 = vmatprep.mubr.msk.bf16.mxu0 %vm1064_vm12, %v5250_v36  ;;  %v2777_v36 = vrot.slane %v2776_v54, 4  ;;  %479 = vst [vmem:[#allocation2 + $0x74] sm:$0x1] %v478_v27  ;;  %v2823_v54 = vrot.slane %v2821_v14, 4  ;;  %v2832_v56 = vshrl.u32 %v2660_v15, 16  ;;  %v2835_v31 = vshll.u32 %v2660_v15, 16 }
  0xbb   : > { %4045 = vmatmul.mubr.msk.bf16.gmra.mrb[4].mxu1 %vm1064_vm12, %v3704_v52  ;;  %v803_v52 = vrot.slane %v5125_v8, 4  ;;  %v2845_v41 = vshrl.u32 %v5399_v6, 16  ;;  %v2814_v63 = vor.u32 %v2813_v16, %v2810_v57  ;;  %v3794_v60 = vcombine.low %v2748_v12, %v2758_v23  ;;  %v3024_v15 = vld [vmem:[#allocation2 + $0x18] sm:$0xe] }
  0xbc   : > { %4048 = vmatprep.mubr.msk.bf16.mxu1 %vm1064_vm12, %v3705_v32  ;;  %v5411_v32 = vld [vmem:[#allocation2 + $0x68] sm:$0x1]  ;;  %v2782_v8 = vsel %vm4632_vm13, %v2777_v36, %v2781_v45  ;;  %v2824_v59 = vor.u32 %v2823_v54, %v2819_v49  ;;  %v5682_v27 = vcombine.low %v5274_v9, %v5287_v4  ;;  %v2791_v25 = vrot.slane %v2790_v37, 4 }
  0xbd   : > { %v3795_v39 = vcombine.low %v2772_v5, %v2782_v8  ;;  %v2801_v36 = vrot.slane %v2800_v26, 4  ;;  %v2805_v45 = vrot.slane %v2803_v29, 5  ;;  %v2834_v17 = vrot.slane %v2832_v56, 4  ;;  %v1818_v29 = vld [vmem:[#allocation2 + $0x48] sm:$0xf] }
  0xbe   : > { %v2837_v53 = vrot.slane %v2835_v31, 5  ;;  %v2843_v51 = vrot.slane %v2841_v0, 5  ;;  %v2847_v3 = vrot.slane %v2845_v41, 4  ;;  %v2796_v9 = vsel %vm4632_vm13, %v2791_v25, %v2795_v47  ;;  %v4357_v0 = vld [vmem:[#allocation2 + $0x18] sm:$0xff]   ;;  %v3026_v25 = vld [vmem:[#allocation2 + $0x30] sm:$0xe] }
  0xbf   : > { %v2806_v4 = vsel %vm4632_vm13, %v2801_v36, %v2805_v45  ;;  %v5683_v47 = vcombine.low %v5374_v18, %v5385_v44  ;;  %v3808_v26 = vrot.slane %v3024_v15, 9  ;;  %v1815_v41 = vld [vmem:[#allocation2 + $0x3c] sm:$0xf]  ;;  %v1948_v18 = vshrl.u32 %v1818_v29, 16 }
  0xc0   : > { %v2838_v48 = vor.u32 %v2837_v53, %v2834_v17  ;;  %v3796_v23 = vcombine.low %v2796_v9, %v2806_v4  ;;  %v1924_v36 = vshrl.u32 %v1815_v41, 16  ;;  %v1927_v45 = vshll.u32 %v1815_v41, 16 }
  0xc1   : > { %4131 = vmatmul.mubr.msk.bf16.vlgmr.msra.gmra.mrb[0].mxu0 %vm1064_vm12, %v5338_v10  ;;  %v2827_v10 = vshll.u32 %v5411_v32, 16  ;;  %v812_v24 = vld [vmem:[#allocation2 + $0x74] sm:$0x1]  ;;  %v1933_v53 = vshll.u32 %v4952_v58, 16  ;;  %v3075_v4 = vrot.slane %v5234_v21, 5 }
  0xc2   : > { %4134 = vmatprep.mubr.msk.bf16.mxu0 %vm1064_vm12, %v3793_v28  ;;  %4147 = vmatpush3.bf16.msra.mxu0 %v3162_v22  ;;  %v813_v14 = vsel %vm4483_vm3, %v803_v52, %v812_v24  ;;  %v2815_v28 = vrot.slane %v2814_v63, 4  ;;  %v2825_v22 = vrot.slane %v2824_v59, 4  ;;  %v3058_v52 = vrot.slane %v5147_v38, 5 }
  0xc3   : > { %4049 = vmatmul.mubr.msk.bf16.gmra.mrb[8].mxu1 %vm1064_vm12, %v5682_v27  ;;  %814 = vst [vmem:[#allocation2 + $0x74] sm:$0x1] %v813_v14  ;;  %v2829_v57 = vrot.slane %v2827_v10, 5  ;;  %v3061_v38 = vrot.slane %v5178_v2, 5  ;;  %v4358_v10 = vld [vmem:[#allocation2 + $0x24] sm:$0xff]   ;;  %v3065_v24 = vrot.slane %v5171_v43, 5 }
  0xc4   : > { %4052 = vmatprep.mubr.msk.bf16.mxu1 %vm1064_vm12, %v3707_v13  ;;  %v2848_v13 = vor.u32 %v2847_v3, %v2843_v51  ;;  %v2820_v16 = vsel %vm4632_vm13, %v2815_v28, %v2819_v49  ;;  %v2839_v49 = vrot.slane %v2838_v48, 4  ;;  %v3060_v31 = vrot.slane %v3058_v52, 4  ;;  %v4359_v48 = vld [vmem:[#allocation2 + $0x30] sm:$0xff]  }
  0xc5   : > { %v2830_v54 = vsel %vm4632_vm13, %v2825_v22, %v2829_v57  ;;  %v3059_v59 = vsel %vm4755_vm1, %v3808_v26, %v3058_v52  ;;  %v3072_v14 = vrot.slane %v5205_v33, 5  ;;  %v1950_v27 = vrot.slane %v1948_v18, 4  ;;  %v4365_v18 = vld [vmem:[#allocation2 + $0x44] sm:$0x1] }
  0xc6   : > { %v3797_v8 = vcombine.low %v2820_v16, %v2830_v54  ;;  %v2849_v37 = vrot.slane %v2848_v13, 4  ;;  %v2844_v44 = vsel %vm4632_vm13, %v2839_v49, %v2843_v51  ;;  %v3062_v2 = vsel %vm4755_vm1, %v3060_v31, %v3061_v38  ;;  %v1821_v31 = vld [vmem:[#allocation2 + $0x54] sm:$0xf] }
  0xc7   : > { %v1937_v51 = vshrl.u32 %v4952_v58, 16  ;;  %v3816_v43 = vcombine.low %v3059_v59, %v3062_v2  ;;  %v3067_v33 = vrot.slane %v3065_v24, 4  ;;  %v3068_v22 = vrot.slane %v5194_v34, 5  ;;  %v3027_v58 = vld [vmem:[#allocation2 + $0x3c] sm:$0xe] }
  0xc8   : > { %v3810_v57 = vrot.slane %v3026_v25, 9  ;;  %v3074_v9 = vrot.slane %v3072_v14, 4  ;;  %v3079_v13 = vrot.slane %v5270_v35, 5  ;;  %v1926_v16 = vrot.slane %v1924_v36, 4  ;;  %v3030_v36 = vld [vmem:[#allocation2 + $0x60] sm:$0xe] }
  0xc9   : > { %4135 = vmatmul.mubr.msk.bf16.gmra.mrb[4].mxu0 %vm1064_vm12, %v3794_v60  ;;  %v3025_v60 = vld [vmem:[#allocation2 + $0x24] sm:$0xe]  ;;  %v5473_v54 = vrot.slane %v1933_v53, 5  ;;  %v1939_v15 = vrot.slane %v1937_v51, 4  ;;  %v3069_v21 = vsel %vm4755_vm1, %v3067_v33, %v3068_v22  ;;  %v3086_v35 = vrot.slane %v5289_v7, 5 }
  0xca   : > { %4138 = vmatprep.mubr.msk.bf16.mxu0 %vm1064_vm12, %v3795_v39  ;;  %v5443_v12 = vld [vmem:[#allocation2 + $0x74] sm:$0x1]  ;;  %v1951_v39 = vshll.u32 %v1818_v29, 16  ;;  %v3809_v28 = vrot.slane %v3025_v60, 9  ;;  %v3081_v26 = vrot.slane %v3079_v13, 4  ;;  %v3082_v29 = vrot.slane %v5301_v40, 5 }
  0xcb   : > { %4053 = vmatmul.mubr.msk.bf16.gmra.mrb[12].mxu1 %vm1064_vm12, %v5683_v47  ;;  %v2851_v5 = vshll.u32 %v5443_v12, 16  ;;  %v3073_v47 = vsel %vm4755_vm1, %v3810_v57, %v3072_v14  ;;  %v5684_v7 = vsel %vm4632_vm13, %v5076_v62, %v5065_v20  ;;  %v1940_v41 = vor.u32 %v1939_v15, %v5473_v54 }
  0xcc   : > { %4058 = vmatprep.mubr.msk.bf16.mxu1 %vm1064_vm12, %v4356_v50  ;;  %v1953_v3 = vrot.slane %v1951_v39, 5  ;;  %v3066_v34 = vsel %vm4755_vm1, %v3809_v28, %v3065_v24  ;;  %v3089_v59 = vrot.slane %v5326_v30, 5  ;;  %v1972_v20 = vshrl.u32 %v1821_v31, 16  ;;  %v5685_v24 = vld [vmem:[#allocation3_spill] sm:$0xff]  ;;  %v4361_v39 = vld [vmem:[#allocation2 + $0x48] sm:$0xff]  }
  0xcd   : > { %v2853_v56 = vrot.slane %v2851_v5, 5  ;;  %v3076_v5 = vsel %vm4755_vm1, %v3074_v9, %v3075_v4  ;;  %v3817_v38 = vcombine.low %v3066_v34, %v3069_v21  ;;  %v1975_v62 = vshll.u32 %v1821_v31, 16  ;;  %v1824_v9 = vld [vmem:[#allocation2 + $0x60] sm:$0xf]  ;;  %v5686_v34 = vld [vmem:[#allocation5_spill] sm:$0xff] }
  0xce   : > { %v1954_v50 = vor.u32 %v1953_v3, %v1950_v27  ;;  %v1981_v2 = vshll.u32 %v5685_v24, 16  ;;  %v1985_v60 = vshrl.u32 %v5685_v24, 16  ;;  %v3083_v27 = vsel %vm4755_vm1, %v3081_v26, %v3082_v29  ;;  %v4362_v3 = vld [vmem:[#allocation2 + $0x54] sm:$0xff]  }
  0xcf   : > { %v2854_v63 = vsel %vm4632_vm13, %v2849_v37, %v2853_v56  ;;  %v3811_v37 = vrot.slane %v3027_v58, 9  ;;  %v3093_v25 = vrot.slane %v5357_v42, 5  ;;  %v3100_v28 = vrot.slane %v5376_v46, 5 }
  0xd0   : > { %v3798_v17 = vcombine.low %v2844_v44, %v2854_v63  ;;  %v1955_v52 = vrot.slane %v1954_v50, 4  ;;  %v3818_v44 = vcombine.low %v3073_v47, %v3076_v5  ;;  %v3088_v63 = vrot.slane %v3086_v35, 4  ;;  %v5687_v47 = vld [vmem:[#allocation4_spill] sm:$0xff] }
  0xd1   : > { %4139 = vmatmul.mubr.msk.bf16.gmra.mrb[8].mxu0 %vm1064_vm12, %v3796_v23  ;;  %v4360_v23 = vld [vmem:[#allocation2 + $0x3c] sm:$0xff]   ;;  %v3080_v14 = vsel %vm4755_vm1, %v3811_v37, %v3079_v13  ;;  %v1974_v33 = vrot.slane %v1972_v20, 4  ;;  %v1977_v22 = vrot.slane %v1975_v62, 5  ;;  %v1983_v57 = vrot.slane %v1981_v2, 5  ;;  %v5688_v2 = vld [vmem:[#allocation6_spill] sm:$0xff] }
  0xd2   : > { %4142 = vmatprep.mubr.msk.bf16.mxu0 %vm1064_vm12, %v3797_v8  ;;  %v3028_v8 = vld [vmem:[#allocation2 + $0x48] sm:$0xe]  ;;  %v1960_v49 = vsel %vm4632_vm13, %v1955_v52, %v5012_v11  ;;  %v1943_v11 = vshll.u32 %v4365_v18, 16  ;;  %v3090_v51 = vsel %vm4755_vm1, %v3088_v63, %v3089_v59  ;;  %v1987_v42 = vrot.slane %v1985_v60, 4 }
  0xd3   : > { %4059 = vmatmul.mubr.msk.bf16.vlgmr.msra.gmra.mrb[0].mxu1 %vm1064_vm12, %v4357_v0  ;;  %v5494_v56 = vcombine.low %v1960_v49, %v5684_v7  ;;  %v3812_v40 = vrot.slane %v3028_v8, 9  ;;  %v3819_v4 = vcombine.low %v3080_v14, %v3083_v27  ;;  %v3096_v50 = vrot.slane %v5397_v61, 5  ;;  %v4363_v49 = vld [vmem:[#allocation2 + $0x60] sm:$0xff]   ;;  %v3031_v7 = vld [vmem:[#allocation2 + $0x6c] sm:$0xe] }
  0xd4   : > { %4165 = vmatpush3.bf16.msra.mxu1 %v4476_v1  ;;  %4062 = vmatprep.mubr.msk.bf16.mxu1 %vm1064_vm12, %v4358_v10  ;;  %v1929_v1 = vrot.slane %v1927_v45, 5  ;;  %v3029_v10 = vld [vmem:[#allocation2 + $0x54] sm:$0xe]  ;;  %v1941_v45 = vrot.slane %v1940_v41, 4  ;;  %v3103_v13 = vrot.slane %v5411_v32, 5  ;;  %v3095_v58 = vrot.slane %v3093_v25, 4 }
  0xd5   : > { %v3087_v53 = vsel %vm4755_vm1, %v3812_v40, %v3086_v35  ;;  %v1996_v15 = vshrl.u32 %v1824_v9, 16  ;;  %v1999_v52 = vshll.u32 %v1824_v9, 16  ;;  %v2005_v61 = vshll.u32 %v5686_v34, 16 }
  0xd6   : > { %v1930_v0 = vor.u32 %v1929_v1, %v1926_v16  ;;  %v3820_v16 = vcombine.low %v3087_v53, %v3090_v51  ;;  %v2009_v21 = vshrl.u32 %v5686_v34, 16  ;;  %v3102_v32 = vrot.slane %v3100_v28, 4 }
  0xd7   : > { %v1988_v35 = vor.u32 %v1987_v42, %v1983_v57  ;;  %v1991_v5 = vshll.u32 %v5687_v47, 16  ;;  %v3107_v29 = vrot.slane %v5399_v6, 5  ;;  %v1998_v31 = vrot.slane %v1996_v15, 4 }
  0xd8   : > { %v1931_v30 = vrot.slane %v1930_v0, 4  ;;  %v2007_v0 = vrot.slane %v2005_v61, 5  ;;  %v2011_v41 = vrot.slane %v2009_v21, 4  ;;  %v3104_v18 = vsel %vm4755_vm1, %v3102_v32, %v3103_v13 }
  0xd9   : > { %4143 = vmatmul.mubr.msk.bf16.gmra.mrb[12].mxu0 %vm1064_vm12, %v3798_v17  ;;  %v1945_v17 = vrot.slane %v1943_v11, 5  ;;  %v1993_v40 = vrot.slane %v1991_v5, 5  ;;  %v3815_v59 = vrot.slane %v3031_v7, 9  ;;  %v3110_v6 = vrot.slane %v5443_v12, 5 }
  0xda   : > { %4148 = vmatprep.mubr.msk.bf16.mxu0 %vm1064_vm12, %v3816_v43  ;;  %v3813_v43 = vrot.slane %v3029_v10, 9  ;;  %v1936_v1 = vsel %vm4632_vm13, %v1931_v30, %v5473_v54  ;;  %v3097_v54 = vsel %vm4755_vm1, %v3095_v58, %v3096_v50  ;;  %v3109_v10 = vrot.slane %v3107_v29, 4 }
  0xdb   : > { %4063 = vmatmul.mubr.msk.bf16.gmra.mrb[4].mxu1 %vm1064_vm12, %v4359_v48  ;;  %v3814_v48 = vrot.slane %v3030_v36, 9  ;;  %v1946_v46 = vsel %vm4632_vm13, %v1941_v45, %v1945_v17  ;;  %v2012_v24 = vor.u32 %v2011_v41, %v2007_v0  ;;  %v2015_v60 = vshll.u32 %v5688_v2, 16 }
  0xdc   : > { %4066 = vmatprep.mubr.msk.bf16.mxu1 %vm1064_vm12, %v4360_v23  ;;  %v1978_v23 = vor.u32 %v1977_v22, %v1974_v33  ;;  %v3094_v8 = vsel %vm4755_vm1, %v3813_v43, %v3093_v25  ;;  %v3738_v26 = vcombine.low %v1936_v1, %v1946_v46  ;;  %v3111_v12 = vsel %vm4755_vm1, %v3109_v10, %v3110_v6 }
  0xdd   : > { %v3101_v37 = vsel %vm4755_vm1, %v3814_v48, %v3100_v28  ;;  %v3821_v63 = vcombine.low %v3094_v8, %v3097_v54  ;;  %v2013_v30 = vrot.slane %v2012_v24, 4  ;;  %v2017_v45 = vrot.slane %v2015_v60, 5 }
  0xde   : > { %v1979_v11 = vrot.slane %v1978_v23, 4  ;;  %v3822_v20 = vcombine.low %v3101_v37, %v3104_v18 }
  0xdf   : > { %v2018_v51 = vsel %vm4632_vm13, %v2013_v30, %v2017_v45 }
  0xe0   : > { %v1984_v14 = vsel %vm4632_vm13, %v1979_v11, %v1983_v57 }
  0xe1   : > { %4149 = vmatmul.mubr.msk.bf16.vlgmr.msra.gmra.mrb[0].mxu0 %vm1064_vm12, %v3817_v38  ;;  %v2001_v38 = vrot.slane %v1999_v52, 5 }
  0xe2   : > { %4152 = vmatprep.mubr.msk.bf16.mxu0 %vm1064_vm12, %v3818_v44  ;;  %v1989_v44 = vrot.slane %v1988_v35, 4 }
  0xe3   : > { %4067 = vmatmul.mubr.msk.bf16.gmra.mrb[8].mxu1 %vm1064_vm12, %v4361_v39  ;;  %v2002_v62 = vor.u32 %v2001_v38, %v1998_v31  ;;  %v3108_v39 = vsel %vm4755_vm1, %v3815_v59, %v3107_v29 }
  0xe4   : > { %4070 = vmatprep.mubr.msk.bf16.mxu1 %vm1064_vm12, %v4362_v3  ;;  %v1994_v27 = vsel %vm4632_vm13, %v1989_v44, %v1993_v40  ;;  %v3823_v17 = vcombine.low %v3108_v39, %v3111_v12 }
  0xe5   : > { %v3740_v25 = vcombine.low %v1984_v14, %v1994_v27  ;;  %v2003_v36 = vrot.slane %v2002_v62, 4 }
  0xe7   : > { %v2008_v53 = vsel %vm4632_vm13, %v2003_v36, %v2007_v0 }
  0xe8   : > { %v3741_v19 = vcombine.low %v2008_v53, %v2018_v51 }
  0xe9   : > { %4153 = vmatmul.mubr.msk.bf16.gmra.mrb[4].mxu0 %vm1064_vm12, %v3819_v4 }
  0xea   : > { %4156 = vmatprep.mubr.msk.bf16.mxu0 %vm1064_vm12, %v3820_v16 }
  0xeb   : > { %4071 = vmatmul.mubr.msk.bf16.gmra.mrb[12].mxu1 %vm1064_vm12, %v4363_v49 }
  0xec   : > { %4084 = vmatprep.mubr.msk.bf16.mxu1 %vm1064_vm12, %v3738_v26 }
  0xf1   : > { %4157 = vmatmul.mubr.msk.bf16.gmra.mrb[8].mxu0 %vm1064_vm12, %v3821_v63 }
  0xf2   : > { %4160 = vmatprep.mubr.msk.bf16.mxu0 %vm1064_vm12, %v3822_v20 }
  0xf3   : > { %4085 = vmatmul.mubr.msk.bf16.vlgmr.msra.gmra.mrb[8].mxu1 %vm1064_vm12, %v5494_v56 }
  0xf4   : > { %4088 = vmatprep.mubr.msk.bf16.mxu1 %vm1064_vm12, %v3740_v25 }
  0xf9   : > { %4161 = vmatmul.mubr.msk.bf16.gmra.mrb[12].mxu0 %vm1064_vm12, %v3823_v17 }
  0xfb   : > { %4089 = vmatmul.mubr.msk.bf16.gmra.mrb[12].mxu1 %vm1064_vm12, %v3741_v19 }
 0x1a6   : > { %v4060_v3 = vpop.f32.mrb[0].mxu1 }
 0x1a7   : > { %v1724_v43 = vpop.f32.mrb[1].mxu1 }
 0x1a8   : > { %v4061_v28 = vpop.f32.mrb[2].mxu1 }
 0x1a9   : > { %v1727_v33 = vpop.f32.mrb[3].mxu1 }
 0x1ae   : > { %v4064_v22 = vpop.f32.mrb[4].mxu1 }
 0x1af   : > { %v1740_v56 = vpop.f32.mrb[5].mxu1 }
 0x1b0   : > { %v4065_v57 = vpop.f32.mrb[6].mxu1 }
 0x1b1   : > { %v1743_v42 = vpop.f32.mrb[7].mxu1 }
 0x1b4   : > { %v4150_v9 = vpop.f32.mrb[0].mxu0 }
 0x1b5   : > { %v5560_v4 = vadd.f32 %v4150_v9, %v4060_v3  ;;  %v3198_v50 = vpop.f32.mrb[1].mxu0 }
 0x1b6   : > { %v5562_v55 = vadd.f32 %v3198_v50, %v1724_v43  ;;  %v4151_v48 = vpop.f32.mrb[2].mxu0 }
 0x1b7   : > { %v5564_v13 = vadd.f32 %v4151_v48, %v4061_v28  ;;  %v3201_v16 = vpop.f32.mrb[3].mxu0 }
 0x1b8   : > { %v5573_v58 = vadd.f32 %v3201_v16, %v1727_v33 }
 0x1b9   : > { %v3882_v1 = vpack.c.bf16 %v5564_v13, %v5560_v4 }
 0x1ba   : > { %v3277_v46 = vadd.f32 %v5573_v58, %v5562_v55  ;;  %v3877_v15 = vpack.c.bf16 %v5573_v58, %v5562_v55 }
 0x1bb   : > { %3914 = vst [vmem:[%s5571_s9 + $0x8] sm:$0xff] %v3882_v1  }
 0x1bc   : > { %v3278_v52 = vadd.f32 %v5560_v4, %v3277_v46  ;;  %3878 = vst [vmem:[%s5571_s9] sm:$0xff] %v3877_v15   ;;  %v4154_v34 = vpop.f32.mrb[4].mxu0 }
 0x1bd   : > { %v5584_v61 = vadd.f32 %v4154_v34, %v4064_v22  ;;  %v3214_v21 = vpop.f32.mrb[5].mxu0 }
 0x1be   : > { %v5586_v32 = vadd.f32 %v3214_v21, %v1740_v56  ;;  %v3279_v23 = vadd.f32 %v5564_v13, %v3278_v52  ;;  %v4155_v35 = vpop.f32.mrb[6].mxu0 }
 0x1bf   : > { %v5589_v47 = vadd.f32 %v4155_v35, %v4065_v57  ;;  %v3217_v5 = vpop.f32.mrb[7].mxu0 }
 0x1c0   : > { %v3280_v8 = vadd.f32 %v5586_v32, %v3279_v23  ;;  %v5592_v54 = vadd.f32 %v3217_v5, %v1743_v42 }
 0x1c1   : > { %v3892_v49 = vpack.c.bf16 %v5589_v47, %v5584_v61 }
 0x1c2   : > { %v3281_v37 = vadd.f32 %v5592_v54, %v3280_v8  ;;  %v3887_v26 = vpack.c.bf16 %v5592_v54, %v5586_v32 }
 0x1c3   : > { %3916 = vst [vmem:[%s5571_s9 + $0x18] sm:$0xff] %v3892_v49  }
 0x1c4   : > { %v3282_v29 = vadd.f32 %v5584_v61, %v3281_v37  ;;  %3915 = vst [vmem:[%s5571_s9 + $0x10] sm:$0xff] %v3887_v26   ;;  %v4158_v7 = vpop.f32.mrb[8].mxu0 }
 0x1c5   : > { %v3230_v31 = vpop.f32.mrb[9].mxu0 }
 0x1c6   : > { %v4159_v38 = vpop.f32.mrb[10].mxu0  ;;  %v3283_v0 = vadd.f32 %v5589_v47, %v3282_v29  ;;  %v4086_v18 = vpop.f32.mrb[8].mxu1 }
 0x1c7   : > { %v3233_v41 = vpop.f32.mrb[11].mxu0  ;;  %v4174_v11 = vadd.f32 %v4158_v7, %v4086_v18  ;;  %v2137_v44 = vpop.f32.mrb[9].mxu1 }
 0x1c8   : > { %v4175_v40 = vadd.f32 %v3230_v31, %v2137_v44  ;;  %v4087_v63 = vpop.f32.mrb[10].mxu1 }
 0x1c9   : > { %v4176_v59 = vadd.f32 %v4159_v38, %v4087_v63  ;;  %v2140_v10 = vpop.f32.mrb[11].mxu1 }
 0x1ca   : > { %v3284_v20 = vadd.f32 %v4175_v40, %v3283_v0  ;;  %v4177_v62 = vadd.f32 %v3233_v41, %v2140_v10 }
 0x1cb   : > { %v3902_v2 = vpack.c.bf16 %v4176_v59, %v4174_v11 }
 0x1cc   : > { %v4162_v6 = vpop.f32.mrb[12].mxu0  ;;  %v3285_v14 = vadd.f32 %v4177_v62, %v3284_v20  ;;  %v3897_v27 = vpack.c.bf16 %v4177_v62, %v4175_v40 }
 0x1cd   : > { %v3246_v24 = vpop.f32.mrb[13].mxu0  ;;  %3918 = vst [vmem:[%s5571_s9 + $0x28] sm:$0xff] %v3902_v2  }
 0x1ce   : > { %v4163_v60 = vpop.f32.mrb[14].mxu0  ;;  %v3286_v12 = vadd.f32 %v4174_v11, %v3285_v14  ;;  %3917 = vst [vmem:[%s5571_s9 + $0x20] sm:$0xff] %v3897_v27   ;;  %v4090_v25 = vpop.f32.mrb[12].mxu1 }
 0x1cf   : > { %v3249_v39 = vpop.f32.mrb[15].mxu0  ;;  %v4178_v36 = vadd.f32 %v4162_v6, %v4090_v25  ;;  %v2153_v30 = vpop.f32.mrb[13].mxu1 }
 0x1d0   : > { %v4179_v45 = vadd.f32 %v3246_v24, %v2153_v30  ;;  %v3287_v17 = vadd.f32 %v4176_v59, %v3286_v12  ;;  %v4091_v53 = vpop.f32.mrb[14].mxu1 }
 0x1d1   : > { %v4180_v51 = vadd.f32 %v4163_v60, %v4091_v53  ;;  %v2156_v19 = vpop.f32.mrb[15].mxu1 }
 0x1d2   : > { %v3288_v3 = vadd.f32 %v4179_v45, %v3287_v17  ;;  %v4181_v43 = vadd.f32 %v3249_v39, %v2156_v19 }
 0x1d3   : > { %v3912_v28 = vpack.c.bf16 %v4180_v51, %v4178_v36 }
 0x1d4   : > { %v3289_v33 = vadd.f32 %v4181_v43, %v3288_v3  ;;  %v3907_v22 = vpack.c.bf16 %v4181_v43, %v4179_v45 }
 0x1d5   : > { %3920 = vst [vmem:[%s5571_s9 + $0x38] sm:$0xff] %v3912_v28  }
 0x1d6   : > { %v3290_v56 = vadd.f32 %v4178_v36, %v3289_v33  ;;  %3919 = vst [vmem:[%s5571_s9 + $0x30] sm:$0xff] %v3907_v22  }
 0x1d8   : > { %v3291_v57 = vadd.f32 %v4180_v51, %v3290_v56 }
 0x1da   : > { %v3292_v42 = vrot.slane %v3291_v57, 4 }
 0x1dc   : > { %v3293_v9 = vadd.f32 %v3292_v42, %v3291_v57 }
 0x1de   : > { %v3294_v50 = vrot.slane %v3293_v9, 2 }
 0x1e0   : > { %v3295_v48 = vadd.f32 %v3294_v50, %v3293_v9 }
 0x1e2   : > { %v3296_v16 = vrot.slane %v3295_v48, 1 }
 0x1e4   : > { %v3297_v1 = vadd.f32 %v3296_v16, %v3295_v48 }
 0x1e6   : > { %v3298_v46 = vmul.f32 0.0078125, %v3297_v1  ;;  %3315 = vst [vmem:[%s5614_s27] sm:$0x1] %v3297_v1 }
 0x1e8   : > { %v3299_v15 = vsub.f32 %v5562_v55, %v3298_v46  ;;  %v3300_v52 = vsub.f32 %v5573_v58, %v3298_v46  ;;  %v3301_v34 = vsub.f32 %v5560_v4, %v3298_v46  ;;  %v3302_v21 = vsub.f32 %v5564_v13, %v3298_v46 }
 0x1e9   : > { %v3303_v23 = vsub.f32 %v5586_v32, %v3298_v46  ;;  %v3304_v35 = vsub.f32 %v5592_v54, %v3298_v46  ;;  %v3305_v5 = vsub.f32 %v5584_v61, %v3298_v46  ;;  %v3306_v8 = vsub.f32 %v5589_v47, %v3298_v46 }
 0x1ea   : > { %v3307_v49 = vsub.f32 %v4175_v40, %v3298_v46  ;;  %v3308_v37 = vsub.f32 %v4177_v62, %v3298_v46  ;;  %v3309_v26 = vsub.f32 %v4174_v11, %v3298_v46  ;;  %v3310_v29 = vsub.f32 %v4176_v59, %v3298_v46 }
 0x1eb   : > { %v3311_v7 = vsub.f32 %v4179_v45, %v3298_v46  ;;  %v3312_v55 = vsub.f32 %v4181_v43, %v3298_v46  ;;  %v3313_v31 = vsub.f32 %v4178_v36, %v3298_v46  ;;  %v3314_v58 = vsub.f32 %v4180_v51, %v3298_v46 }
 0x1ec   : > { %v3316_v38 = vmul.f32 %v3299_v15, %v3299_v15  ;;  %v3317_v4 = vmul.f32 %v3300_v52, %v3300_v52  ;;  %v3318_v0 = vmul.f32 %v3301_v34, %v3301_v34  ;;  %v3319_v41 = vmul.f32 %v3302_v21, %v3302_v21 }
 0x1ed   : > { %v3320_v18 = vmul.f32 %v3303_v23, %v3303_v23  ;;  %v3321_v44 = vmul.f32 %v3304_v35, %v3304_v35  ;;  %v3322_v63 = vmul.f32 %v3305_v5, %v3305_v5  ;;  %v3323_v40 = vmul.f32 %v3306_v8, %v3306_v8 }
 0x1ee   : > { %v3332_v13 = vadd.f32 %v3317_v4, %v3316_v38  ;;  %v3324_v11 = vmul.f32 %v3307_v49, %v3307_v49  ;;  %v3325_v6 = vmul.f32 %v3308_v37, %v3308_v37  ;;  %v3326_v62 = vmul.f32 %v3309_v26, %v3309_v26 }
 0x1ef   : > { %v3327_v2 = vmul.f32 %v3310_v29, %v3310_v29  ;;  %v3328_v14 = vmul.f32 %v3311_v7, %v3311_v7  ;;  %v3329_v39 = vmul.f32 %v3312_v55, %v3312_v55  ;;  %v3330_v25 = vmul.f32 %v3313_v31, %v3313_v31 }
 0x1f0   : > { %v3333_v32 = vadd.f32 %v3332_v13, %v3318_v0  ;;  %v3331_v30 = vmul.f32 %v3314_v58, %v3314_v58 }
 0x1f2   : > { %v3334_v54 = vadd.f32 %v3333_v32, %v3319_v41 }
 0x1f4   : > { %v3335_v61 = vadd.f32 %v3334_v54, %v3320_v18 }
 0x1f6   : > { %v3336_v47 = vadd.f32 %v3335_v61, %v3321_v44 }
 0x1f8   : > { %v3337_v10 = vadd.f32 %v3336_v47, %v3322_v63 }
 0x1fa   : > { %v3338_v59 = vadd.f32 %v3337_v10, %v3323_v40 }
 0x1fc   : > { %v3339_v20 = vadd.f32 %v3338_v59, %v3324_v11 }
 0x1fe   : > { %v3340_v24 = vadd.f32 %v3339_v20, %v3325_v6 }
 0x200   : > { %v3341_v60 = vadd.f32 %v3340_v24, %v3326_v62 }
 0x202   : > { %v3342_v27 = vadd.f32 %v3341_v60, %v3327_v2 }
 0x204   : > { %v3343_v12 = vadd.f32 %v3342_v27, %v3328_v14 }
 0x206   : > { %v3344_v36 = vadd.f32 %v3343_v12, %v3329_v39 }
 0x208   : > { %v3345_v45 = vadd.f32 %v3344_v36, %v3330_v25 }
 0x20a   : > { %v3346_v17 = vadd.f32 %v3345_v45, %v3331_v30 }
 0x20c   : > { %v3347_v53 = vrot.slane %v3346_v17, 4 }
 0x20e   : > { %v3348_v51 = vadd.f32 %v3347_v53, %v3346_v17 }
 0x210   : > { %v3349_v19 = vrot.slane %v3348_v51, 2 }
 0x212   : > { %v3350_v3 = vadd.f32 %v3349_v19, %v3348_v51 }
 0x214   : > { %v3351_v43 = vrot.slane %v3350_v3, 1 }
 0x216   : > { %v3352_v28 = vadd.f32 %v3351_v43, %v3350_v3 }
 0x218   : > { %3353 = vst [vmem:[%s5614_s27 + $0x1] sm:$0x1] %v3352_v28 }
 0x219 PF: > { %s16_s22 = sadd.s32 1, %s4404_s22   ;;  %s5689_s18 = smov %s4396_s20 }
 0x21a   : > { %p13_p0 = scmp.ge.s32.totalorder %s16_s22, 6   ;;  %s5690_s19 = smov %s4400_s21 }
 0x21b   : > { %s5691_s20 = smov %s5694_s23  ;;  %s5692_s21 = smov %s5698_s24 }
 0x21c   :  { %15 = sbr.rel (!%p13_p0) target bundleno = 3 (0x3), region = 87 }

// kernel: conv_block_nested_forward.4
= control target key start
LH: loop header
LB: loop body
LE: loop exit
PB: predicated region body
PF: predicated region fallthrough
CT: control target
= control target key end

     0   :  { %s5429_s24 = smov 0   ;;  %s5431_s25 = smov 0   ;;  %s6684_s0 = inlined_call_operand.vmem [shape: bf16[2,16,16,128], index: 0, kind: input, shape index: {}, may-alias: {0,1,2}]   ;;  %s6685_s1 = inlined_call_operand.vmem [shape: bf16[2,16,16,128], index: 1, kind: input, shape index: {}, may-alias: {0,1,2}]   ;;  %s6686_s2 = inlined_call_operand.vmem [shape: bf16[2,16,16,128], index: 2, kind: input, shape index: {}, may-alias: {0,1,2}]   ;;  %s6687_s3 = inlined_call_operand.vmem [shape: f32[1,128], index: 3, kind: input, shape index: {}]   ;;  %s6688_s4 = inlined_call_operand.vmem [shape: f32[1,128], index: 4, kind: input, shape index: {}]   ;;  %s6689_s5 = inlined_call_operand.vmem [shape: bf16[1152,128], index: 5, kind: input, shape index: {}]   ;;  %s6690_s6 = inlined_call_operand.vmem [shape: bf16[2,16,16,128], index: 6, kind: output, shape index: {0}]   ;;  %s6691_s7 = inlined_call_operand.vmem [shape: f32[2,2,2,128], index: 7, kind: output, shape index: {1}]  }
   0x1   :  { %s5433_s26 = smov 0   ;;  %s5435_s27 = smov 0  }
   0x2   :  { %s5437_s28 = smov 0  }
   0x3 LB: > { %s27_s29 = sadd.s32 1, %s5379_s26  ;;  %s30_s30 = sadd.s32 1, %s5383_s27  ;;  %s5387_s28 = sphi %s5437_s28, %s18_s28   ;;  %s5383_s27 = sphi %s5435_s27, %s6708_s27   ;;  %s5379_s26 = sphi %s5433_s26, %s6707_s26   ;;  %s5375_s25 = sphi %s5431_s25, %s6706_s25   ;;  %s5371_s24 = sphi %s5429_s24, %s6705_s24  }
   0x4   : > { %p28_p0 = scmp.ge.s32.totalorder %s27_s29, 2  ;;  %p4243_p1 = scmp.ge.s32.totalorder %s5387_s28, 1 }
   0x5   : > { %p328_p2 = scmp.lt.s32.totalorder %s5387_s28, 5 }
   0x6   : > { %s6710_s29 = smov (%p28_p0, %s27_s29), 0  ;;  %s6712_s30 = smov (!%p28_p0, %s30_s30), %s5383_s27 }
   0x7   : > { %p329_p3 = pnand %p4243_p1, %p328_p2  ;;  %p32_p4 = scmp.ge.s32.totalorder %s6712_s30, 2 }
   0x8   : > { %v5233_v0 = vld [vmem:[%s6689_s5 + $0x100] sm:$0xff] (!%p329_p3)   ;;  %s5465_s10 = sshll.u32 (!%p329_p3), %s5371_s24, 3  ;;  %v5234_v1 = vld [vmem:[%s6689_s5 + $0x108] sm:$0xff] (!%p329_p3)   ;;  %p405_p5 = scmp.lt.s32.totalorder (!%p329_p3), %s5375_s25, 1  ;;  %v5236_v3 = vld [vmem:[%s6689_s5 + $0x110] sm:$0xff] (!%p329_p3)   ;;  %vm469_vm0 = vcmask (!%p329_p3), 1040384  }
   0x9   : > { %s6714_s30 = smov (%p32_p4, %s6712_s30), 0  ;;  %332 = sbr.rel (%p329_p3) target bundleno = 576 (0x240), region = 44 }
   0xa   : > { %4889 = vmatprep.subr.bf16.mxu0 (!%p329_p3), %v5233_v0  ;;  %v5235_v2 = vld [vmem:[%s6689_s5 + $0x40] sm:$0xff] (!%p329_p3)   ;;  %p407_p6 = scmp.lt.s32.totalorder (!%p329_p3), %s5465_s10, 15  ;;  %v5237_v4 = vld [vmem:[%s6689_s5 + $0x48] sm:$0xff] (!%p329_p3)   ;;  %v5239_v5 = vld [vmem:[%s6689_s5 + $0x50] sm:$0xff] (!%p329_p3)   ;;  %s4249_s15 = sadd.s32 (!%p329_p3), 4294967295, %s5465_s10  ;;  %vm839_vm6 = vcmask (!%p329_p3), 1043456  }
   0xb   : > { %4890 = vmatpush3.bf16.msra.mxu0 (!%p329_p3), %v5233_v0  ;;  %4761 = vmatprep.subr.bf16.mxu1 (!%p329_p3), %v5235_v2  ;;  %v5238_v6 = vld [vmem:[%s6689_s5 + $0x118] sm:$0xff] (!%p329_p3)   ;;  %p417_p7 = scmp.gt.s32.totalorder (!%p329_p3), %s4249_s15, 0  ;;  %v5240_v8 = vld [vmem:[%s6689_s5 + $0x120] sm:$0xff] (!%p329_p3)   ;;  %p4250_p8 = scmp.lt.s32.totalorder (!%p329_p3), %s4249_s15, 15  ;;  %v5242_v9 = vld [vmem:[%s6689_s5 + $0x128] sm:$0xff] (!%p329_p3)   ;;  %vm1693_vm12 = vcmask (!%p329_p3), 1042432  }
   0xc   : > { %4891 = vmatprep.subr.bf16.mxu0 (!%p329_p3), %v5234_v1  ;;  %4762 = vmatpush3.bf16.msra.mxu1 (!%p329_p3), %v5235_v2  ;;  %v5241_v7 = vld [vmem:[%s6689_s5 + $0x58] sm:$0xff] (!%p329_p3)   ;;  %v5243_v10 = vld [vmem:[%s6689_s5 + $0x60] sm:$0xff] (!%p329_p3)   ;;  %vm470_vm1 = vsmask.f32 (!%p329_p3), 256  ;;  %v475_v11 = vld [vmem:[#allocation2 + $0xc] sm:$0x1] (!%p329_p3) }
   0xd   : > { %4763 = vmatprep.subr.bf16.mxu1 (!%p329_p3), %v5237_v4  ;;  %vm502_vm2 = vsmask.f32 (!%p329_p3), 7938  ;;  %vm5518_vm3 = vmand (!%p329_p3), %vm469_vm0, %vm470_vm1  ;;  %v507_v13 = vld [vmem:[#allocation2 + $0x14] sm:$0x1] (!%p329_p3)  ;;  %v5535_v19 = vld [vmem:[%s6687_s3] ss:$0 sm:$0xff] (!%p329_p3) }
   0xe   : > { %v476_v15 = vsel (!%p329_p3), %vm5518_vm3, 0, %v475_v11  ;;  %vm5528_vm4 = vmand (!%p329_p3), %vm469_vm0, %vm502_vm2  ;;  %v5245_v20 = vld [vmem:[%s6689_s5 + $0x68] sm:$0xff] (!%p329_p3)   ;;  %v5545_v22 = vld [vmem:[%s6688_s4] ss:$0 sm:$0xff] (!%p329_p3)  ;;  %vm676_vm5 = vsmask.f32 (!%p329_p3), 4368 }
   0xf   : > { %4892 = vmatpush3.bf16.msra.mxu0 (!%p329_p3), %v5234_v1  ;;  %477 = vst [vmem:[#allocation2 + $0xc] sm:$0x1] (!%p329_p3), %v476_v15  ;;  %v508_v21 = vsel (!%p329_p3), %vm5528_vm4, 0, %v507_v13  ;;  %v5244_v23 = vld [vmem:[%s6689_s5 + $0x130] sm:$0xff] (!%p329_p3)   ;;  %v478_v27 = vld [vmem:[#allocation2 + $0x18] sm:$0x1] (!%p329_p3)  ;;  %vm5585_vm7 = vmor (!%p329_p3), %vm470_vm1, %vm676_vm5 }
  0x10   : > { %s6716_s25 = smov (!%p405_p5, %s5375_s25), 1  ;;  %4893 = vmatprep.subr.bf16.mxu0 %v5236_v3  ;;  %4764 = vmatpush3.bf16.msra.mxu1 %v5237_v4  ;;  %509 = vst [vmem:[#allocation2 + $0x14] sm:$0x1] %v508_v21  ;;  %v5247_v26 = vld [vmem:[%s6689_s5 + $0x70] sm:$0xff]   ;;  %v510_v28 = vld [vmem:[#allocation2 + $0x20] sm:$0x1]  ;;  %vm5601_vm8 = vmand %vm839_vm6, %vm502_vm2 }
  0x11   : > { %s408_s19 = scalar_select %p407_p6, %s5465_s10, 15  ;;  %4765 = vmatprep.subr.bf16.mxu1 %v5239_v5  ;;  %v479_v31 = vsel %vm5518_vm3, 0, %v478_v27  ;;  %v511_v32 = vsel %vm5528_vm4, 0, %v510_v28  ;;  %v472_v38 = vld [vmem:[#allocation2] sm:$0x1]  ;;  %v5246_v39 = vld [vmem:[%s6689_s5 + $0x138] sm:$0xff]  }
  0x12   : > { %s5484_s20 = sshll.u32 %s6716_s25, 5  ;;  %p922_p9 = scmp.gt.s32.totalorder %s5371_s24, 0  ;;  %480 = vst [vmem:[#allocation2 + $0x18] sm:$0x1] %v479_v31  ;;  %512 = vst [vmem:[#allocation2 + $0x20] sm:$0x1] %v511_v32 }
  0x13   : > { %s4245_s23 = sshll.u32 %s408_s19, 1  ;;  %4894 = vmatpush3.bf16.msra.mxu0 %v5236_v3  ;;  %v473_v42 = vsel %vm5518_vm3, 0, %v472_v38  ;;  %v504_v43 = vld [vmem:[#allocation2 + $0x8] sm:$0x1]  ;;  %v5249_v50 = vld [vmem:[%s6689_s5 + $0x78] sm:$0xff]   ;;  %v5594_v59 = vld [vmem:[%s6689_s5 + $0x140] sm:$0xff]  }
  0x14   : > { %s5490_s8 = sadd.s32 %s5484_s20, %s4245_s23  ;;  %4895 = vmatprep.subr.bf16.mxu0 %v5238_v6  ;;  %4766 = vmatpush3.bf16.msra.mxu1 %v5239_v5  ;;  %474 = vst [vmem:[#allocation2] sm:$0x1] %v473_v42  ;;  %v505_v46 = vsel %vm5528_vm4, 0, %v504_v43  ;;  %v481_v5 = vld [vmem:[#allocation2 + $0x24] sm:$0x1]  ;;  %vm1694_vm13 = vcmask 1046532  }
  0x15   : > { %s4247_s12 = sshll.u32 %s5490_s8, 2  ;;  %4767 = vmatprep.subr.bf16.mxu1 %v5241_v7  ;;  %506 = vst [vmem:[#allocation2 + $0x8] sm:$0x1] %v505_v46  ;;  %v5611_v13 = vld [vmem:[%s6689_s5] sm:$0xff]   ;;  %v484_v21 = vld [vmem:[#allocation2 + $0x30] sm:$0x1]  ;;  %vm5992_vm14 = vmor %vm1693_vm12, %vm1694_vm13 }
  0x16   : > { %s5508_s21 = scalar_lea.vmem %s6684_s0, %s4247_s12  ;;  %v841_v58 = vld [vmem:[#allocation2 + $0xc] sm:$0xf]  ;;  %vm1088_vm9 = vsmask.f32 3328  ;;  %vm1089_vm10 = vsmask.f32 7440 }
  0x17   : > { %s418_s22 = scalar_select %p417_p7, %s4249_s15, 0  ;;  %4896 = vmatpush3.bf16.msra.mxu0 %v5238_v6  ;;  %v4524_v14 = vld [vmem:[%s5508_s21] sm:$0xff]   ;;  %v4603_v33 = vld [vmem:[%s5508_s21 + $0x8] sm:$0xff]   ;;  %v4604_v0 = vld [vmem:[%s5508_s21 + $0x10] sm:$0xff]  }
  0x18   : > { %4897 = vmatprep.subr.bf16.mxu0 %v5240_v8  ;;  %4768 = vmatpush3.bf16.msra.mxu1 %v5241_v7  ;;  %v4525_v17 = vunpack.c.l.bf16 %v4524_v14  ;;  %v4526_v18 = vunpack.c.h.bf16 %v4524_v14  ;;  %v4529_v34 = vunpack.c.l.bf16 %v4603_v33  ;;  %v4530_v35 = vunpack.c.h.bf16 %v4603_v33  ;;  %s923_s9 = scalar_select %p922_p9, 1, 0  ;;  %v845_v4 = vld [vmem:[#allocation2 + $0x14] sm:$0x1]  ;;  %v513_v14 = vld [vmem:[#allocation2 + $0x2c] sm:$0x1]  ;;  %vm5663_vm11 = vmor %vm1088_vm9, %vm1089_vm10 }
  0x19   : > { %s6718_s22 = smov (!%p4250_p8, %s418_s22), 15  ;;  %4769 = vmatprep.subr.bf16.mxu1 %v5243_v10  ;;  %v4533_v6 = vunpack.c.l.bf16 %v4604_v0  ;;  %v4534_v7 = vunpack.c.h.bf16 %v4604_v0  ;;  %v852_v31 = vld [vmem:[#allocation2 + $0x20] sm:$0x1]  ;;  %v516_v33 = vld [vmem:[#allocation2 + $0x38] sm:$0x1]  ;;  %v514_v38 = vsel %vm5528_vm4, 0, %v513_v14 }
  0x1a   : > { %v573_v24 = vmul.f32 %v4525_v17, %v5535_v19  ;;  %v574_v25 = vmul.f32 %v4526_v18, %v5535_v19  ;;  %s4255_s11 = sshll.u32 %s6718_s22, 1  ;;  %v575_v40 = vmul.f32 %v4529_v34, %v5535_v19  ;;  %v576_v41 = vmul.f32 %v4530_v35, %v5535_v19  ;;  %s5589_s14 = scvt.s32.f32 %s923_s9  ;;  %v4605_v42 = vld [vmem:[%s5508_s21 + $0x18] sm:$0xff]   ;;  %515 = vst [vmem:[#allocation2 + $0x2c] sm:$0x1] %v514_v38 }
  0x1b   : > { %4898 = vmatpush3.bf16.msra.mxu0 %v5240_v8  ;;  %s425_s16 = sadd.s32 %s4255_s11, %s5484_s20  ;;  %p462_p12 = scmp.lt.s32.totalorder %s5371_s24, 1 }
  0x1c   : > { %4899 = vmatprep.subr.bf16.mxu0 %v5242_v9  ;;  %4770 = vmatpush3.bf16.msra.mxu1 %v5243_v10  ;;  %v596_v29 = vadd.f32 %v5545_v22, %v573_v24  ;;  %v597_v30 = vadd.f32 %v5545_v22, %v574_v25  ;;  %s4257_s22 = sshll.u32 %s425_s16, 2  ;;  %v598_v48 = vadd.f32 %v5545_v22, %v575_v40  ;;  %s927_s15 = sshrl.u32 %s5589_s14, 16 }
  0x1d   : > { %4771 = vmatprep.subr.bf16.mxu1 %v5245_v20  ;;  %s427_s23 = scalar_lea.vmem %s6685_s1, %s4257_s22  ;;  %v599_v49 = vadd.f32 %v5545_v22, %v576_v41  ;;  %p926_p10 = scmp.ne.f32.partialorder %s5589_s14, %s5589_s14  ;;  %v578_v40 = vmul.f32 %v4534_v7, %v5535_v19  ;;  %v485_v41 = vsel %vm5518_vm3, 0, %v484_v21 }
  0x1e   : > { %v612_v36 = vmax.f32 %v596_v29, 0.0  ;;  %v613_v37 = vmax.f32 %v597_v30, 0.0  ;;  %v4556_v47 = vld [vmem:[%s427_s23] sm:$0xff]   ;;  %v614_v60 = vmax.f32 %v598_v48, 0.0  ;;  %s928_s19 = sand.u32 1, %s927_s15  ;;  %s6728_s24 = smov (!%p462_p12, %s5371_s24), 1 }
  0x1f   : > { %4900 = vmatpush3.bf16.msra.mxu0 %v5242_v9  ;;  %v4557_v51 = vunpack.c.l.bf16 %v4556_v47  ;;  %v4558_v52 = vunpack.c.h.bf16 %v4556_v47  ;;  %v615_v61 = vmax.f32 %v599_v49, 0.0  ;;  %s929_s23 = sadd.s32 32767, %s928_s19  ;;  %v848_v30 = vld [vmem:[#allocation2 + $0x18] sm:$0xf]  ;;  %486 = vst [vmem:[#allocation2 + $0x30] sm:$0x1] %v485_v41  ;;  %v601_v49 = vadd.f32 %v5545_v22, %v578_v40 }
  0x20   : > { %4901 = vmatprep.subr.bf16.mxu0 %v5244_v23  ;;  %4772 = vmatpush3.bf16.msra.mxu1 %v5245_v20  ;;  %v4491_v44 = vpack.c.bf16 %v612_v36, %v612_v36  ;;  %v4492_v45 = vpack.c.bf16 %v613_v37, %v613_v37  ;;  %v4493_v8 = vpack.c.bf16 %v614_v60, %v614_v60  ;;  %s930_s9 = sadd.s32 %s929_s23, %s5589_s14  ;;  %v482_v37 = vsel %vm5518_vm3, 0, %v481_v5  ;;  %v519_v60 = vld [vmem:[#allocation2 + $0x44] sm:$0x1]  ;;  %s4269_s8 = sshll.u32 %s6716_s25, 1 }
  0x21   : > { %4773 = vmatprep.subr.bf16.mxu1 %v5247_v26  ;;  %v908_v62 = vmul.f32 %v4557_v51, %v5535_v19  ;;  %v909_v63 = vmul.f32 %v4558_v52, %v5535_v19  ;;  %v4494_v9 = vpack.c.bf16 %v615_v61, %v615_v61  ;;  %s931_s11 = sand.u32 4294901760, %s930_s9  ;;  %483 = vst [vmem:[#allocation2 + $0x24] sm:$0x1] %v482_v37  ;;  %v4538_v5 = vunpack.c.h.bf16 %v4605_v42 }
  0x22   : > { %v679_v54 = vshrl.u32 %v4491_v44, 16  ;;  %v682_v55 = vshll.u32 %v4491_v44, 16  ;;  %v687_v56 = vshrl.u32 %v4492_v45, 16  ;;  %v690_v57 = vshll.u32 %v4492_v45, 16  ;;  %s6720_s11 = smov (%p926_p10, %s931_s11), 2143289344 }
  0x23   : > { %4902 = vmatpush3.bf16.msra.mxu0 %v5244_v23  ;;  %v917_v10 = vadd.f32 %v5545_v22, %v908_v62  ;;  %v918_v11 = vadd.f32 %v5545_v22, %v909_v63  ;;  %v696_v23 = vshrl.u32 %v4493_v8, 16  ;;  %v699_v24 = vshll.u32 %v4493_v8, 16  ;;  %s934_s13 = sshrl.u32 %s6720_s11, 16 }
  0x24   : > { %4903 = vmatprep.subr.bf16.mxu0 %v5246_v39  ;;  %v681_v1 = vrot.slane %v679_v54, 7  ;;  %v689_v2 = vrot.slane %v687_v56, 7  ;;  %4774 = vmatpush3.bf16.msra.mxu1 %v5247_v26  ;;  %v704_v25 = vshrl.u32 %v4494_v9, 16  ;;  %v707_v26 = vshll.u32 %v4494_v9, 16  ;;  %s935_s14 = sshll.u32 %s934_s13, 16 }
  0x25   : > { %4775 = vmatprep.subr.bf16.mxu1 %v5249_v50  ;;  %v919_v32 = vmax.f32 %v917_v10, 0.0  ;;  %v698_v34 = vrot.slane %v696_v23, 7  ;;  %v920_v36 = vmax.f32 %v918_v11, 0.0  ;;  %s936_s16 = sor.u32 %s935_s14, %s934_s13  ;;  %v617_v62 = vmax.f32 %v601_v49, 0.0 }
  0x26   : > { %v684_v15 = vor.u32 %v682_v55, %v681_v1  ;;  %v685_v17 = vrot.slane %v681_v1, 4  ;;  %v692_v18 = vor.u32 %v690_v57, %v689_v2  ;;  %v694_v20 = vrot.slane %v689_v2, 4  ;;  %v487_v55 = vld [vmem:[#allocation2 + $0x3c] sm:$0x1] }
  0x27   : > { %4904 = vmatpush3.bf16.msra.mxu0 %v5246_v39  ;;  %v706_v35 = vrot.slane %v704_v25, 7  ;;  %v577_v39 = vmul.f32 %v4533_v6, %v5535_v19  ;;  %v701_v43 = vor.u32 %v699_v24, %v698_v34  ;;  %v702_v44 = vrot.slane %v698_v34, 4 }
  0x28   : > { %4921 = vmatprep.subr.bf16.mxu0 %v5594_v59  ;;  %v693_v27 = vsel %vm5585_vm7, %v685_v17, %v692_v18  ;;  %v842_v28 = vsel %vm5601_vm8, %v684_v15, %v841_v58  ;;  %v846_v29 = vsel %vm5518_vm3, %v694_v20, %v845_v4  ;;  %4776 = vmatpush3.bf16.msra.mxu1 %v5249_v50  ;;  %v517_v50 = vsel %vm5528_vm4, 0, %v516_v33 }
  0x29   : > { %843 = vst [vmem:[#allocation2 + $0xc] sm:$0xf] %v842_v28  ;;  %844 = vst [vmem:[#allocation2 + $0x10] sm:$0xf] %v693_v27  ;;  %4793 = vmatprep.subr.bf16.mxu1 %v5611_v13  ;;  %v709_v45 = vor.u32 %v707_v26, %v706_v35  ;;  %v711_v46 = vrot.slane %v706_v35, 4  ;;  %v921_v47 = vpack.c.bf16 %v920_v36, %v919_v32  ;;  %v4537_v57 = vunpack.c.l.bf16 %v4605_v42 }
  0x2a   : > { %847 = vst [vmem:[#allocation2 + $0x14] sm:$0x1] %v846_v29  ;;  %v600_v48 = vadd.f32 %v5545_v22, %v577_v39  ;;  %v849_v52 = vsel %vm5601_vm8, %v701_v43, %v848_v30  ;;  %518 = vst [vmem:[#allocation2 + $0x38] sm:$0x1] %v517_v50  ;;  %v488_v58 = vsel %vm5518_vm3, 0, %v487_v55  ;;  %v937_v61 = vstv %s936_s16 }
  0x2b   : > { %v710_v51 = vsel %vm5585_vm7, %v702_v44, %v709_v45  ;;  %v853_v54 = vsel %vm5518_vm3, %v711_v46, %v852_v31  ;;  %850 = vst [vmem:[#allocation2 + $0x18] sm:$0xf] %v849_v52  ;;  %489 = vst [vmem:[#allocation2 + $0x3c] sm:$0x1] %v488_v58  ;;  %v520_v63 = vsel %vm5528_vm4, 0, %v519_v60  ;;  %v939_v4 = vmul.bf16 %v937_v61, %v921_v47 }
  0x2c   : > { %851 = vst [vmem:[#allocation2 + $0x1c] sm:$0xf] %v710_v51  ;;  %854 = vst [vmem:[#allocation2 + $0x20] sm:$0x1] %v853_v54  ;;  %v616_v56 = vmax.f32 %v600_v48, 0.0  ;;  %v579_v15 = vmul.f32 %v4537_v57, %v5535_v19  ;;  %v5658_v32 = vpack.c.bf16 %v617_v62, %v617_v62  ;;  %v580_v33 = vmul.f32 %v4538_v5, %v5535_v19 }
  0x2d   : > { %521 = vst [vmem:[#allocation2 + $0x44] sm:$0x1] %v520_v63  ;;  %v4291_v11 = vcombine.low %v939_v4, %v939_v4  ;;  %v4292_v14 = vcombine.high %v939_v4, %v939_v4  ;;  %v965_v58 = vld [vmem:[#allocation2] sm:$0xf]  ;;  %v969_v63 = vld [vmem:[#allocation2 + $0x8] sm:$0x1] }
  0x2e   : > { %v5654_v26 = vpack.c.bf16 %v616_v56, %v616_v56  ;;  %v5674_v51 = vadd.f32 %v5545_v22, %v579_v15  ;;  %v5677_v52 = vadd.f32 %v5545_v22, %v580_v33 }
  0x2f   : > { %v946_v24 = vshrl.u32 %v4291_v11, 16  ;;  %v949_v25 = vshll.u32 %v4291_v11, 16  ;;  %v954_v42 = vshrl.u32 %v4292_v14, 16  ;;  %v957_v62 = vshll.u32 %v4292_v14, 16 }
  0x30   : > { %v2202_v0 = vld [vmem:[#allocation2 + $0xc] sm:$0xf]  ;;  %v2203_v1 = vld [vmem:[#allocation2 + $0x10] sm:$0xf] }
  0x31   : > { %v2204_v2 = vld [vmem:[#allocation2 + $0x14] sm:$0x1]  ;;  %v2227_v6 = vshrl.u32 %v2202_v0, 16  ;;  %v2230_v7 = vshll.u32 %v2202_v0, 16  ;;  %v2236_v8 = vshll.u32 %v2203_v1, 16  ;;  %v2240_v9 = vshrl.u32 %v2203_v1, 16 }
  0x32   : > { %v2246_v10 = vshll.u32 %v2204_v2, 16  ;;  %v2205_v29 = vld [vmem:[#allocation2 + $0x18] sm:$0xf]  ;;  %v1050_v47 = vld [vmem:[#allocation2 + $0xc] sm:$0xf]  ;;  %v948_v60 = vrot.slane %v946_v24, 7 }
  0x33   : > { %v2229_v17 = vrot.slane %v2227_v6, 4  ;;  %v2232_v18 = vrot.slane %v2230_v7, 5  ;;  %v2238_v20 = vrot.slane %v2236_v8, 5  ;;  %v2242_v21 = vrot.slane %v2240_v9, 4  ;;  %v5656_v30 = vld [vmem:[#allocation2 + $0x1c] sm:$0xf] }
  0x34   : > { %v2248_v23 = vrot.slane %v2246_v10, 5  ;;  %v2207_v31 = vld [vmem:[#allocation2 + $0x20] sm:$0x1]  ;;  %v2251_v35 = vshrl.u32 %v2205_v29, 16  ;;  %v2254_v36 = vshll.u32 %v2205_v29, 16  ;;  %v2260_v37 = vshll.u32 %v5656_v30, 16 }
  0x35   : > { %v2233_v27 = vor.u32 %v2232_v18, %v2229_v17  ;;  %v2243_v28 = vor.u32 %v2242_v21, %v2238_v20  ;;  %v2264_v38 = vshrl.u32 %v5656_v30, 16  ;;  %v2270_v41 = vshll.u32 %v2207_v31, 16  ;;  %v1051_v50 = vld [vmem:[#allocation2 + $0x10] sm:$0xf]  ;;  %v1081_v4 = vld [vmem:[#allocation2 + $0x14] sm:$0x1] }
  0x36   : > { %v2253_v43 = vrot.slane %v2251_v35, 4  ;;  %v2256_v44 = vrot.slane %v2254_v36, 5  ;;  %v2262_v45 = vrot.slane %v2260_v37, 5  ;;  %v956_v61 = vrot.slane %v954_v42, 7  ;;  %v5680_v7 = vld [vmem:[%s5508_s21 + $0x20] sm:$0xff]   ;;  %v5250_v21 = vld [vmem:[%s6689_s5 + $0x148] sm:$0xff]  }
  0x37   : > { %v2234_v39 = vrot.slane %v2233_v27, 4  ;;  %v2244_v40 = vrot.slane %v2243_v28, 4  ;;  %v2266_v46 = vrot.slane %v2264_v38, 4  ;;  %v2272_v57 = vrot.slane %v2270_v41, 5  ;;  %v5697_v33 = vld [vmem:[#allocation2 + $0x18] sm:$0xf] }
  0x38   : > { %v2257_v55 = vor.u32 %v2256_v44, %v2253_v43  ;;  %v1116_v0 = vshrl.u32 %v1050_v47, 16  ;;  %v1119_v5 = vshll.u32 %v1050_v47, 16  ;;  %v1125_v6 = vshll.u32 %v1051_v50, 16 }
  0x39   : > { %v2239_v48 = vsel %vm5663_vm11, %v2234_v39, %v2238_v20  ;;  %v2249_v49 = vsel %vm5663_vm11, %v2244_v40, %v2248_v23  ;;  %v2267_v56 = vor.u32 %v2266_v46, %v2262_v45  ;;  %v951_v8 = vor.u32 %v949_v25, %v948_v60 }
  0x3a   : > { %v4369_v54 = vcombine.low %v2239_v48, %v2249_v49  ;;  %v2258_v1 = vrot.slane %v2257_v55, 4  ;;  %v952_v9 = vrot.slane %v948_v60, 4  ;;  %v959_v10 = vor.u32 %v957_v62, %v956_v61  ;;  %v855_v49 = vld [vmem:[#allocation2 + $0x24] sm:$0xf] }
  0x3b   : > { %v2268_v2 = vrot.slane %v2267_v56, 4  ;;  %v961_v11 = vrot.slane %v956_v61, 4  ;;  %v1118_v17 = vrot.slane %v1116_v0, 4  ;;  %v1121_v18 = vrot.slane %v1119_v5, 5 }
  0x3c   : > { %4905 = vmatprep.mubr.bf16.mxu0 %v4369_v54  ;;  %v2263_v15 = vsel %vm5663_vm11, %v2258_v1, %v2262_v45  ;;  %v960_v23 = vsel %vm5585_vm7, %v952_v9, %v959_v10  ;;  %v966_v24 = vsel %vm5601_vm8, %v951_v8, %v965_v58  ;;  %v5695_v28 = vrot.slane %v1125_v6, 5  ;;  %v5252_v45 = vld [vmem:[%s6689_s5 + $0x150] sm:$0xff]  }
  0x3d   : > { %v2273_v14 = vsel %vm5663_vm11, %v2268_v2, %v2272_v57  ;;  %v970_v25 = vsel %vm5518_vm3, %v961_v11, %v969_v63  ;;  %967 = vst [vmem:[#allocation2] sm:$0xf] %v966_v24  ;;  %968 = vst [vmem:[#allocation2 + $0x4] sm:$0xf] %v960_v23  ;;  %v1122_v27 = vor.u32 %v1121_v18, %v1118_v17  ;;  %v1129_v29 = vshrl.u32 %v1051_v50, 16 }
  0x3e   : > { %v4370_v20 = vcombine.low %v2263_v15, %v2273_v14  ;;  %971 = vst [vmem:[#allocation2 + $0x8] sm:$0x1] %v970_v25  ;;  %v1135_v31 = vshll.u32 %v1081_v4, 16  ;;  %v713_v35 = vshrl.u32 %v5654_v26, 16  ;;  %v716_v36 = vshll.u32 %v5654_v26, 16 }
  0x3f   : > { %v721_v37 = vshrl.u32 %v5658_v32, 16  ;;  %v4541_v38 = vunpack.c.l.bf16 %v5680_v7  ;;  %v2668_v39 = vrot.slane %v5656_v30, 5  ;;  %v1123_v40 = vrot.slane %v1122_v27, 4  ;;  %v5732_v17 = vld [vmem:[#allocation2 + $0x1c] sm:$0xf] }
  0x40   : > { %4906 = vmatmul.mubr.bf16.vlgmr.msra.gmra.mrb[0].mxu0 %v4370_v20  ;;  %v1131_v41 = vrot.slane %v1129_v29, 4  ;;  %v724_v42 = vshll.u32 %v5658_v32, 16  ;;  %v715_v43 = vrot.slane %v713_v35, 7  ;;  %v618_v26 = vmax.f32 %v5674_v51, 0.0  ;;  %v859_v32 = vld [vmem:[#allocation2 + $0x2c] sm:$0x1] }
  0x41   : > { %4922 = vmatpush3.bf16.msra.mxu0 %v5594_v59  ;;  %v723_v44 = vrot.slane %v721_v37, 7  ;;  %v619_v46 = vmax.f32 %v5677_v52, 0.0  ;;  %v1128_v47 = vsel %vm5663_vm11, %v1123_v40, %v5695_v28  ;;  %v1137_v48 = vrot.slane %v1135_v31, 5  ;;  %v5254_v52 = vld [vmem:[%s6689_s5 + $0x158] sm:$0xff]   ;;  %v862_v31 = vld [vmem:[#allocation2 + $0x30] sm:$0xf] }
  0x42   : > { %4923 = vmatprep.subr.bf16.mxu0 %v5250_v21  ;;  %v1132_v59 = vor.u32 %v1131_v41, %v5695_v28  ;;  %v1140_v50 = vshrl.u32 %v5697_v33, 16  ;;  %v718_v54 = vor.u32 %v716_v36, %v715_v43  ;;  %v719_v55 = vrot.slane %v715_v43, 4 }
  0x43   : > { %v726_v56 = vor.u32 %v724_v42, %v723_v44  ;;  %v728_v57 = vrot.slane %v723_v44, 4  ;;  %v4497_v51 = vpack.c.bf16 %v618_v26, %v618_v26  ;;  %v1143_v61 = vshll.u32 %v5697_v33, 16  ;;  %v5256_v33 = vld [vmem:[%s6689_s5 + $0x160] sm:$0xff]  }
  0x44   : > { %v1133_v58 = vrot.slane %v1132_v59, 4  ;;  %v5719_v60 = vrot.slane %v1140_v50, 4  ;;  %v1048_v62 = vld [vmem:[#allocation2] sm:$0xf]  ;;  %v1049_v63 = vld [vmem:[#allocation2 + $0x4] sm:$0xf]  ;;  %v856_v2 = vsel %vm5601_vm8, %v718_v54, %v855_v49  ;;  %v5728_v5 = vpack.c.bf16 %v619_v46, %v619_v46 }
  0x45   : > { %4924 = vmatpush3.bf16.msra.mxu0 %v5250_v21  ;;  %v1080_v0 = vld [vmem:[#allocation2 + $0x8] sm:$0x1]  ;;  %v727_v1 = vsel %vm5585_vm7, %v719_v55, %v726_v56  ;;  %v860_v4 = vsel %vm5518_vm3, %v728_v57, %v859_v32  ;;  %v1092_v6 = vshrl.u32 %v1048_v62, 16  ;;  %v1095_v8 = vshll.u32 %v1048_v62, 16  ;;  %857 = vst [vmem:[#allocation2 + $0x24] sm:$0xf] %v856_v2 }
  0x46   : > { %4925 = vmatprep.subr.bf16.mxu0 %v5252_v45  ;;  %v1101_v9 = vshll.u32 %v1049_v63, 16  ;;  %v1105_v10 = vshrl.u32 %v1049_v63, 16  ;;  %858 = vst [vmem:[#allocation2 + $0x28] sm:$0xf] %v727_v1  ;;  %861 = vst [vmem:[#allocation2 + $0x2c] sm:$0x1] %v860_v4  ;;  %v1138_v15 = vsel %vm5663_vm11, %v1133_v58, %v1137_v48  ;;  %v4542_v18 = vunpack.c.h.bf16 %v5680_v7 }
  0x47   : > { %v1111_v11 = vshll.u32 %v1080_v0, 16  ;;  %v730_v14 = vshrl.u32 %v4497_v51, 16  ;;  %v1094_v20 = vrot.slane %v1092_v6, 4  ;;  %v1097_v21 = vrot.slane %v1095_v8, 5  ;;  %v866_v54 = vld [vmem:[#allocation2 + $0x38] sm:$0x1] }
  0x48   : > { %v1103_v23 = vrot.slane %v1101_v9, 5  ;;  %v1107_v24 = vrot.slane %v1105_v10, 4  ;;  %v4298_v27 = vcombine.low %v1128_v47, %v1138_v15  ;;  %v733_v29 = vshll.u32 %v4497_v51, 16  ;;  %v1082_v62 = vld [vmem:[#allocation2 + $0x20] sm:$0x1]  ;;  %v5253_v1 = vld [vmem:[%s6689_s5 + $0x8] sm:$0xff]  }
  0x49   : > { %4926 = vmatpush3.bf16.msra.mxu0 %v5252_v45  ;;  %v1113_v25 = vrot.slane %v1111_v11, 5  ;;  %v732_v28 = vrot.slane %v730_v14, 7  ;;  %v1098_v35 = vor.u32 %v1097_v21, %v1094_v20  ;;  %v738_v37 = vshrl.u32 %v5728_v5, 16  ;;  %v5258_v45 = vld [vmem:[%s6689_s5 + $0x168] sm:$0xff]   ;;  %v5260_v9 = vld [vmem:[%s6689_s5 + $0x170] sm:$0xff]  }
  0x4a   : > { %4927 = vmatprep.subr.bf16.mxu0 %v5254_v52  ;;  %v1108_v36 = vor.u32 %v1107_v24, %v1103_v23  ;;  %v741_v40 = vshll.u32 %v5728_v5, 16  ;;  %v1145_v43 = vrot.slane %v1143_v61, 5  ;;  %v1149_v44 = vshll.u32 %v5732_v17, 16 }
  0x4b   : > { %v735_v41 = vor.u32 %v733_v29, %v732_v28  ;;  %v736_v42 = vrot.slane %v732_v28, 4  ;;  %v1099_v26 = vrot.slane %v1098_v35, 4  ;;  %v740_v47 = vrot.slane %v738_v37, 7  ;;  %v5255_v35 = vld [vmem:[%s6689_s5 + $0x10] sm:$0xff]  }
  0x4c   : > { %v1109_v46 = vrot.slane %v1108_v36, 4  ;;  %v1153_v59 = vshrl.u32 %v5732_v17, 16  ;;  %v2208_v48 = vld [vmem:[#allocation2 + $0x24] sm:$0xf]  ;;  %v1146_v55 = vor.u32 %v1145_v43, %v5719_v60  ;;  %v5753_v56 = vmul.f32 %v4541_v38, %v5535_v19 }
  0x4d   : > { %4928 = vmatpush3.bf16.msra.mxu0 %v5254_v52  ;;  %v5745_v49 = vld [vmem:[#allocation2 + $0x28] sm:$0xf]  ;;  %v2210_v32 = vld [vmem:[#allocation2 + $0x2c] sm:$0x1]  ;;  %v863_v50 = vsel %vm5601_vm8, %v735_v41, %v862_v31  ;;  %v5756_v57 = vmul.f32 %v4542_v18, %v5535_v19  ;;  %v1104_v58 = vsel %vm5663_vm11, %v1099_v26, %v1103_v23  ;;  %v2275_v52 = vshrl.u32 %v2208_v48, 16 }
  0x4e   : > { %4929 = vmatprep.subr.bf16.mxu0 %v5256_v33  ;;  %v1114_v51 = vsel %vm5663_vm11, %v1109_v46, %v1113_v25  ;;  %v2278_v61 = vshll.u32 %v2208_v48, 16  ;;  %864 = vst [vmem:[#allocation2 + $0x30] sm:$0xf] %v863_v50  ;;  %v1054_v60 = vld [vmem:[#allocation2 + $0x24] sm:$0xf]  ;;  %v2284_v7 = vshll.u32 %v5745_v49, 16  ;;  %v743_v6 = vor.u32 %v741_v40, %v740_v47 }
  0x4f   : > { %v4297_v63 = vcombine.low %v1104_v58, %v1114_v51  ;;  %v2288_v38 = vshrl.u32 %v5745_v49, 16  ;;  %v2294_v0 = vshll.u32 %v2210_v32, 16  ;;  %v1055_v2 = vld [vmem:[#allocation2 + $0x28] sm:$0xf]  ;;  %v2277_v4 = vrot.slane %v2275_v52, 4  ;;  %v5257_v51 = vld [vmem:[%s6689_s5 + $0x18] sm:$0xff]  }
  0x50   : > { %v2280_v5 = vrot.slane %v2278_v61, 5  ;;  %v745_v8 = vrot.slane %v740_v47, 4  ;;  %v2286_v10 = vrot.slane %v2284_v7, 5  ;;  %v1147_v14 = vrot.slane %v1146_v55, 4  ;;  %v1083_v46 = vld [vmem:[#allocation2 + $0x2c] sm:$0x1] }
  0x51   : > { %4930 = vmatpush3.bf16.msra.mxu0 %v5256_v33  ;;  %4777 = vmatprep.mubr.bf16.mxu1 %v4297_v63  ;;  %v2290_v11 = vrot.slane %v2288_v38, 4  ;;  %v2296_v15 = vrot.slane %v2294_v0, 5  ;;  %v744_v18 = vsel %vm5585_vm7, %v736_v42, %v743_v6  ;;  %v1151_v21 = vrot.slane %v1149_v44, 5  ;;  %v5262_v42 = vld [vmem:[%s6689_s5 + $0x178] sm:$0xff]   ;;  %v490_v63 = vld [vmem:[#allocation2 + $0x48] sm:$0x1] }
  0x52   : > { %4931 = vmatprep.subr.bf16.mxu0 %v5258_v45  ;;  %4778 = vmatmul.mubr.bf16.vlgmr.msra.gmra.mrb[0].mxu1 %v4298_v27  ;;  %v2281_v17 = vor.u32 %v2280_v5, %v2277_v4  ;;  %v867_v20 = vsel %vm5518_vm3, %v745_v8, %v866_v54  ;;  %865 = vst [vmem:[#allocation2 + $0x34] sm:$0xf] %v744_v18  ;;  %v1155_v24 = vrot.slane %v1153_v59, 4  ;;  %v1159_v25 = vshll.u32 %v1082_v62, 16  ;;  %v5803_v5 = vld [vmem:[%s6689_s5 + $0x180] sm:$0xff]  }
  0x53   : > { %v2291_v23 = vor.u32 %v2290_v11, %v2286_v10  ;;  %4794 = vmatpush3.bf16.msra.mxu1 %v5611_v13  ;;  %868 = vst [vmem:[#allocation2 + $0x38] sm:$0x1] %v867_v20  ;;  %v1164_v28 = vshrl.u32 %v1054_v60, 16  ;;  %v1152_v27 = vsel %vm5663_vm11, %v1147_v14, %v1151_v21  ;;  %v1167_v31 = vshll.u32 %v1054_v60, 16  ;;  %v4607_v11 = vld [vmem:[%s5508_s21 + $0x28] sm:$0xff]   ;;  %v5259_v18 = vld [vmem:[%s6689_s5 + $0x20] sm:$0xff]  }
  0x54   : > { %v2282_v29 = vrot.slane %v2281_v17, 4  ;;  %4795 = vmatprep.subr.bf16.mxu1 %v5253_v1  ;;  %v1173_v33 = vshll.u32 %v1055_v2, 16  ;;  %v1156_v13 = vor.u32 %v1155_v24, %v1151_v21  ;;  %v1161_v40 = vrot.slane %v1159_v25, 5 }
  0x55   : > { %4932 = vmatpush3.bf16.msra.mxu0 %v5258_v45  ;;  %v2292_v36 = vrot.slane %v2291_v23, 4  ;;  %v2211_v37 = vld [vmem:[#allocation2 + $0x30] sm:$0xf]  ;;  %v1166_v41 = vrot.slane %v1164_v28, 4  ;;  %v1169_v47 = vrot.slane %v1167_v31, 5  ;;  %v1177_v32 = vshrl.u32 %v1055_v2, 16 }
  0x56   : > { %4933 = vmatprep.subr.bf16.mxu0 %v5260_v9  ;;  %v2287_v43 = vsel %vm5663_vm11, %v2282_v29, %v2286_v10  ;;  %v2299_v44 = vshrl.u32 %v2211_v37, 16  ;;  %v2302_v26 = vshll.u32 %v2211_v37, 16  ;;  %v1157_v59 = vrot.slane %v1156_v13, 4  ;;  %v522_v10 = vld [vmem:[#allocation2 + $0x50] sm:$0x1]  ;;  %v5261_v31 = vld [vmem:[%s6689_s5 + $0x28] sm:$0xff]  }
  0x57   : > { %v2297_v45 = vsel %vm5663_vm11, %v2292_v36, %v2296_v15  ;;  %4796 = vmatpush3.bf16.msra.mxu1 %v5253_v1  ;;  %v1175_v48 = vrot.slane %v1173_v33, 5  ;;  %v1170_v58 = vor.u32 %v1169_v47, %v1166_v41  ;;  %v1179_v61 = vrot.slane %v1177_v32, 4  ;;  %v5811_v17 = vld [vmem:[#allocation2 + $0x30] sm:$0xf] }
  0x58   : > { %v4371_v50 = vcombine.low %v2287_v43, %v2297_v45  ;;  %v2301_v54 = vrot.slane %v2299_v44, 4  ;;  %v2304_v55 = vrot.slane %v2302_v26, 5  ;;  %4797 = vmatprep.subr.bf16.mxu1 %v5255_v35  ;;  %v1162_v52 = vsel %vm5663_vm11, %v1157_v59, %v1161_v40  ;;  %v869_v26 = vld [vmem:[#allocation2 + $0x3c] sm:$0xf] }
  0x59   : > { %4934 = vmatpush3.bf16.msra.mxu0 %v5260_v9  ;;  %v1183_v62 = vshll.u32 %v1083_v46, 16  ;;  %v604_v60 = vadd.f32 %v5545_v22, %v5753_v56  ;;  %v5794_v7 = vld [vmem:[#allocation2 + $0x34] sm:$0xf]  ;;  %v4299_v1 = vcombine.low %v1152_v27, %v1162_v52  ;;  %v1171_v2 = vrot.slane %v1170_v58, 4  ;;  %v5838_v58 = vld [vmem:[%s6687_s3] ss:$0 sm:$0xff] }
  0x5a   : > { %4935 = vmatprep.subr.bf16.mxu0 %v5262_v42  ;;  %4909 = vmatprep.mubr.bf16.mxu0 %v4371_v50  ;;  %v5796_v38 = vld [vmem:[#allocation2 + $0x38] sm:$0x1]  ;;  %v2305_v0 = vor.u32 %v2304_v55, %v2301_v54  ;;  %v605_v4 = vadd.f32 %v5545_v22, %v5756_v57  ;;  %v2308_v56 = vshll.u32 %v5794_v7, 16  ;;  %v2312_v6 = vshrl.u32 %v5794_v7, 16  ;;  %v5828_v43 = vld [vmem:[#allocation2 + $0x34] sm:$0xf] }
  0x5b   : > { %v2318_v8 = vshll.u32 %v5796_v38, 16  ;;  %v1180_v9 = vor.u32 %v1179_v61, %v1175_v48  ;;  %4798 = vmatpush3.bf16.msra.mxu1 %v5255_v35  ;;  %4781 = vmatprep.mubr.bf16.mxu1 %v4299_v1  ;;  %v1176_v22 = vsel %vm5663_vm11, %v1171_v2, %v1175_v48  ;;  %v1185_v57 = vrot.slane %v1183_v62, 5  ;;  %v873_v55 = vld [vmem:[#allocation2 + $0x44] sm:$0x1]  ;;  %v1084_v61 = vld [vmem:[#allocation2 + $0x38] sm:$0x1] }
  0x5c   : > { %v2306_v15 = vrot.slane %v2305_v0, 4  ;;  %v620_v14 = vmax.f32 %v604_v60, 0.0  ;;  %4799 = vmatprep.subr.bf16.mxu1 %v5257_v51  ;;  %v2310_v20 = vrot.slane %v2308_v56, 5  ;;  %v2314_v21 = vrot.slane %v2312_v6, 4  ;;  %v5263_v60 = vld [vmem:[%s6689_s5 + $0x30] sm:$0xff]  }
  0x5d   : > { %v2320_v23 = vrot.slane %v2318_v8, 5  ;;  %v1181_v24 = vrot.slane %v1180_v9, 4  ;;  %4936 = vmatpush3.bf16.msra.mxu0 %v5262_v42  ;;  %v621_v25 = vmax.f32 %v605_v4, 0.0  ;;  %v491_v29 = vsel %vm5518_vm3, 0, %v490_v63  ;;  %v493_v9 = vld [vmem:[#allocation2 + $0x54] sm:$0x1] }
  0x5e   : > { %v4499_v28 = vpack.c.bf16 %v620_v14, %v620_v14  ;;  %v523_v27 = vsel %vm5528_vm4, 0, %v522_v10  ;;  %4953 = vmatprep.subr.bf16.mxu0 %v5803_v5  ;;  %v2311_v33 = vsel %vm5663_vm11, %v2306_v15, %v2310_v20  ;;  %v2315_v35 = vor.u32 %v2314_v21, %v2310_v20  ;;  %492 = vst [vmem:[#allocation2 + $0x48] sm:$0x1] %v491_v29  ;;  %v5265_v14 = vld [vmem:[%s6689_s5 + $0x38] sm:$0xff]  }
  0x5f   : > { %v1186_v36 = vsel %vm5663_vm11, %v1181_v24, %v1185_v57  ;;  %524 = vst [vmem:[#allocation2 + $0x50] sm:$0x1] %v523_v27  ;;  %v4545_v37 = vunpack.c.l.bf16 %v4607_v11  ;;  %4800 = vmatpush3.bf16.msra.mxu1 %v5257_v51  ;;  %v4500_v40 = vpack.c.bf16 %v621_v25, %v621_v25  ;;  %v4546_v46 = vunpack.c.h.bf16 %v4607_v11  ;;  %v525_v57 = vld [vmem:[#allocation2 + $0x5c] sm:$0x1]  ;;  %v496_v24 = vld [vmem:[#allocation2 + $0x60] sm:$0x1] }
  0x60   : > { %v4300_v13 = vcombine.low %v1176_v22, %v1186_v36  ;;  %v747_v41 = vshrl.u32 %v4499_v28, 16  ;;  %v750_v42 = vshll.u32 %v4499_v28, 16  ;;  %4801 = vmatprep.subr.bf16.mxu1 %v5259_v18  ;;  %v2316_v44 = vrot.slane %v2315_v35, 4 }
  0x61   : > { %v583_v47 = vmul.f32 %v4545_v37, %v5535_v19  ;;  %v1188_v45 = vshrl.u32 %v5811_v17, 16  ;;  %v755_v48 = vshrl.u32 %v4500_v40, 16  ;;  %v758_v32 = vshll.u32 %v4500_v40, 16  ;;  %v5844_v19 = vld [vmem:[%s6688_s4] ss:$0 sm:$0xff]  ;;  %v4608_v40 = vld [vmem:[%s5508_s21 + $0x30] sm:$0xff]  }
  0x62   : > { %4782 = vmatmul.mubr.bf16.gmra.mrb[4].mxu1 %v4300_v13  ;;  %v749_v59 = vrot.slane %v747_v41, 7  ;;  %v1191_v50 = vshll.u32 %v5811_v17, 16  ;;  %v2321_v54 = vsel %vm5663_vm11, %v2316_v44, %v2320_v23  ;;  %v584_v51 = vmul.f32 %v5838_v58, %v4546_v46 }
  0x63   : > { %v606_v52 = vadd.f32 %v5844_v19, %v583_v47  ;;  %v1190_v62 = vrot.slane %v1188_v45, 4  ;;  %4802 = vmatpush3.bf16.msra.mxu1 %v5259_v18  ;;  %v4372_v63 = vcombine.low %v2311_v33, %v2321_v54  ;;  %v757_v2 = vrot.slane %v755_v48, 7  ;;  %v528_v33 = vld [vmem:[#allocation2 + $0x68] sm:$0x1] }
  0x64   : > { %v752_v0 = vor.u32 %v750_v42, %v749_v59  ;;  %v753_v1 = vrot.slane %v749_v59, 4  ;;  %4803 = vmatprep.subr.bf16.mxu1 %v5261_v31  ;;  %v607_v4 = vadd.f32 %v5844_v19, %v584_v51  ;;  %v1193_v6 = vrot.slane %v1191_v50, 5 }
  0x65   : > { %v622_v56 = vmax.f32 %v606_v52, 0.0  ;;  %v1197_v8 = vshll.u32 %v5828_v43, 16  ;;  %4910 = vmatmul.mubr.bf16.gmra.mrb[4].mxu0 %v4372_v63  ;;  %v760_v10 = vor.u32 %v758_v32, %v757_v2  ;;  %v762_v11 = vrot.slane %v757_v2, 4  ;;  %v876_v59 = vld [vmem:[#allocation2 + $0x48] sm:$0xf]  ;;  %v5875_v32 = vld [vmem:[%s6689_s5 + $0x80] sm:$0xff]  }
  0x66   : > { %v870_v15 = vsel %vm5601_vm8, %v752_v0, %v869_v26  ;;  %v1201_v22 = vshrl.u32 %v5828_v43, 16  ;;  %v623_v18 = vmax.f32 %v607_v4, 0.0  ;;  %v1194_v21 = vor.u32 %v1193_v6, %v1190_v62  ;;  %v5868_v26 = vld [vmem:[%s5508_s21 + $0x38] sm:$0xff]   ;;  %v880_v0 = vld [vmem:[#allocation2 + $0x50] sm:$0x1]  ;;  %s4490_s21 = sadd.s32 8, %s5465_s10 }
  0x67   : > { %871 = vst [vmem:[#allocation2 + $0x3c] sm:$0xf] %v870_v15  ;;  %v4501_v20 = vpack.c.bf16 %v622_v56, %v622_v56  ;;  %v1199_v23 = vrot.slane %v1197_v8, 5  ;;  %4804 = vmatpush3.bf16.msra.mxu1 %v5261_v31  ;;  %v761_v25 = vsel %vm5585_vm7, %v753_v1, %v760_v10  ;;  %v874_v28 = vsel %vm5518_vm3, %v762_v11, %v873_v55  ;;  %p6032_p11 = scmp.lt.s32.totalorder %s4490_s21, 15 }
  0x68   : > { %v1203_v29 = vrot.slane %v1201_v22, 4  ;;  %v1207_v27 = vshll.u32 %v1084_v61, 16  ;;  %4805 = vmatprep.subr.bf16.mxu1 %v5263_v60  ;;  %872 = vst [vmem:[#allocation2 + $0x40] sm:$0xf] %v761_v25  ;;  %875 = vst [vmem:[#allocation2 + $0x44] sm:$0x1] %v874_v28  ;;  %v4502_v35 = vpack.c.bf16 %v623_v18, %v623_v18  ;;  %v4549_v54 = vunpack.c.l.bf16 %v4608_v40 }
  0x69   : > { %v764_v36 = vshrl.u32 %v4501_v20, 16  ;;  %v767_v37 = vshll.u32 %v4501_v20, 16  ;;  %v1195_v13 = vrot.slane %v1194_v21, 4  ;;  %v494_v42 = vsel %vm5518_vm3, 0, %v493_v9  ;;  %s6722_s21 = smov (!%p6032_p11, %s4490_s21), 15 }
  0x6a   : > { %v1204_v41 = vor.u32 %v1203_v29, %v1199_v23  ;;  %v1209_v31 = vrot.slane %v1207_v27, 5  ;;  %v526_v44 = vsel %vm5528_vm4, 0, %v525_v57  ;;  %v772_v47 = vshrl.u32 %v4502_v35, 16  ;;  %495 = vst [vmem:[#allocation2 + $0x54] sm:$0x1] %v494_v42  ;;  %s6724_s21 = smov (!%p6032_p11, %s6722_s21), 15 }
  0x6b   : > { %v766_v46 = vrot.slane %v764_v36, 7  ;;  %v775_v45 = vshll.u32 %v4502_v35, 16  ;;  %v1200_v48 = vsel %vm5663_vm11, %v1195_v13, %v1199_v23  ;;  %527 = vst [vmem:[#allocation2 + $0x5c] sm:$0x1] %v526_v44  ;;  %4806 = vmatpush3.bf16.msra.mxu1 %v5263_v60  ;;  %v4550_v55 = vunpack.c.h.bf16 %v4608_v40  ;;  %s998_s10 = scalar_select %p462_p12, 1, 0 }
  0x6c   : > { %v1205_v50 = vrot.slane %v1204_v41, 4  ;;  %v497_v51 = vsel %vm5518_vm3, 0, %v496_v24  ;;  %4807 = vmatprep.subr.bf16.mxu1 %v5265_v14  ;;  %v774_v62 = vrot.slane %v772_v47, 7  ;;  %v529_v63 = vsel %vm5528_vm4, 0, %v528_v33  ;;  %s6059_s23 = sshll.u32 %s6724_s21, 1 }
  0x6d   : > { %v769_v52 = vor.u32 %v767_v37, %v766_v46  ;;  %v770_v61 = vrot.slane %v766_v46, 4  ;;  %498 = vst [vmem:[#allocation2 + $0x60] sm:$0x1] %v497_v51  ;;  %v585_v4 = vmul.f32 %v5838_v58, %v4549_v54  ;;  %v586_v56 = vmul.f32 %v5838_v58, %v4550_v55  ;;  %530 = vst [vmem:[#allocation2 + $0x68] sm:$0x1] %v529_v63  ;;  %s6052_s19 = scvt.s32.f32 %s998_s10  ;;  %s442_s16 = sadd.s32 %s6059_s23, %s5484_s20 }
  0x6e   : > { %v2214_v60 = vld [vmem:[#allocation2 + $0x3c] sm:$0xf]  ;;  %v1210_v1 = vsel %vm5663_vm11, %v1205_v50, %v1209_v31  ;;  %v4553_v6 = vunpack.c.l.bf16 %v5868_v26  ;;  %v777_v10 = vor.u32 %v775_v45, %v774_v62  ;;  %v779_v11 = vrot.slane %v774_v62, 4  ;;  %s6089_s20 = sshll.u32 %s442_s16, 2  ;;  %s6606_s10 = scalar_lea.vmem %s6690_s6, %s4247_s12 }
  0x6f   : > { %v5883_v2 = vld [vmem:[#allocation2 + $0x3c] sm:$0xf]  ;;  %v2323_v8 = vshrl.u32 %v2214_v60, 16  ;;  %v2326_v9 = vshll.u32 %v2214_v60, 16  ;;  %4808 = vmatpush3.bf16.msra.mxu1 %v5265_v14  ;;  %v5888_v15 = vld [vmem:[#allocation2 + $0x40] sm:$0xf]  ;;  %v877_v57 = vsel %vm5601_vm8, %v769_v52, %v876_v59  ;;  %v4301_v18 = vcombine.low %v1200_v48, %v1210_v1  ;;  %p1001_p13 = scmp.ne.f32.partialorder %s6052_s19, %s6052_s19  ;;  %s444_s13 = scalar_lea.vmem %s6686_s2, %s6089_s20 }
  0x70   : > { %v5890_v22 = vld [vmem:[#allocation2 + $0x44] sm:$0x1]  ;;  %v608_v20 = vadd.f32 %v5844_v19, %v585_v4  ;;  %v609_v21 = vadd.f32 %v5844_v19, %v586_v56  ;;  %4825 = vmatprep.subr.bf16.mxu1 %v5875_v32  ;;  %v2332_v25 = vshll.u32 %v5888_v15, 16  ;;  %v2336_v14 = vshrl.u32 %v5888_v15, 16  ;;  %878 = vst [vmem:[#allocation2 + $0x48] sm:$0xf] %v877_v57  ;;  %s465_s12 = sadd.s32 %s4269_s8, %s6728_s24 }
  0x71   : > { %v2325_v23 = vrot.slane %v2323_v8, 4  ;;  %v2328_v24 = vrot.slane %v2326_v9, 5  ;;  %v5899_v28 = vld [vmem:[#allocation2 + $0x40] sm:$0xf]  ;;  %v2342_v29 = vshll.u32 %v5890_v22, 16  ;;  %v778_v27 = vsel %vm5585_vm7, %v770_v61, %v777_v10  ;;  %4785 = vmatprep.mubr.bf16.mxu1 %v4301_v18  ;;  %s1002_s9 = sshrl.u32 %s6052_s19, 16 }
  0x72   : > { %v881_v33 = vsel %vm5518_vm3, %v779_v11, %v880_v0  ;;  %v5906_v35 = vld [vmem:[#allocation2 + $0x44] sm:$0x1]  ;;  %v1212_v36 = vshrl.u32 %v5883_v2, 16  ;;  %v2334_v13 = vrot.slane %v2332_v25, 5  ;;  %v2338_v40 = vrot.slane %v2336_v14, 4  ;;  %s1003_s14 = sand.u32 1, %s1002_s9 }
  0x73   : > { %v2329_v37 = vor.u32 %v2328_v24, %v2325_v23  ;;  %879 = vst [vmem:[#allocation2 + $0x4c] sm:$0xf] %v778_v27  ;;  %882 = vst [vmem:[#allocation2 + $0x50] sm:$0x1] %v881_v33  ;;  %v1215_v41 = vshll.u32 %v5883_v2, 16  ;;  %v2344_v31 = vrot.slane %v2342_v29, 5  ;;  %v4554_v56 = vunpack.c.h.bf16 %v5868_v26 }
  0x74   : > { %v1214_v42 = vrot.slane %v1212_v36, 4  ;;  %v1221_v44 = vshll.u32 %v5899_v28, 16  ;;  %v1225_v46 = vshrl.u32 %v5899_v28, 16  ;;  %v2339_v45 = vor.u32 %v2338_v40, %v2334_v13  ;;  %s1004_s22 = sadd.s32 32767, %s1003_s14  ;;  %s4270_s9 = sshll.u32 %s465_s12, 1 }
  0x75   : > { %v2330_v47 = vrot.slane %v2329_v37, 4  ;;  %v1217_v59 = vrot.slane %v1215_v41, 5  ;;  %v1231_v48 = vshll.u32 %v5906_v35, 16  ;;  %v624_v55 = vmax.f32 %v608_v20, 0.0  ;;  %s6079_s15 = sadd.s32 %s1004_s22, %s6052_s19 }
  0x76   : > { %v1223_v50 = vrot.slane %v1221_v44, 5  ;;  %v1227_v54 = vrot.slane %v1225_v46, 4  ;;  %v625_v51 = vmax.f32 %v609_v21, 0.0  ;;  %v2340_v61 = vrot.slane %v2339_v45, 4  ;;  %s1006_s23 = sand.u32 4294901760, %s6079_s15 }
  0x77   : > { %v2335_v52 = vsel %vm5663_vm11, %v2330_v47, %v2334_v13  ;;  %v1218_v62 = vor.u32 %v1217_v59, %v1214_v42  ;;  %v1233_v63 = vrot.slane %v1231_v48, 5  ;;  %v2217_v60 = vld [vmem:[#allocation2 + $0x48] sm:$0xf]  ;;  %v4503_v1 = vpack.c.bf16 %v624_v55, %v624_v55  ;;  %v883_v42 = vld [vmem:[#allocation2 + $0x54] sm:$0xf]  ;;  %s6726_s23 = smov (%p1001_p13, %s1006_s23), 2143289344 }
  0x78   : > { %v1228_v0 = vor.u32 %v1227_v54, %v1223_v50  ;;  %v4504_v4 = vpack.c.bf16 %v625_v51, %v625_v51  ;;  %v2345_v8 = vsel %vm5663_vm11, %v2340_v61, %v2344_v31  ;;  %v2347_v9 = vshrl.u32 %v2217_v60, 16  ;;  %v5930_v13 = vld [vmem:[#allocation2 + $0x48] sm:$0xf]  ;;  %s1009_s17 = sshrl.u32 %s6726_s23, 16 }
  0x79   : > { %v2350_v10 = vshll.u32 %v2217_v60, 16  ;;  %v1219_v11 = vrot.slane %v1218_v62, 4  ;;  %v4373_v57 = vcombine.low %v2335_v52, %v2345_v8  ;;  %v781_v23 = vshrl.u32 %v4503_v1, 16  ;;  %s1010_s14 = sshll.u32 %s1009_s17, 16 }
  0x7a   : > { %v5918_v18 = vld [vmem:[#allocation2 + $0x4c] sm:$0xf]  ;;  %v5920_v20 = vld [vmem:[#allocation2 + $0x50] sm:$0x1]  ;;  %v1229_v21 = vrot.slane %v1228_v0, 4  ;;  %v587_v24 = vmul.f32 %v5838_v58, %v4553_v6  ;;  %v2349_v25 = vrot.slane %v2347_v9, 4  ;;  %v588_v55 = vmul.f32 %v5838_v58, %v4554_v56  ;;  %s6221_s20 = sor.u32 %s1010_s14, %s1009_s17  ;;  %s6655_s14 = scalar_lea.vmem %s6691_s7, %s4270_s9 }
  0x7b   : > { %v2352_v14 = vrot.slane %v2350_v10, 5  ;;  %v2356_v29 = vshll.u32 %v5918_v18, 16  ;;  %v2360_v26 = vshrl.u32 %v5918_v18, 16  ;;  %4913 = vmatprep.mubr.bf16.mxu0 %v4373_v57  ;;  %v2366_v27 = vshll.u32 %v5920_v20, 16  ;;  %v5934_v62 = vld [vmem:[#allocation2 + $0x4c] sm:$0xf] }
  0x7c   : > { %v1224_v33 = vsel %vm5663_vm11, %v1219_v11, %v1223_v50  ;;  %v1234_v36 = vsel %vm5663_vm11, %v1229_v21, %v1233_v63  ;;  %v783_v37 = vrot.slane %v781_v23, 7  ;;  %v784_v46 = vshll.u32 %v4503_v1, 16  ;;  %v887_v50 = vld [vmem:[#allocation2 + $0x5c] sm:$0x1]  ;;  %v5940_v8 = vld [vmem:[#allocation2 + $0x50] sm:$0x1] }
  0x7d   : > { %v2353_v40 = vor.u32 %v2352_v14, %v2349_v25  ;;  %v2358_v6 = vrot.slane %v2356_v29, 5  ;;  %v2362_v41 = vrot.slane %v2360_v26, 4  ;;  %v4302_v31 = vcombine.low %v1224_v33, %v1234_v36 }
  0x7e   : > { %v2368_v44 = vrot.slane %v2366_v27, 5  ;;  %v787_v47 = vrot.slane %v783_v37, 4  ;;  %v789_v45 = vshrl.u32 %v4504_v4, 16  ;;  %v792_v54 = vshll.u32 %v4504_v4, 16 }
  0x7f   : > { %v2354_v59 = vrot.slane %v2353_v40, 4  ;;  %v2363_v48 = vor.u32 %v2362_v41, %v2358_v6  ;;  %4786 = vmatmul.mubr.bf16.gmra.mrb[8].mxu1 %v4302_v31  ;;  %v786_v51 = vor.u32 %v784_v46, %v783_v37  ;;  %v610_v61 = vadd.f32 %v5844_v19, %v587_v24 }
  0x80   : > { %v791_v52 = vrot.slane %v789_v45, 7  ;;  %v1236_v63 = vshrl.u32 %v5930_v13, 16  ;;  %v611_v1 = vadd.f32 %v5844_v19, %v588_v55  ;;  %v1239_v4 = vshll.u32 %v5930_v13, 16 }
  0x81   : > { %v2359_v60 = vsel %vm5663_vm11, %v2354_v59, %v2358_v6  ;;  %v2364_v0 = vrot.slane %v2363_v48, 4  ;;  %v884_v56 = vsel %vm5601_vm8, %v786_v51, %v883_v42  ;;  %v626_v10 = vmax.f32 %v610_v61, 0.0  ;;  %v5954_v6 = vld [vmem:[#allocation2 + $0x18] sm:$0xe] }
  0x82   : > { %v794_v9 = vor.u32 %v792_v54, %v791_v52  ;;  %v796_v58 = vrot.slane %v791_v52, 4  ;;  %885 = vst [vmem:[#allocation2 + $0x54] sm:$0xf] %v884_v56  ;;  %v627_v57 = vmax.f32 %v611_v1, 0.0  ;;  %v1238_v21 = vrot.slane %v1236_v63, 4 }
  0x83   : > { %v2369_v11 = vsel %vm5663_vm11, %v2364_v0, %v2368_v44  ;;  %v1241_v23 = vrot.slane %v1239_v4, 5  ;;  %v4505_v14 = vpack.c.bf16 %v626_v10, %v626_v10  ;;  %v1245_v27 = vshll.u32 %v5934_v62, 16  ;;  %v890_v44 = vld [vmem:[#allocation2 + $0x60] sm:$0xf]  ;;  %v894_v56 = vld [vmem:[#allocation2 + $0x68] sm:$0x1] }
  0x84   : > { %v4374_v24 = vcombine.low %v2359_v60, %v2369_v11  ;;  %v795_v19 = vsel %vm5585_vm7, %v787_v47, %v794_v9  ;;  %v888_v25 = vsel %vm5518_vm3, %v796_v58, %v887_v50  ;;  %v4506_v29 = vpack.c.bf16 %v627_v57, %v627_v57  ;;  %v5960_v47 = vld [vmem:[#allocation2 + $0x20] sm:$0x1] }
  0x85   : > { %886 = vst [vmem:[#allocation2 + $0x58] sm:$0xf] %v795_v19  ;;  %889 = vst [vmem:[#allocation2 + $0x5c] sm:$0x1] %v888_v25  ;;  %v1242_v26 = vor.u32 %v1241_v23, %v1238_v21  ;;  %v1249_v33 = vshrl.u32 %v5934_v62, 16  ;;  %v798_v36 = vshrl.u32 %v4505_v14, 16 }
  0x86   : > { %4914 = vmatmul.mubr.bf16.gmra.mrb[8].mxu0 %v4374_v24  ;;  %v801_v37 = vshll.u32 %v4505_v14, 16  ;;  %v1255_v40 = vshll.u32 %v5940_v8, 16  ;;  %v5958_v41 = vrot.slane %v2668_v39, 4  ;;  %v806_v31 = vshrl.u32 %v4506_v29, 16 }
  0x87   : > { %v809_v42 = vshll.u32 %v4506_v29, 16  ;;  %v1247_v46 = vrot.slane %v1245_v27, 5  ;;  %v2671_v45 = vrot.slane %v5960_v47, 5  ;;  %v800_v59 = vrot.slane %v798_v36, 7 }
  0x88   : > { %v1243_v48 = vrot.slane %v1242_v26, 4  ;;  %v1251_v54 = vrot.slane %v1249_v33, 4  ;;  %v808_v50 = vrot.slane %v806_v31, 7  ;;  %v1257_v55 = vrot.slane %v1255_v40, 5 }
  0x89   : > { %v2220_v51 = vld [vmem:[#allocation2 + $0x54] sm:$0xf]  ;;  %v803_v52 = vor.u32 %v801_v37, %v800_v59  ;;  %v804_v61 = vrot.slane %v800_v59, 4  ;;  %v4386_v0 = vrot.slane %v5954_v6, 9 }
  0x8a   : > { %v1252_v63 = vor.u32 %v1251_v54, %v1247_v46  ;;  %v5963_v60 = vld [vmem:[#allocation2 + $0x54] sm:$0xf]  ;;  %v2371_v1 = vshrl.u32 %v2220_v51, 16  ;;  %v2374_v4 = vshll.u32 %v2220_v51, 16  ;;  %v811_v9 = vor.u32 %v809_v42, %v808_v50 }
  0x8b   : > { %v813_v58 = vrot.slane %v808_v50, 4  ;;  %v891_v57 = vsel %vm5601_vm8, %v803_v52, %v890_v44  ;;  %v1248_v21 = vsel %vm5663_vm11, %v1243_v48, %v1247_v46  ;;  %v1260_v24 = vshrl.u32 %v5963_v60, 16  ;;  %v2627_v46 = vld [vmem:[#allocation2 + $0xc] sm:$0xe] }
  0x8c   : > { %v5966_v10 = vld [vmem:[#allocation2 + $0x58] sm:$0xf]  ;;  %v5968_v11 = vld [vmem:[#allocation2 + $0x5c] sm:$0x1]  ;;  %v1253_v23 = vrot.slane %v1252_v63, 4  ;;  %v2373_v19 = vrot.slane %v2371_v1, 4  ;;  %v812_v33 = vsel %vm5585_vm7, %v804_v61, %v811_v9 }
  0x8d   : > { %v2376_v25 = vrot.slane %v2374_v4, 5  ;;  %v2380_v14 = vshll.u32 %v5966_v10, 16  ;;  %v2384_v29 = vshrl.u32 %v5966_v10, 16  ;;  %892 = vst [vmem:[#allocation2 + $0x60] sm:$0xf] %v891_v57  ;;  %v2390_v27 = vshll.u32 %v5968_v11, 16 }
  0x8e   : > { %v5977_v26 = vld [vmem:[#allocation2 + $0x58] sm:$0xf]  ;;  %v895_v36 = vsel %vm5518_vm3, %v813_v58, %v894_v56  ;;  %v1258_v37 = vsel %vm5663_vm11, %v1253_v23, %v1257_v55  ;;  %v5986_v40 = vld [vmem:[#allocation2 + $0x5c] sm:$0x1]  ;;  %893 = vst [vmem:[#allocation2 + $0x64] sm:$0xf] %v812_v33  ;;  %v6011_v33 = vsel %vm5992_vm14, %v5958_v41, %v2671_v45 }
  0x8f   : > { %v2377_v6 = vor.u32 %v2376_v25, %v2373_v19  ;;  %v2382_v31 = vrot.slane %v2380_v14, 5  ;;  %v2386_v42 = vrot.slane %v2384_v29, 4  ;;  %896 = vst [vmem:[#allocation2 + $0x68] sm:$0x1] %v895_v36  ;;  %v4303_v44 = vcombine.low %v1248_v21, %v1258_v37  ;;  %v5332_v55 = vld [vmem:[#allocation2 + $0x10] sm:$0xf] }
  0x90   : > { %v1262_v59 = vrot.slane %v1260_v24, 4  ;;  %v1263_v48 = vshll.u32 %v5963_v60, 16  ;;  %v1269_v54 = vshll.u32 %v5977_v26, 16  ;;  %v2661_v51 = vrot.slane %v5332_v55, 5  ;;  %v5333_v4 = vld [vmem:[#allocation2 + $0x14] sm:$0x1] }
  0x91   : > { %v2378_v52 = vrot.slane %v2377_v6, 4  ;;  %v2387_v61 = vor.u32 %v2386_v42, %v2382_v31  ;;  %v2392_v63 = vrot.slane %v2390_v27, 5  ;;  %4789 = vmatprep.mubr.bf16.mxu1 %v4303_v44  ;;  %v1273_v1 = vshrl.u32 %v5977_v26, 16 }
  0x92   : > { %v2664_v9 = vrot.slane %v5333_v4, 5  ;;  %v1265_v58 = vrot.slane %v1263_v48, 5  ;;  %v1271_v56 = vrot.slane %v1269_v54, 5  ;;  %v1279_v57 = vshll.u32 %v5986_v40, 16  ;;  %v5334_v4 = vld [vmem:[#allocation2] sm:$0xf] }
  0x93   : > { %v2383_v21 = vsel %vm5663_vm11, %v2378_v52, %v2382_v31  ;;  %v2388_v23 = vrot.slane %v2387_v61, 4  ;;  %v1275_v24 = vrot.slane %v1273_v1, 4  ;;  %v6004_v19 = vsel %vm5992_vm14, %v4386_v0, %v2668_v39 }
  0x94   : > { %v2223_v25 = vld [vmem:[#allocation2 + $0x60] sm:$0xf]  ;;  %v1266_v14 = vor.u32 %v1265_v58, %v1262_v59  ;;  %v4385_v29 = vrot.slane %v2627_v46, 9  ;;  %v2663_v27 = vrot.slane %v2661_v51, 4  ;;  %v1281_v44 = vrot.slane %v1279_v57, 5 }
  0x95   : > { %v2393_v36 = vsel %vm5663_vm11, %v2388_v23, %v2392_v63  ;;  %v2395_v37 = vshrl.u32 %v2223_v25, 16  ;;  %v2398_v30 = vshll.u32 %v2223_v25, 16  ;;  %v1276_v6 = vor.u32 %v1275_v24, %v1271_v56  ;;  %v6015_v39 = vld [vmem:[#allocation2 + $0x64] sm:$0xf] }
  0x96   : > { %v4375_v31 = vcombine.low %v2383_v21, %v2393_v36  ;;  %v6017_v0 = vld [vmem:[#allocation2 + $0x68] sm:$0x1]  ;;  %v1267_v42 = vrot.slane %v1266_v14, 4  ;;  %v4394_v47 = vcombine.low %v6004_v19, %v6011_v33  ;;  %v2404_v45 = vshll.u32 %v6015_v39, 16  ;;  %v6029_v58 = vld [vmem:[#allocation2 + $0x4] sm:$0xf] }
  0x97   : > { %v2397_v46 = vrot.slane %v2395_v37, 4  ;;  %v2400_v41 = vrot.slane %v2398_v30, 5  ;;  %v2408_v59 = vshrl.u32 %v6015_v39, 16  ;;  %v2414_v48 = vshll.u32 %v6017_v0, 16  ;;  %v2629_v36 = vld [vmem:[#allocation2 + $0x24] sm:$0xe] }
  0x98   : > { %4917 = vmatprep.mubr.bf16.mxu0 %v4375_v31  ;;  %v1272_v54 = vsel %vm5663_vm11, %v1267_v42, %v1271_v56  ;;  %v1277_v55 = vrot.slane %v1276_v6, 4  ;;  %v2406_v61 = vrot.slane %v2404_v45, 5  ;;  %v4313_v57 = vcombine.low %v5334_v4, %v6029_v58  ;;  %v2630_v31 = vld [vmem:[#allocation2 + $0x30] sm:$0xe]  ;;  %v5336_v42 = vld [vmem:[#allocation2 + $0x2c] sm:$0x1] }
  0x99   : > { %v2401_v52 = vor.u32 %v2400_v41, %v2397_v46  ;;  %v2410_v63 = vrot.slane %v2408_v59, 4  ;;  %v2416_v23 = vrot.slane %v2414_v48, 5  ;;  %v2662_v25 = vsel %vm5992_vm14, %v4385_v29, %v2661_v51  ;;  %v5337_v41 = vld [vmem:[#allocation2 + $0xc] sm:$0xf]  ;;  %v6055_v45 = vld [vmem:[#allocation2 + $0x10] sm:$0xf] }
  0x9a   : > { %v1282_v1 = vsel %vm5663_vm11, %v1277_v55, %v1281_v44  ;;  %v2665_v14 = vsel %vm5992_vm14, %v2663_v27, %v2664_v9  ;;  %v2675_v37 = vrot.slane %v5745_v49, 5  ;;  %v4387_v29 = vrot.slane %v2629_v36, 9  ;;  %v2631_v48 = vld [vmem:[#allocation2 + $0x3c] sm:$0xe]  ;;  %v5339_v55 = vld [vmem:[#allocation2 + $0x18] sm:$0xf] }
  0x9b   : > { %v2402_v56 = vrot.slane %v2401_v52, 4  ;;  %v2411_v21 = vor.u32 %v2410_v63, %v2406_v61  ;;  %v4304_v24 = vcombine.low %v1272_v54, %v1282_v1  ;;  %v4393_v9 = vcombine.low %v2662_v25, %v2665_v14  ;;  %v6061_v52 = vld [vmem:[#allocation2 + $0x1c] sm:$0xf]  ;;  %v2632_v63 = vld [vmem:[#allocation2 + $0x48] sm:$0xe] }
  0x9c   : > { %v2677_v27 = vrot.slane %v2675_v37, 4  ;;  %v2678_v44 = vrot.slane %v5336_v42, 5  ;;  %v2682_v46 = vrot.slane %v5794_v7, 5  ;;  %v4314_v59 = vcombine.low %v5337_v41, %v6055_v45  ;;  %v5271_v4 = vld [vmem:[%s6689_s5 + $0x88] sm:$0xff]   ;;  %v2633_v14 = vld [vmem:[#allocation2 + $0x54] sm:$0xe] }
  0x9d   : > { %v2407_v30 = vsel %vm5663_vm11, %v2402_v56, %v2406_v61  ;;  %v2412_v6 = vrot.slane %v2411_v21, 4  ;;  %4790 = vmatmul.mubr.bf16.gmra.mrb[12].mxu1 %v4304_v24  ;;  %v2689_v54 = vrot.slane %v5888_v15, 5  ;;  %v4315_v61 = vcombine.low %v5339_v55, %v6061_v52  ;;  %v5275_v42 = vld [vmem:[%s6689_s5 + $0x90] sm:$0xff]   ;;  %v1674_v55 = vld [vmem:[#allocation2 + $0x3c] sm:$0xe] }
  0x9e   : > { %4809 = vmatprep.mubr.bf16.mxu1 %v4313_v57  ;;  %v2696_v7 = vrot.slane %v5918_v18, 5  ;;  %v2676_v1 = vsel %vm5992_vm14, %v4387_v29, %v2675_v37  ;;  %v4388_v15 = vrot.slane %v2630_v31, 9  ;;  %v2679_v57 = vsel %vm5992_vm14, %v2677_v27, %v2678_v44  ;;  %v6086_v31 = vld [vmem:[#allocation2 + $0x14] sm:$0x1]  ;;  %v5343_v29 = vld [vmem:[#allocation2 + $0x24] sm:$0xf] }
  0x9f   : > { %v2417_v51 = vsel %vm5663_vm11, %v2412_v6, %v2416_v23  ;;  %v2684_v56 = vrot.slane %v2682_v46, 4  ;;  %v2685_v21 = vrot.slane %v5796_v38, 5  ;;  %v4389_v23 = vrot.slane %v2631_v48, 9  ;;  %v5277_v19 = vld [vmem:[%s6689_s5 + $0x98] sm:$0xff]  }
  0xa0   : > { %v4376_v49 = vcombine.low %v2407_v30, %v2417_v51  ;;  %v2691_v18 = vrot.slane %v2689_v54, 4  ;;  %v2692_v24 = vrot.slane %v5890_v22, 5  ;;  %v4390_v25 = vrot.slane %v2632_v63, 9  ;;  %v6083_v30 = vld [vmem:[#allocation2 + $0x8] sm:$0x1] }
  0xa1   : > { %v2703_v36 = vrot.slane %v5966_v10, 5  ;;  %v2698_v37 = vrot.slane %v2696_v7, 4  ;;  %v2699_v38 = vrot.slane %v5920_v20, 5  ;;  %v1701_v6 = vrot.slane %v6083_v30, 5  ;;  %v2634_v10 = vld [vmem:[#allocation2 + $0x60] sm:$0xe] }
  0xa2   : > { %4918 = vmatmul.mubr.bf16.gmra.mrb[12].mxu0 %v4376_v49  ;;  %v1708_v22 = vrot.slane %v6086_v31, 5  ;;  %v4395_v51 = vcombine.low %v2676_v1, %v2679_v57  ;;  %v6098_v20 = vsel %vm5992_vm14, %v4388_v15, %v2682_v46  ;;  %v6104_v49 = vld [vmem:[#allocation2 + $0x28] sm:$0xf]  ;;  %v6112_v44 = vsel %vm5992_vm14, %v4389_v23, %v2689_v54  ;;  %v1669_v1 = vld [vmem:[#allocation2] sm:$0xe] }
  0xa3   : > { %4937 = vmatprep.mubr.bf16.mxu0 %v4393_v9  ;;  %v6102_v9 = vsel %vm5992_vm14, %v2684_v56, %v2685_v21  ;;  %v4316_v27 = vcombine.low %v5343_v29, %v6104_v49  ;;  %v6117_v46 = vsel %vm5992_vm14, %v4390_v25, %v2696_v7  ;;  %v4391_v41 = vrot.slane %v2633_v14, 9  ;;  %v4560_v56 = vld [vmem:[%s444_s13] sm:$0xff]  }
  0xa4   : > { %v2706_v48 = vrot.slane %v5968_v11, 5  ;;  %v2693_v54 = vsel %vm5992_vm14, %v2691_v18, %v2692_v24  ;;  %v4317_v63 = vcombine.low %v5811_v17, %v5828_v43  ;;  %v4392_v7 = vrot.slane %v2634_v10, 9  ;;  %v499_v11 = vld [vmem:[#allocation2 + $0x6c] sm:$0x1]  ;;  %v5270_v17 = vld [vmem:[%s6689_s5 + $0x190] sm:$0xff]   ;;  %v5293_v31 = vld [vmem:[%s6689_s5 + $0xc0] sm:$0xff]  }
  0xa5   : > { %4810 = vmatmul.mubr.bf16.vlgmr.msra.gmra.mrb[0].mxu1 %v4314_v59  ;;  %v2705_v59 = vrot.slane %v2703_v36, 4  ;;  %v4396_v43 = vcombine.low %v6098_v20, %v6102_v9  ;;  %v2710_v33 = vrot.slane %v6015_v39, 5  ;;  %v2713_v21 = vrot.slane %v6017_v0, 5  ;;  %v1675_v24 = vld [vmem:[#allocation2 + $0x48] sm:$0xe] }
  0xa6   : > { %4826 = vmatpush3.bf16.msra.mxu1 %v5875_v32  ;;  %4813 = vmatprep.mubr.bf16.mxu1 %v4315_v61  ;;  %v5266_v32 = vld [vmem:[%s6689_s5 + $0x188] sm:$0xff]   ;;  %v6127_v61 = vsel %vm5992_vm14, %v2698_v37, %v2699_v38  ;;  %v1698_v23 = vrot.slane %v6029_v58, 5  ;;  %v4334_v18 = vrot.slane %v1674_v55, 9  ;;  %v4329_v25 = vrot.slane %v1669_v1, 9  ;;  %v5272_v38 = vld [vmem:[%s6689_s5 + $0x198] sm:$0xff]   ;;  %v5281_v58 = vld [vmem:[%s6689_s5 + $0xa0] sm:$0xff]  }
  0xa7   : > { %4827 = vmatprep.subr.bf16.mxu1 %v5271_v4  ;;  %v4398_v15 = vcombine.low %v6117_v46, %v6127_v61  ;;  %v6161_v57 = vsel %vm5992_vm14, %v2705_v59, %v2706_v48  ;;  %v6168_v39 = vsel %vm5992_vm14, %v4392_v7, %v2710_v33  ;;  %v1733_v14 = vrot.slane %v5899_v28, 5  ;;  %v1676_v59 = vld [vmem:[#allocation2 + $0x54] sm:$0xe]  ;;  %v5283_v48 = vld [vmem:[%s6689_s5 + $0xa8] sm:$0xff]   ;;  %v5276_v1 = vld [vmem:[%s6689_s5 + $0x1a0] sm:$0xff]  }
  0xa8   : > { %v500_v37 = vsel %vm5518_vm3, 0, %v499_v11  ;;  %v4561_v10 = vunpack.c.l.bf16 %v4560_v56  ;;  %v4562_v29 = vunpack.c.h.bf16 %v4560_v56  ;;  %v6203_v55 = vsel %vm5992_vm14, %v4329_v25, %v1698_v23  ;;  %v5282_v61 = vld [vmem:[%s6689_s5 + $0x1b0] sm:$0xff]  }
  0xa9   : > { %501 = vst [vmem:[#allocation2 + $0x6c] sm:$0x1] %v500_v37  ;;  %v6190_v20 = vsel %vm5992_vm14, %v4334_v18, %v1733_v14  ;;  %v1735_v9 = vrot.slane %v1733_v14, 4  ;;  %v1750_v56 = vrot.slane %v5986_v40, 5  ;;  %v5287_v37 = vld [vmem:[%s6689_s5 + $0xb0] sm:$0xff]  }
  0xaa   : > { %4938 = vmatmul.mubr.bf16.vlgmr.msra.gmra.mrb[0].mxu0 %v4394_v47  ;;  %4828 = vmatpush3.bf16.msra.mxu1 %v5271_v4  ;;  %v4397_v47 = vcombine.low %v6112_v44, %v2693_v54  ;;  %v6157_v4 = vsel %vm5992_vm14, %v4391_v41, %v2703_v36  ;;  %v1736_v36 = vrot.slane %v5906_v35, 5  ;;  %v4319_v35 = vcombine.low %v5930_v13, %v5934_v62  ;;  %v1670_v54 = vld [vmem:[#allocation2 + $0xc] sm:$0xe] }
  0xab   : > { %4954 = vmatpush3.bf16.msra.mxu0 %v5803_v5  ;;  %4941 = vmatprep.mubr.bf16.mxu0 %v4395_v51  ;;  %v4318_v5 = vcombine.low %v5883_v2, %v5899_v28  ;;  %v4293_v2 = vld [vmem:[%s6687_s3] ss:$0 sm:$0xff]  ;;  %v4399_v51 = vcombine.low %v6157_v4, %v6161_v57  ;;  %v2712_v28 = vrot.slane %v2710_v33, 4  ;;  %v4335_v13 = vrot.slane %v1675_v24, 9 }
  0xac   : > { %4955 = vmatprep.subr.bf16.mxu0 %v5266_v32  ;;  %4829 = vmatprep.subr.bf16.mxu1 %v5275_v42  ;;  %v983_v44 = vmul.f32 %v4561_v10, %v4293_v2  ;;  %v1740_v41 = vrot.slane %v5934_v62, 5  ;;  %v984_v7 = vmul.f32 %v4562_v29, %v4293_v2  ;;  %v1743_v62 = vrot.slane %v5940_v8, 5 }
  0xad   : > { %4814 = vmatmul.mubr.bf16.gmra.mrb[4].mxu1 %v4316_v27  ;;  %v4294_v27 = vld [vmem:[%s6688_s4] ss:$0 sm:$0xff]  ;;  %v4336_v8 = vrot.slane %v1676_v59, 9  ;;  %v2714_v14 = vsel %vm5992_vm14, %v2712_v28, %v2713_v21  ;;  %v1673_v59 = vld [vmem:[#allocation2 + $0x30] sm:$0xe] }
  0xae   : > { %4830 = vmatpush3.bf16.msra.mxu1 %v5275_v42  ;;  %4817 = vmatprep.mubr.bf16.mxu1 %v4317_v63  ;;  %v1700_v42 = vrot.slane %v1698_v23, 4  ;;  %v6207_v63 = vsel %vm5992_vm14, %v1735_v9, %v1736_v36  ;;  %v993_v33 = vadd.f32 %v4294_v27, %v984_v7  ;;  %v1671_v23 = vld [vmem:[#allocation2 + $0x18] sm:$0xe]  ;;  %v4320_v36 = vcombine.low %v5963_v60, %v5977_v26  ;;  %v5345_v21 = vld [vmem:[#allocation2 + $0x20] sm:$0x1] }
  0xaf   : > { %4956 = vmatpush3.bf16.msra.mxu0 %v5266_v32  ;;  %4831 = vmatprep.subr.bf16.mxu1 %v5277_v19  ;;  %v1705_v32 = vrot.slane %v6055_v45, 5  ;;  %v4342_v11 = vcombine.low %v6190_v20, %v6207_v63  ;;  %v4331_v10 = vrot.slane %v1671_v23, 9  ;;  %v1715_v28 = vrot.slane %v5345_v21, 5  ;;  %v5348_v23 = vld [vmem:[#allocation2 + $0x38] sm:$0x1]  ;;  %v5294_v21 = vld [vmem:[#allocation2 + $0x30] sm:$0xff]  }
  0xb0   : > { %4957 = vmatprep.subr.bf16.mxu0 %v5270_v17  ;;  %v1702_v2 = vsel %vm5992_vm14, %v1700_v42, %v1701_v6  ;;  %v995_v25 = vmax.f32 %v993_v33, 0.0  ;;  %v5288_v42 = vld [vmem:[#allocation2 + $0x18] sm:$0xff]   ;;  %v5304_v63 = vld [vmem:[%s6689_s5 + $0x1e8] sm:$0xff]  }
  0xb1   : > { %v4337_v60 = vcombine.low %v6203_v55, %v1702_v2  ;;  %v4333_v2 = vrot.slane %v1673_v59, 9 }
  0xb2   : > { %4942 = vmatmul.mubr.bf16.gmra.mrb[4].mxu0 %v4396_v43  ;;  %4832 = vmatpush3.bf16.msra.mxu1 %v5277_v19  ;;  %v992_v19 = vadd.f32 %v4294_v27, %v983_v44  ;;  %v1742_v43 = vrot.slane %v1740_v41, 4  ;;  %v5291_v27 = vld [vmem:[%s6689_s5 + $0xb8] sm:$0xff]  }
  0xb3   : > { %4958 = vmatpush3.bf16.msra.mxu0 %v5270_v17  ;;  %4945 = vmatprep.mubr.bf16.mxu0 %v4397_v47  ;;  %v6217_v17 = vsel %vm5992_vm14, %v4335_v13, %v1740_v41  ;;  %v1747_v47 = vrot.slane %v5977_v26, 5  ;;  %v5284_v41 = vld [vmem:[%s6689_s5 + $0x1b8] sm:$0xff]  }
  0xb4   : > { %4959 = vmatprep.subr.bf16.mxu0 %v5272_v38  ;;  %4833 = vmatprep.subr.bf16.mxu1 %v5281_v58  ;;  %v994_v18 = vmax.f32 %v992_v19, 0.0  ;;  %v6232_v24 = vsel %vm5992_vm14, %v1742_v43, %v1743_v62  ;;  %v5347_v43 = vld [vmem:[#allocation2 + $0x2c] sm:$0x1] }
  0xb5   : > { %4818 = vmatmul.mubr.bf16.gmra.mrb[8].mxu1 %v4318_v5  ;;  %v1712_v5 = vrot.slane %v6061_v52, 5  ;;  %v4343_v40 = vcombine.low %v6217_v17, %v6232_v24  ;;  %v6238_v30 = vsel %vm5992_vm14, %v4336_v8, %v1747_v47  ;;  %v1749_v6 = vrot.slane %v1747_v47, 4  ;;  %v5278_v52 = vld [vmem:[%s6689_s5 + $0x1a8] sm:$0xff]   ;;  %v5311_v17 = vld [vmem:[%s6689_s5 + $0xf0] sm:$0xff]  }
  0xb6   : > { %4834 = vmatpush3.bf16.msra.mxu1 %v5281_v58  ;;  %4821 = vmatprep.mubr.bf16.mxu1 %v4319_v35  ;;  %v1012_v58 = vstv %s6221_s20  ;;  %v1707_v35 = vrot.slane %v1705_v32, 4  ;;  %v996_v9 = vpack.c.bf16 %v995_v25, %v994_v18  ;;  %v1722_v33 = vrot.slane %v5347_v43, 5  ;;  %v1041_v18 = vld [vmem:[#allocation2 + $0x6c] sm:$0xf]  ;;  %v5298_v43 = vld [vmem:[%s6689_s5 + $0x1d8] sm:$0xff]  }
  0xb7   : > { %4960 = vmatpush3.bf16.msra.mxu0 %v5272_v38  ;;  %4835 = vmatprep.subr.bf16.mxu1 %v5283_v48  ;;  %v4330_v38 = vrot.slane %v1670_v54, 9  ;;  %v6257_v0 = vsel %vm5992_vm14, %v1749_v6, %v1750_v56  ;;  %v1714_v26 = vrot.slane %v1712_v5, 4  ;;  %v1713_v57 = vsel %vm5992_vm14, %v4331_v10, %v1712_v5  ;;  %v5297_v25 = vld [vmem:[%s6689_s5 + $0xc8] sm:$0xff]   ;;  %v6307_v10 = vld [vmem:[#allocation2 + $0x1c] sm:$0xf] }
  0xb8   : > { %4961 = vmatprep.subr.bf16.mxu0 %v5276_v1  ;;  %v4344_v29 = vcombine.low %v6238_v30, %v6257_v0  ;;  %v1014_v46 = vmul.bf16 %v1012_v58, %v996_v9  ;;  %v1709_v45 = vsel %vm5992_vm14, %v1707_v35, %v1708_v22  ;;  %v1729_v5 = vrot.slane %v5348_v23, 5  ;;  %v5290_v9 = vld [vmem:[#allocation2 + $0x24] sm:$0xff]   ;;  %v6347_v23 = vld [vmem:[#allocation2 + $0x34] sm:$0xf]  ;;  %v5310_v30 = vld [vmem:[%s6689_s5 + $0x1f8] sm:$0xff]  }
  0xb9   : > { %v1706_v4 = vsel %vm5992_vm14, %v4330_v38, %v1705_v32  ;;  %v1719_v32 = vrot.slane %v6104_v49, 5  ;;  %v3166_v38 = vld [vmem:[#allocation2 + $0x18] sm:$0xf] }
  0xba   : > { %4946 = vmatmul.mubr.bf16.gmra.mrb[8].mxu0 %v4398_v15  ;;  %4836 = vmatpush3.bf16.msra.mxu1 %v5283_v48  ;;  %v4400_v15 = vcombine.low %v6168_v39, %v2714_v14  ;;  %v4295_v44 = vcombine.low %v1014_v46, %v1014_v46  ;;  %v4296_v13 = vcombine.high %v1014_v46, %v1014_v46  ;;  %v5346_v48 = vld [vmem:[#allocation2 + $0x34] sm:$0xf]  ;;  %v5292_v46 = vld [vmem:[%s6689_s5 + $0x1c8] sm:$0xff]  }
  0xbb   : > { %4962 = vmatpush3.bf16.msra.mxu0 %v5276_v1  ;;  %4949 = vmatprep.mubr.bf16.mxu0 %v4399_v51  ;;  %v1672_v51 = vld [vmem:[#allocation2 + $0x24] sm:$0xe]  ;;  %v1716_v39 = vsel %vm5992_vm14, %v1714_v26, %v1715_v28  ;;  %v1726_v55 = vrot.slane %v5346_v48, 5  ;;  %v4338_v19 = vcombine.low %v1706_v4, %v1709_v45  ;;  %v1721_v56 = vrot.slane %v1719_v32, 4 }
  0xbc   : > { %4963 = vmatprep.subr.bf16.mxu0 %v5278_v52  ;;  %4837 = vmatprep.subr.bf16.mxu1 %v5287_v37  ;;  %v1021_v54 = vshrl.u32 %v4295_v44, 16  ;;  %v1024_v7 = vshll.u32 %v4295_v44, 16  ;;  %v1029_v62 = vshrl.u32 %v4296_v13, 16  ;;  %v1032_v1 = vshll.u32 %v4296_v13, 16  ;;  %v6325_v44 = vld [vmem:[#allocation2 + $0x28] sm:$0xf] }
  0xbd   : > { %4822 = vmatmul.mubr.bf16.gmra.mrb[12].mxu1 %v4320_v36  ;;  %v4332_v22 = vrot.slane %v1672_v51, 9  ;;  %v4339_v47 = vcombine.low %v1713_v57, %v1716_v39  ;;  %v1728_v6 = vrot.slane %v1726_v55, 4  ;;  %v1723_v26 = vsel %vm5992_vm14, %v1721_v56, %v1722_v33  ;;  %v3169_v57 = vld [vmem:[#allocation2 + $0x24] sm:$0xf]  ;;  %v5295_v13 = vld [vmem:[%s6689_s5 + $0x1d0] sm:$0xff]  }
  0xbe   : > { %4838 = vmatpush3.bf16.msra.mxu1 %v5287_v37  ;;  %4841 = vmatprep.mubr.bf16.mxu1 %v4337_v60  ;;  %v1023_v8 = vrot.slane %v1021_v54, 7  ;;  %v6294_v49 = vrot.slane %v1029_v62, 7  ;;  %v5289_v37 = vld [vmem:[%s6689_s5 + $0x1c0] sm:$0xff]   ;;  %v1727_v53 = vsel %vm5992_vm14, %v4333_v2, %v1726_v55  ;;  %v3191_v28 = vshrl.u32 %v3166_v38, 16 }
  0xbf   : > { %4964 = vmatpush3.bf16.msra.mxu0 %v5278_v52  ;;  %4839 = vmatprep.subr.bf16.mxu1 %v5291_v27  ;;  %v1720_v60 = vsel %vm5992_vm14, %v4332_v22, %v1719_v32  ;;  %v1730_v3 = vsel %vm5992_vm14, %v1728_v6, %v1729_v5  ;;  %v6333_v32 = vld [vmem:[#allocation2 + $0x20] sm:$0x1]  ;;  %v3215_v55 = vshrl.u32 %v3169_v57, 16  ;;  %v3218_v54 = vshll.u32 %v3169_v57, 16  ;;  %v5300_v22 = vld [vmem:[#allocation2 + $0x48] sm:$0xff]  }
  0xc0   : > { %4965 = vmatprep.subr.bf16.mxu0 %v5282_v61  ;;  %v1026_v52 = vor.u32 %v1024_v7, %v1023_v8  ;;  %v1027_v14 = vrot.slane %v1023_v8, 4  ;;  %v1034_v36 = vor.u32 %v1032_v1, %v6294_v49  ;;  %v4340_v4 = vcombine.low %v1720_v60, %v1723_v26  ;;  %v5296_v1 = vld [vmem:[#allocation2 + $0x3c] sm:$0xff]   ;;  %v6349_v5 = vld [vmem:[#allocation2 + $0x2c] sm:$0x1] }
  0xc1   : > { %v4341_v51 = vcombine.low %v1727_v53, %v1730_v3  ;;  %v3193_v45 = vrot.slane %v3191_v28, 4  ;;  %v3224_v7 = vshll.u32 %v6325_v44, 16  ;;  %v3228_v62 = vshrl.u32 %v6325_v44, 16  ;;  %v5305_v33 = vld [vmem:[%s6689_s5 + $0xe0] sm:$0xff]   ;;  %v5302_v53 = vld [vmem:[#allocation2 + $0x54] sm:$0xff]  }
  0xc2   : > { %4950 = vmatmul.mubr.bf16.gmra.mrb[12].mxu0 %v4400_v15  ;;  %4840 = vmatpush3.bf16.msra.mxu1 %v5291_v27  ;;  %v1035_v58 = vsel %vm5585_vm7, %v1027_v14, %v1034_v36  ;;  %v1042_v35 = vsel %vm5601_vm8, %v1026_v52, %v1041_v18  ;;  %v3194_v27 = vshll.u32 %v3166_v38, 16  ;;  %v3200_v15 = vshll.u32 %v6307_v10, 16  ;;  %v5309_v14 = vld [vmem:[%s6689_s5 + $0xe8] sm:$0xff]   ;;  %v3175_v38 = vld [vmem:[#allocation2 + $0x3c] sm:$0xf] }
  0xc3   : > { %4966 = vmatpush3.bf16.msra.mxu0 %v5282_v61  ;;  %4969 = vmatprep.mubr.bf16.mxu0 %v5288_v42  ;;  %1043 = vst [vmem:[#allocation2 + $0x6c] sm:$0xf] %v1042_v35  ;;  %1044 = vst [vmem:[#allocation2 + $0x70] sm:$0xf] %v1035_v58  ;;  %v5299_v61 = vld [vmem:[%s6689_s5 + $0xd0] sm:$0xff]   ;;  %v3204_v42 = vshrl.u32 %v6307_v10, 16 }
  0xc4   : > { %4967 = vmatprep.subr.bf16.mxu0 %v5284_v41  ;;  %4857 = vmatprep.subr.bf16.mxu1 %v5293_v31  ;;  %v3196_v39 = vrot.slane %v3194_v27, 5  ;;  %v6335_v59 = vrot.slane %v3200_v15, 5  ;;  %v3217_v56 = vrot.slane %v3215_v55, 4  ;;  %v3220_v2 = vrot.slane %v3218_v54, 5  ;;  %v6358_v58 = vld [vmem:[#allocation2 + $0x40] sm:$0xf] }
  0xc5   : > { %4842 = vmatmul.mubr.bf16.vlgmr.msra.gmra.mrb[0].mxu1 %v4338_v19  ;;  %v3206_v48 = vrot.slane %v3204_v42, 4  ;;  %v3210_v19 = vshll.u32 %v6333_v32, 16  ;;  %v6351_v18 = vrot.slane %v3224_v7, 5  ;;  %v3248_v36 = vshll.u32 %v6347_v23, 16  ;;  %v5301_v35 = vld [vmem:[%s6689_s5 + $0x1e0] sm:$0xff]   ;;  %v5315_v7 = vld [vmem:[#allocation2 + $0xc] sm:$0xff]  }
  0xc6   : > { %4858 = vmatpush3.bf16.msra.mxu1 %v5293_v31  ;;  %4845 = vmatprep.mubr.bf16.mxu1 %v4339_v47  ;;  %v3172_v31 = vld [vmem:[#allocation2 + $0x30] sm:$0xf]  ;;  %v3197_v8 = vor.u32 %v3196_v39, %v3193_v45  ;;  %v3221_v3 = vor.u32 %v3220_v2, %v3217_v56  ;;  %v6371_v15 = vld [vmem:[#allocation2 + $0x38] sm:$0x1]  ;;  %v3263_v42 = vshrl.u32 %v3175_v38, 16  ;;  %v3272_v57 = vshll.u32 %v6358_v58, 16 }
  0xc7   : > { %4968 = vmatpush3.bf16.msra.mxu0 %v5284_v41  ;;  %4859 = vmatprep.subr.bf16.mxu1 %v5297_v25  ;;  %v5303_v41 = vld [vmem:[%s6689_s5 + $0xd8] sm:$0xff]   ;;  %v3207_v47 = vor.u32 %v3206_v48, %v6335_v59  ;;  %v3239_v6 = vshrl.u32 %v3172_v31, 16  ;;  %v3242_v52 = vshll.u32 %v3172_v31, 16  ;;  %v3212_v26 = vrot.slane %v3210_v19, 5  ;;  %v3178_v45 = vld [vmem:[#allocation2 + $0x48] sm:$0xf] }
  0xc8   : > { %4985 = vmatprep.subr.bf16.mxu0 %v5289_v37  ;;  %v3276_v20 = vshrl.u32 %v6358_v58, 16  ;;  %v6381_v24 = vrot.slane %v3248_v36, 5  ;;  %v6390_v39 = vld [vmem:[#allocation2 + $0x4c] sm:$0xf]  ;;  %v6394_v55 = vrot.slane %v3221_v3, 4  ;;  %v6401_v31 = vrot.slane %v3263_v42, 4 }
  0xc9   : > { %v3208_v60 = vrot.slane %v3207_v47, 4  ;;  %v3241_v27 = vrot.slane %v3239_v6, 4  ;;  %v6405_v19 = vrot.slane %v3272_v57, 5  ;;  %v3290_v47 = vshll.u32 %v3178_v45, 16  ;;  %v5307_v2 = vld [vmem:[%s6689_s5 + $0x1f0] sm:$0xff]  }
  0xca   : > { %4970 = vmatmul.mubr.bf16.vlgmr.msra.gmra.mrb[0].mxu0 %v5290_v9  ;;  %4860 = vmatpush3.bf16.msra.mxu1 %v5297_v25  ;;  %v3230_v25 = vrot.slane %v3228_v62, 4  ;;  %v3198_v9 = vrot.slane %v3197_v8, 4  ;;  %v3278_v16 = vrot.slane %v3276_v20, 4  ;;  %v3287_v8 = vshrl.u32 %v3178_v45, 16  ;;  %v5316_v20 = vld [vmem:[#allocation2 + $0x18] sm:$0xff]   ;;  %v5319_v45 = vld [vmem:[#allocation2 + $0x24] sm:$0xff]  }
  0xcb   : > { %4986 = vmatpush3.bf16.msra.mxu0 %v5289_v37  ;;  %4973 = vmatprep.mubr.bf16.mxu0 %v5294_v21  ;;  %v3252_v37 = vshrl.u32 %v6347_v23, 16  ;;  %v3234_v21 = vshll.u32 %v6349_v5, 16  ;;  %v3296_v56 = vshll.u32 %v6390_v39, 16  ;;  %v3300_v6 = vshrl.u32 %v6390_v39, 16 }
  0xcc   : > { %4987 = vmatprep.subr.bf16.mxu0 %v5292_v46  ;;  %4861 = vmatprep.subr.bf16.mxu1 %v5299_v61  ;;  %v3231_v28 = vor.u32 %v3230_v25, %v6351_v18  ;;  %v3292_v3 = vrot.slane %v3290_v47, 5 }
  0xcd   : > { %4846 = vmatmul.mubr.bf16.gmra.mrb[4].mxu1 %v4340_v4  ;;  %v3266_v4 = vshll.u32 %v3175_v38, 16  ;;  %v3181_v38 = vld [vmem:[#allocation2 + $0x54] sm:$0xf] }
  0xce   : > { %4862 = vmatpush3.bf16.msra.mxu1 %v5299_v61  ;;  %4849 = vmatprep.mubr.bf16.mxu1 %v4341_v51  ;;  %v531_v61 = vld [vmem:[#allocation2 + $0x74] sm:$0x1]  ;;  %v3203_v51 = vsel %vm5663_vm11, %v3198_v9, %v6335_v59  ;;  %v6396_v54 = vrot.slane %v3231_v28, 4  ;;  %v6399_v59 = vld [vmem:[#allocation2 + $0x44] sm:$0x1]  ;;  %v3279_v9 = vor.u32 %v3278_v16, %v6405_v19  ;;  %v6439_v28 = vrot.slane %v3296_v56, 5 }
  0xcf   : > { %4988 = vmatpush3.bf16.msra.mxu0 %v5292_v46  ;;  %4863 = vmatprep.subr.bf16.mxu1 %v5303_v41  ;;  %v3244_v46 = vrot.slane %v3242_v52, 5  ;;  %v532_v48 = vsel %vm5528_vm4, 0, %v531_v61  ;;  %v1036_v52 = vrot.slane %v6294_v49, 4  ;;  %v5308_v49 = vld [vmem:[#allocation2 + $0x6c] sm:$0xff]   ;;  %v3311_v61 = vshrl.u32 %v3181_v38, 16 }
  0xd0   : > { %4989 = vmatprep.subr.bf16.mxu0 %v5295_v13  ;;  %533 = vst [vmem:[#allocation2 + $0x74] sm:$0x1] %v532_v48  ;;  %v3314_v42 = vshll.u32 %v3181_v38, 16 }
  0xd1   : > { %v3245_v62 = vor.u32 %v3244_v46, %v3241_v27  ;;  %v6441_v27 = vld [vmem:[#allocation2 + $0x64] sm:$0xf]  ;;  %v3302_v46 = vrot.slane %v3300_v6, 4 }
  0xd2   : > { %4974 = vmatmul.mubr.bf16.gmra.mrb[4].mxu0 %v5296_v1  ;;  %4864 = vmatpush3.bf16.msra.mxu1 %v5303_v41  ;;  %v6388_v41 = vrot.slane %v3234_v21, 5  ;;  %v3258_v1 = vshll.u32 %v6371_v15, 16  ;;  %v3344_v48 = vshll.u32 %v6441_v27, 16  ;;  %v3316_v16 = vrot.slane %v3314_v42, 5 }
  0xd3   : > { %4990 = vmatpush3.bf16.msra.mxu0 %v5295_v13  ;;  %4977 = vmatprep.mubr.bf16.mxu0 %v5300_v22  ;;  %v3213_v13 = vsel %vm5663_vm11, %v3208_v60, %v3212_v26  ;;  %v6403_v22 = vrot.slane %v3266_v4, 5  ;;  %v3246_v0 = vrot.slane %v3245_v62, 4  ;;  %v6437_v60 = vld [vmem:[#allocation2 + $0x50] sm:$0x1]  ;;  %v3184_v26 = vld [vmem:[#allocation2 + $0x60] sm:$0xf] }
  0xd4   : > { %4991 = vmatprep.subr.bf16.mxu0 %v5298_v43  ;;  %4865 = vmatprep.subr.bf16.mxu1 %v5305_v33  ;;  %v4425_v25 = vcombine.low %v3203_v51, %v3213_v13  ;;  %v3237_v36 = vsel %vm5663_vm11, %v6396_v54, %v6388_v41  ;;  %v5312_v51 = vld [vmem:[%s6689_s5 + $0x200] sm:$0xff]   ;;  %v3306_v62 = vshll.u32 %v6437_v60, 16  ;;  %v6470_v6 = vrot.slane %v3344_v48, 5 }
  0xd5   : > { %4850 = vmatmul.mubr.bf16.gmra.mrb[8].mxu1 %v4342_v11  ;;  %v5306_v11 = vld [vmem:[#allocation2 + $0x60] sm:$0xff]   ;;  %v3251_v13 = vsel %vm5663_vm11, %v3246_v0, %v6381_v24 }
  0xd6   : > { %4866 = vmatpush3.bf16.msra.mxu1 %v5305_v33  ;;  %4853 = vmatprep.mubr.bf16.mxu1 %v4343_v40  ;;  %v3254_v40 = vrot.slane %v3252_v37, 4  ;;  %v3282_v37 = vshll.u32 %v6399_v59, 16 }
  0xd7   : > { %4992 = vmatpush3.bf16.msra.mxu0 %v5298_v43  ;;  %4867 = vmatprep.subr.bf16.mxu1 %v5309_v14  ;;  %v5313_v43 = vld [vmem:[%s6689_s5 + $0xf8] sm:$0xff]   ;;  %v1045_v57 = vld [vmem:[#allocation2 + $0x74] sm:$0x1] }
  0xd8   : > { %4993 = vmatprep.subr.bf16.mxu0 %v5301_v35  ;;  %v3255_v33 = vor.u32 %v3254_v40, %v6381_v24  ;;  %v1046_v40 = vsel %vm5518_vm3, %v1036_v52, %v1045_v57  ;;  %v3284_v41 = vrot.slane %v3282_v37, 5  ;;  %v6461_v24 = vld [vmem:[%s6689_s5 + $0x208] sm:$0xff]  }
  0xd9   : > { %1047 = vst [vmem:[#allocation2 + $0x74] sm:$0x1] %v1046_v40  ;;  %v3187_v37 = vld [vmem:[#allocation2 + $0x6c] sm:$0xf] }
  0xda   : > { %4978 = vmatmul.mubr.bf16.gmra.mrb[8].mxu0 %v5302_v53  ;;  %4868 = vmatpush3.bf16.msra.mxu1 %v5309_v14  ;;  %v3227_v14 = vsel %vm5663_vm11, %v6394_v55, %v6351_v18  ;;  %v3269_v18 = vor.u32 %v6403_v22, %v6401_v31  ;;  %v3256_v21 = vrot.slane %v3255_v33, 4  ;;  %v3289_v53 = vrot.slane %v3287_v8, 4 }
  0xdb   : > { %4994 = vmatpush3.bf16.msra.mxu0 %v5301_v35  ;;  %4981 = vmatprep.mubr.bf16.mxu0 %v5306_v11  ;;  %v6429_v35 = vld [vmem:[#allocation2 + $0x58] sm:$0xf]  ;;  %v3348_v55 = vshrl.u32 %v6441_v27, 16  ;;  %v3303_v31 = vor.u32 %v3302_v46, %v6439_v28  ;;  %v3313_v22 = vrot.slane %v3311_v61, 4  ;;  %v5317_v46 = vld [vmem:[%s6689_s5 + $0x210] sm:$0xff]   ;;  %v5323_v61 = vld [vmem:[#allocation2 + $0x3c] sm:$0xff]  }
  0xdc   : > { %4995 = vmatprep.subr.bf16.mxu0 %v5304_v63  ;;  %4869 = vmatprep.subr.bf16.mxu1 %v5311_v17  ;;  %v3320_v4 = vshll.u32 %v6429_v35, 16  ;;  %v3324_v11 = vshrl.u32 %v6429_v35, 16  ;;  %v3270_v54 = vrot.slane %v3269_v18, 4 }
  0xdd   : > { %4854 = vmatmul.mubr.bf16.gmra.mrb[12].mxu1 %v4344_v29  ;;  %v3260_v29 = vrot.slane %v3258_v1, 5  ;;  %v3293_v1 = vor.u32 %v3292_v3, %v3289_v53  ;;  %v3350_v52 = vrot.slane %v3348_v55, 4  ;;  %v3304_v18 = vrot.slane %v3303_v31, 4 }
  0xde   : > { %4870 = vmatpush3.bf16.msra.mxu1 %v5311_v17  ;;  %4873 = vmatprep.mubr.bf16.mxu1 %v5315_v7  ;;  %v3335_v17 = vshrl.u32 %v3184_v26, 16  ;;  %v3280_v7 = vrot.slane %v3279_v9, 4  ;;  %v6466_v33 = vrot.slane %v3320_v4, 5  ;;  %v3326_v8 = vrot.slane %v3324_v11, 4 }
  0xdf   : > { %4996 = vmatpush3.bf16.msra.mxu0 %v5304_v63  ;;  %4871 = vmatprep.subr.bf16.mxu1 %v5313_v43  ;;  %v3338_v63 = vshll.u32 %v3184_v26, 16  ;;  %v3261_v12 = vsel %vm5663_vm11, %v3256_v21, %v3260_v29  ;;  %v3294_v29 = vrot.slane %v3293_v1, 4  ;;  %v3317_v9 = vor.u32 %v3316_v16, %v3313_v22  ;;  %v3595_v22 = vld [vmem:[#allocation2 + $0x48] sm:$0xe] }
  0xe0   : > { %4997 = vmatprep.subr.bf16.mxu0 %v5307_v2  ;;  %v3337_v47 = vrot.slane %v3335_v17, 4  ;;  %v4427_v38 = vcombine.low %v3251_v13, %v3261_v12  ;;  %v3285_v0 = vsel %vm5663_vm11, %v3280_v7, %v3284_v41  ;;  %v3327_v21 = vor.u32 %v3326_v8, %v6466_v33  ;;  %v5318_v41 = vld [vmem:[%s6689_s5 + $0x218] sm:$0xff]   ;;  %v6503_v31 = vld [vmem:[#allocation2 + $0x74] sm:$0x1] }
  0xe1   : > { %v3340_v56 = vrot.slane %v3338_v63, 5  ;;  %v3359_v3 = vshrl.u32 %v3187_v37, 16  ;;  %v3351_v42 = vor.u32 %v3350_v52, %v6470_v6  ;;  %v3362_v4 = vshll.u32 %v3187_v37, 16  ;;  %v5327_v52 = vld [vmem:[#allocation2 + $0x54] sm:$0xff]  }
  0xe2   : > { %4982 = vmatmul.mubr.bf16.gmra.mrb[12].mxu0 %v5308_v49  ;;  %4872 = vmatpush3.bf16.msra.mxu1 %v5313_v43  ;;  %v6464_v43 = vld [vmem:[#allocation2 + $0x5c] sm:$0x1]  ;;  %v3275_v49 = vsel %vm5663_vm11, %v3270_v54, %v6405_v19  ;;  %v3299_v17 = vsel %vm5663_vm11, %v3294_v29, %v6439_v28  ;;  %v3318_v40 = vrot.slane %v3317_v9, 4  ;;  %v3653_v1 = vrot.slane %v6390_v39, 5  ;;  %v5321_v39 = vld [vmem:[%s6689_s5 + $0x220] sm:$0xff]   ;;  %v5322_v29 = vld [vmem:[%s6689_s5 + $0x228] sm:$0xff]  }
  0xe3   : > { %4998 = vmatpush3.bf16.msra.mxu0 %v5307_v2  ;;  %5001 = vmatprep.mubr.bf16.mxu0 %v4425_v25  ;;  %v4426_v2 = vcombine.low %v3227_v14, %v3237_v36  ;;  %v6468_v25 = vld [vmem:[#allocation2 + $0x68] sm:$0x1]  ;;  %v3308_v14 = vrot.slane %v3306_v62, 5  ;;  %v6478_v36 = vld [vmem:[#allocation2 + $0x70] sm:$0xf]  ;;  %v3330_v26 = vshll.u32 %v6464_v43, 16  ;;  %v3341_v53 = vor.u32 %v3340_v56, %v3337_v47 }
  0xe4   : > { %4999 = vmatprep.subr.bf16.mxu0 %v5310_v30  ;;  %5049 = vmatprep.subr.bf16.mxu1 %v5312_v51  ;;  %v3354_v19 = vshll.u32 %v6468_v25, 16  ;;  %v3368_v57 = vshll.u32 %v6478_v36, 16  ;;  %v4428_v11 = vcombine.low %v3275_v49, %v3285_v0  ;;  %v3361_v55 = vrot.slane %v3359_v3, 4  ;;  %v5324_v47 = vld [vmem:[#allocation2 + $0x48] sm:$0xff]  }
  0xe5   : > { %4874 = vmatmul.mubr.bf16.vlgmr.msra.gmra.mrb[0].mxu1 %v5316_v20  ;;  %v3372_v20 = vshrl.u32 %v6478_v36, 16  ;;  %v3309_v63 = vsel %vm5663_vm11, %v3304_v18, %v3308_v14  ;;  %v3332_v13 = vrot.slane %v3330_v26, 5  ;;  %v3352_v12 = vrot.slane %v3351_v42, 4  ;;  %v3591_v18 = vld [vmem:[#allocation2 + $0x18] sm:$0xe] }
  0xe6   : > { %5057 = vmatpush3.bf16.msra.mxu1 %v5312_v51  ;;  %4877 = vmatprep.mubr.bf16.mxu1 %v5319_v45  ;;  %v3342_v45 = vrot.slane %v3341_v53, 4  ;;  %v3356_v48 = vrot.slane %v3354_v19, 5  ;;  %v3364_v54 = vrot.slane %v3362_v4, 5  ;;  %v6499_v28 = vrot.slane %v3368_v57, 5  ;;  %v3596_v53 = vld [vmem:[#allocation2 + $0x54] sm:$0xe] }
  0xe7   : > { %5000 = vmatpush3.bf16.msra.mxu0 %v5310_v30  ;;  %5050 = vmatprep.subr.bf16.mxu1 %v6461_v24  ;;  %v5320_v30 = vld [vmem:[#allocation2 + $0x30] sm:$0xff]   ;;  %v3374_v7 = vrot.slane %v3372_v20, 4  ;;  %v4429_v62 = vcombine.low %v3299_v17, %v3309_v63  ;;  %v3323_v16 = vsel %vm5663_vm11, %v3318_v40, %v6466_v33  ;;  %v3378_v37 = vshll.u32 %v6503_v31, 16  ;;  %v3597_v42 = vld [vmem:[#allocation2 + $0x60] sm:$0xe] }
  0xe8   : > { %5017 = vmatprep.subr.bf16.mxu0 %v5312_v51  ;;  %v3357_v56 = vsel %vm5663_vm11, %v3352_v12, %v3356_v48  ;;  %v3655_v49 = vrot.slane %v3653_v1, 4  ;;  %v3625_v0 = vrot.slane %v6307_v10, 5  ;;  %v3660_v14 = vrot.slane %v6429_v35, 5  ;;  %v5328_v20 = vld [vmem:[#allocation2 + $0x60] sm:$0xff]  }
  0xe9   : > { %v3375_v33 = vor.u32 %v3374_v7, %v6499_v28  ;;  %v3667_v19 = vrot.slane %v6441_v27, 5  ;;  %v4441_v3 = vrot.slane %v3591_v18, 9  ;;  %v3663_v57 = vrot.slane %v6464_v43, 5  ;;  %v3592_v27 = vld [vmem:[#allocation2 + $0x24] sm:$0xe] }
  0xea   : > { %5002 = vmatmul.mubr.bf16.vlgmr.msra.gmra.mrb[0].mxu0 %v4426_v2  ;;  %5058 = vmatpush3.bf16.msra.mxu1 %v6461_v24  ;;  %v3365_v2 = vor.u32 %v3364_v54, %v3361_v55  ;;  %v3662_v4 = vrot.slane %v3660_v14, 4  ;;  %v3632_v63 = vrot.slane %v6325_v44, 5  ;;  %v3639_v44 = vrot.slane %v6347_v23, 5  ;;  %v5326_v55 = vld [vmem:[%s6689_s5 + $0x238] sm:$0xff]   ;;  %v3593_v54 = vld [vmem:[#allocation2 + $0x30] sm:$0xe] }
  0xeb   : > { %5018 = vmatpush3.bf16.msra.mxu0 %v5312_v51  ;;  %5005 = vmatprep.mubr.bf16.mxu0 %v4427_v38  ;;  %v3328_v51 = vrot.slane %v3327_v21, 4  ;;  %v4445_v38 = vrot.slane %v3595_v22, 9  ;;  %v3376_v21 = vrot.slane %v3375_v33, 4  ;;  %v4442_v34 = vrot.slane %v3592_v27, 9 }
  0xec   : > { %5019 = vmatprep.subr.bf16.mxu0 %v6461_v24  ;;  %5051 = vmatprep.subr.bf16.mxu1 %v5317_v46  ;;  %v3635_v12 = vrot.slane %v6349_v5, 5  ;;  %v3664_v7 = vsel %vm5992_vm14, %v3662_v4, %v3663_v57  ;;  %v3674_v23 = vrot.slane %v6478_v36, 5  ;;  %v3677_v33 = vrot.slane %v6503_v31, 5 }
  0xed   : > { %4878 = vmatmul.mubr.bf16.gmra.mrb[4].mxu1 %v5320_v30  ;;  %v3333_v8 = vsel %vm5663_vm11, %v3328_v51, %v3332_v13  ;;  %v3366_v30 = vrot.slane %v3365_v2, 4  ;;  %v3654_v10 = vsel %vm5992_vm14, %v4445_v38, %v3653_v1  ;;  %v4447_v13 = vrot.slane %v3597_v42, 9 }
  0xee   : > { %5059 = vmatpush3.bf16.msra.mxu1 %v5317_v46  ;;  %4881 = vmatprep.mubr.bf16.mxu1 %v5323_v61  ;;  %v4430_v9 = vcombine.low %v3323_v16, %v3333_v8  ;;  %v3628_v61 = vrot.slane %v6333_v32, 5  ;;  %v4446_v32 = vrot.slane %v3596_v53, 9  ;;  %v3670_v51 = vrot.slane %v6468_v25, 5  ;;  %v3598_v16 = vld [vmem:[#allocation2 + $0x6c] sm:$0xe] }
  0xef   : > { %5020 = vmatpush3.bf16.msra.mxu0 %v6461_v24  ;;  %5052 = vmatprep.subr.bf16.mxu1 %v5318_v41  ;;  %v3347_v24 = vsel %vm5663_vm11, %v3342_v45, %v6470_v6  ;;  %v3656_v6 = vrot.slane %v6437_v60, 5  ;;  %v3380_v60 = vrot.slane %v3378_v37, 5  ;;  %v3371_v17 = vsel %vm5663_vm11, %v3366_v30, %v6499_v28 }
  0xf0   : > { %5021 = vmatprep.subr.bf16.mxu0 %v5317_v46  ;;  %v4431_v26 = vcombine.low %v3347_v24, %v3357_v56  ;;  %v3626_v45 = vsel %vm5992_vm14, %v4441_v3, %v3625_v0  ;;  %v3661_v28 = vsel %vm5992_vm14, %v4446_v32, %v3660_v14  ;;  %v3634_v1 = vrot.slane %v3632_v63, 4 }
  0xf1   : > { %v3657_v35 = vsel %vm5992_vm14, %v3655_v49, %v3656_v6  ;;  %v3381_v43 = vsel %vm5663_vm11, %v3376_v21, %v3380_v60  ;;  %v3668_v22 = vsel %vm5992_vm14, %v4447_v13, %v3667_v19  ;;  %v4443_v8 = vrot.slane %v3593_v54, 9  ;;  %v3594_v6 = vld [vmem:[#allocation2 + $0x3c] sm:$0xe] }
  0xf2   : > { %5006 = vmatmul.mubr.bf16.gmra.mrb[4].mxu0 %v4428_v11  ;;  %5060 = vmatpush3.bf16.msra.mxu1 %v5318_v41  ;;  %v5325_v11 = vld [vmem:[%s6689_s5 + $0x230] sm:$0xff]   ;;  %v4453_v40 = vcombine.low %v3654_v10, %v3657_v35  ;;  %v4432_v25 = vcombine.low %v3371_v17, %v3381_v43  ;;  %v3642_v24 = vrot.slane %v6371_v15, 5  ;;  %v4448_v56 = vrot.slane %v3598_v16, 9 }
  0xf3   : > { %5022 = vmatpush3.bf16.msra.mxu0 %v5317_v46  ;;  %5009 = vmatprep.mubr.bf16.mxu0 %v4429_v62  ;;  %v3627_v46 = vrot.slane %v3625_v0, 4  ;;  %v3676_v2 = vrot.slane %v3674_v23, 4  ;;  %v3636_v37 = vsel %vm5992_vm14, %v3634_v1, %v3635_v12  ;;  %v3646_v38 = vrot.slane %v6358_v58, 5 }
  0xf4   : > { %5023 = vmatprep.subr.bf16.mxu0 %v5318_v41  ;;  %5053 = vmatprep.subr.bf16.mxu1 %v5321_v39  ;;  %v3640_v15 = vsel %vm5992_vm14, %v4443_v8, %v3639_v44  ;;  %v3675_v0 = vsel %vm5992_vm14, %v4448_v56, %v3674_v23  ;;  %v4444_v58 = vrot.slane %v3594_v6, 9 }
  0xf5   : > { %4882 = vmatmul.mubr.bf16.gmra.mrb[8].mxu1 %v5324_v47  ;;  %v3629_v48 = vsel %vm5992_vm14, %v3627_v46, %v3628_v61  ;;  %v3641_v47 = vrot.slane %v3639_v44, 4  ;;  %v3678_v14 = vsel %vm5992_vm14, %v3676_v2, %v3677_v33  ;;  %v3648_v18 = vrot.slane %v3646_v38, 4 }
  0xf6   : > { %5061 = vmatpush3.bf16.msra.mxu1 %v5321_v39  ;;  %4885 = vmatprep.mubr.bf16.mxu1 %v5327_v52  ;;  %v4449_v62 = vcombine.low %v3626_v45, %v3629_v48  ;;  %v3633_v52 = vsel %vm5992_vm14, %v4442_v34, %v3632_v63  ;;  %v3647_v30 = vsel %vm5992_vm14, %v4444_v58, %v3646_v38 }
  0xf7   : > { %5024 = vmatpush3.bf16.msra.mxu0 %v5318_v41  ;;  %5054 = vmatprep.subr.bf16.mxu1 %v5322_v29  ;;  %v3669_v41 = vrot.slane %v3667_v19, 4  ;;  %v3643_v49 = vsel %vm5992_vm14, %v3641_v47, %v3642_v24  ;;  %v4450_v31 = vcombine.low %v3633_v52, %v3636_v37 }
  0xf8   : > { %5025 = vmatprep.subr.bf16.mxu0 %v5321_v39 }
  0xf9   : > { %v3671_v5 = vsel %vm5992_vm14, %v3669_v41, %v3670_v51 }
  0xfa   : > { %5010 = vmatmul.mubr.bf16.gmra.mrb[8].mxu0 %v4430_v9  ;;  %5062 = vmatpush3.bf16.msra.mxu1 %v5322_v29  ;;  %v4455_v36 = vcombine.low %v3668_v22, %v3671_v5  ;;  %v3649_v9 = vrot.slane %v6399_v59, 5 }
  0xfb   : > { %5026 = vmatpush3.bf16.msra.mxu0 %v5321_v39  ;;  %5013 = vmatprep.mubr.bf16.mxu0 %v4431_v26  ;;  %v4454_v39 = vcombine.low %v3661_v28, %v3664_v7  ;;  %v4456_v26 = vcombine.low %v3675_v0, %v3678_v14 }
  0xfc   : > { %5027 = vmatprep.subr.bf16.mxu0 %v5322_v29  ;;  %5055 = vmatprep.subr.bf16.mxu1 %v5325_v11  ;;  %v3650_v21 = vsel %vm5992_vm14, %v3648_v18, %v3649_v9 }
  0xfd   : > { %4886 = vmatmul.mubr.bf16.gmra.mrb[12].mxu1 %v5328_v20  ;;  %v4452_v60 = vcombine.low %v3647_v30, %v3650_v21 }
  0xfe   : > { %5063 = vmatpush3.bf16.msra.mxu1 %v5325_v11  ;;  %5041 = vmatprep.mubr.bf16.mxu1 %v4453_v40 }
  0xff   : > { %5028 = vmatpush3.bf16.msra.mxu0 %v5322_v29  ;;  %5056 = vmatprep.subr.bf16.mxu1 %v5326_v55  ;;  %v4451_v29 = vcombine.low %v3640_v15, %v3643_v49 }
 0x100   : > { %5029 = vmatprep.subr.bf16.mxu0 %v5325_v11 }
 0x102   : > { %5014 = vmatmul.mubr.bf16.gmra.mrb[12].mxu0 %v4432_v25  ;;  %5064 = vmatpush3.bf16.msra.mxu1 %v5326_v55 }
 0x103   : > { %5030 = vmatpush3.bf16.msra.mxu0 %v5325_v11  ;;  %5033 = vmatprep.mubr.bf16.mxu0 %v4449_v62 }
 0x104   : > { %5031 = vmatprep.subr.bf16.mxu0 %v5326_v55 }
 0x105   : > { %5042 = vmatmul.mubr.bf16.vlgmr.msra.gmra.mrb[16].mxu1 %v4454_v39 }
 0x106   : > { %5045 = vmatprep.mubr.bf16.mxu1 %v4455_v36 }
 0x107   : > { %5032 = vmatpush3.bf16.msra.mxu0 %v5326_v55 }
 0x10a   : > { %5034 = vmatmul.mubr.bf16.vlgmr.msra.gmra.mrb[0].mxu0 %v4450_v31 }
 0x10b   : > { %5037 = vmatprep.mubr.bf16.mxu0 %v4451_v29 }
 0x10d   : > { %5046 = vmatmul.mubr.bf16.gmra.mrb[20].mxu1 %v4456_v26 }
 0x112   : > { %5038 = vmatmul.mubr.bf16.gmra.mrb[4].mxu0 %v4452_v60 }
 0x1b8   : > { %v4875_v10 = vpop.f32.mrb[0].mxu1 }
 0x1b9   : > { %v2123_v35 = vpop.f32.mrb[1].mxu1 }
 0x1ba   : > { %v4876_v53 = vpop.f32.mrb[2].mxu1 }
 0x1bb   : > { %v2126_v19 = vpop.f32.mrb[3].mxu1 }
 0x1c0   : > { %v6581_v3 = vpop.f32.mrb[4].mxu1 }
 0x1c1   : > { %v6583_v46 = vpop.f32.mrb[5].mxu1 }
 0x1c2   : > { %v6585_v59 = vpop.f32.mrb[6].mxu1 }
 0x1c3   : > { %v6587_v61 = vpop.f32.mrb[7].mxu1 }
 0x1c8   : > { %v4883_v42 = vpop.f32.mrb[8].mxu1 }
 0x1c9   : > { %v2155_v4 = vpop.f32.mrb[9].mxu1 }
 0x1ca   : > { %v4884_v57 = vpop.f32.mrb[10].mxu1 }
 0x1cb   : > { %v2158_v50 = vpop.f32.mrb[11].mxu1 }
 0x1cd   : > { %v5011_v20 = vpop.f32.mrb[8].mxu0 }
 0x1ce   : > { %v3544_v11 = vpop.f32.mrb[9].mxu0  ;;  %v5073_v17 = vadd.f32 %v5011_v20, %v4883_v42 }
 0x1cf   : > { %v5012_v27 = vpop.f32.mrb[10].mxu0  ;;  %v5075_v63 = vadd.f32 %v3544_v11, %v2155_v4 }
 0x1d0   : > { %v3547_v40 = vpop.f32.mrb[11].mxu0  ;;  %v5077_v32 = vadd.f32 %v5012_v27, %v4884_v57  ;;  %v4887_v43 = vpop.f32.mrb[12].mxu1 }
 0x1d1   : > { %v5079_v13 = vadd.f32 %v3547_v40, %v2158_v50  ;;  %v2171_v41 = vpop.f32.mrb[13].mxu1 }
 0x1d2   : > { %v4888_v51 = vpop.f32.mrb[14].mxu1 }
 0x1d3   : > { %v2174_v45 = vpop.f32.mrb[15].mxu1 }
 0x1d5   : > { %v5015_v48 = vpop.f32.mrb[12].mxu0 }
 0x1d6   : > { %v3560_v44 = vpop.f32.mrb[13].mxu0  ;;  %v5081_v55 = vadd.f32 %v5015_v48, %v4887_v43 }
 0x1d7   : > { %v5016_v34 = vpop.f32.mrb[14].mxu0  ;;  %v5083_v12 = vadd.f32 %v3560_v44, %v2171_v41 }
 0x1d8   : > { %v3563_v54 = vpop.f32.mrb[15].mxu0  ;;  %v5085_v25 = vadd.f32 %v5016_v34, %v4888_v51  ;;  %v5043_v28 = vpop.f32.mrb[16].mxu1 }
 0x1d9   : > { %v5087_v7 = vadd.f32 %v3563_v54, %v2174_v45  ;;  %v6589_v23 = vadd.f32 %v5073_v17, %v5043_v28  ;;  %v3841_v62 = vpop.f32.mrb[17].mxu1 }
 0x1da   : > { %v6591_v1 = vadd.f32 %v5075_v63, %v3841_v62  ;;  %v5044_v22 = vpop.f32.mrb[18].mxu1 }
 0x1db   : > { %v6593_v5 = vadd.f32 %v5077_v32, %v5044_v22  ;;  %v3844_v16 = vpop.f32.mrb[19].mxu1 }
 0x1dc   : > { %v6595_v8 = vadd.f32 %v5079_v13, %v3844_v16 }
 0x1dd   : > { %v5035_v47 = vpop.f32.mrb[0].mxu0  ;;  %v4591_v24 = vpack.c.bf16 %v6593_v5, %v6589_v23 }
 0x1de   : > { %v6599_v39 = vadd.f32 %v5035_v47, %v4875_v10  ;;  %v3809_v36 = vpop.f32.mrb[1].mxu0  ;;  %v4586_v56 = vpack.c.bf16 %v6595_v8, %v6591_v1 }
 0x1df   : > { %v6610_v2 = vadd.f32 %v3809_v36, %v2123_v35  ;;  %v5036_v33 = vpop.f32.mrb[2].mxu0  ;;  %4614 = vst [vmem:[%s6606_s10 + $0x28] sm:$0xff] %v4591_v24  }
 0x1e0   : > { %v6613_v52 = vadd.f32 %v5036_v33, %v4876_v53  ;;  %v3812_v37 = vpop.f32.mrb[3].mxu0  ;;  %4613 = vst [vmem:[%s6606_s10 + $0x20] sm:$0xff] %v4586_v56   ;;  %v5047_v38 = vpop.f32.mrb[20].mxu1 }
 0x1e1   : > { %v5068_v15 = vadd.f32 %v3812_v37, %v2126_v19  ;;  %v6616_v49 = vadd.f32 %v5081_v55, %v5047_v38  ;;  %v3857_v6 = vpop.f32.mrb[21].mxu1 }
 0x1e2   : > { %v4571_v31 = vpack.c.bf16 %v6613_v52, %v6599_v39  ;;  %v6620_v0 = vadd.f32 %v5083_v12, %v3857_v6  ;;  %v5048_v14 = vpop.f32.mrb[22].mxu1 }
 0x1e3   : > { %v3888_v29 = vadd.f32 %v5068_v15, %v6610_v2  ;;  %v4566_v58 = vpack.c.bf16 %v5068_v15, %v6610_v2  ;;  %v6624_v18 = vadd.f32 %v5085_v25, %v5048_v14  ;;  %v3860_v9 = vpop.f32.mrb[23].mxu1 }
 0x1e4   : > { %4610 = vst [vmem:[%s6606_s10 + $0x8] sm:$0xff] %v4571_v31   ;;  %v5088_v26 = vadd.f32 %v5087_v7, %v3860_v9 }
 0x1e5   : > { %v3889_v30 = vadd.f32 %v6599_v39, %v3888_v29  ;;  %4567 = vst [vmem:[%s6606_s10] sm:$0xff] %v4566_v58   ;;  %v5039_v21 = vpop.f32.mrb[4].mxu0  ;;  %v4601_v60 = vpack.c.bf16 %v6624_v18, %v6616_v49 }
 0x1e6   : > { %v5069_v10 = vadd.f32 %v5039_v21, %v6581_v3  ;;  %v3825_v35 = vpop.f32.mrb[5].mxu0  ;;  %v4596_v53 = vpack.c.bf16 %v5088_v26, %v6620_v0 }
 0x1e7   : > { %v5070_v19 = vadd.f32 %v3825_v35, %v6583_v46  ;;  %v3890_v42 = vadd.f32 %v6613_v52, %v3889_v30  ;;  %v5040_v4 = vpop.f32.mrb[6].mxu0  ;;  %4616 = vst [vmem:[%s6606_s10 + $0x38] sm:$0xff] %v4601_v60  }
 0x1e8   : > { %v5071_v57 = vadd.f32 %v5040_v4, %v6585_v59  ;;  %v3828_v50 = vpop.f32.mrb[7].mxu0  ;;  %4615 = vst [vmem:[%s6606_s10 + $0x30] sm:$0xff] %v4596_v53  }
 0x1e9   : > { %v3891_v20 = vadd.f32 %v5070_v19, %v3890_v42  ;;  %v5072_v11 = vadd.f32 %v3828_v50, %v6587_v61 }
 0x1ea   : > { %v4581_v3 = vpack.c.bf16 %v5071_v57, %v5069_v10 }
 0x1eb   : > { %v3892_v17 = vadd.f32 %v5072_v11, %v3891_v20  ;;  %v4576_v27 = vpack.c.bf16 %v5072_v11, %v5070_v19 }
 0x1ec   : > { %4612 = vst [vmem:[%s6606_s10 + $0x18] sm:$0xff] %v4581_v3  }
 0x1ed   : > { %v3893_v63 = vadd.f32 %v5069_v10, %v3892_v17  ;;  %4611 = vst [vmem:[%s6606_s10 + $0x10] sm:$0xff] %v4576_v27  }
 0x1ef   : > { %v3894_v46 = vadd.f32 %v5071_v57, %v3893_v63 }
 0x1f1   : > { %v3895_v40 = vadd.f32 %v6591_v1, %v3894_v46 }
 0x1f3   : > { %v3896_v32 = vadd.f32 %v6595_v8, %v3895_v40 }
 0x1f5   : > { %v3897_v59 = vadd.f32 %v6589_v23, %v3896_v32 }
 0x1f7   : > { %v3898_v43 = vadd.f32 %v6593_v5, %v3897_v59 }
 0x1f9   : > { %v3899_v61 = vadd.f32 %v6620_v0, %v3898_v43 }
 0x1fb   : > { %v3900_v13 = vadd.f32 %v5088_v26, %v3899_v61 }
 0x1fd   : > { %v3901_v41 = vadd.f32 %v6616_v49, %v3900_v13 }
 0x1ff   : > { %v3902_v51 = vadd.f32 %v6624_v18, %v3901_v41 }
 0x201   : > { %v3903_v45 = vrot.slane %v3902_v51, 4 }
 0x203   : > { %v3904_v48 = vadd.f32 %v3903_v45, %v3902_v51 }
 0x205   : > { %v3905_v44 = vrot.slane %v3904_v48, 2 }
 0x207   : > { %v3906_v55 = vadd.f32 %v3905_v44, %v3904_v48 }
 0x209   : > { %v3907_v34 = vrot.slane %v3906_v55, 1 }
 0x20b   : > { %v3908_v12 = vadd.f32 %v3907_v34, %v3906_v55 }
 0x20d   : > { %v3909_v54 = vmul.f32 0.0078125, %v3908_v12  ;;  %3926 = vst [vmem:[%s6655_s14] sm:$0x1] %v3908_v12 }
 0x20f   : > { %v3910_v25 = vsub.f32 %v6610_v2, %v3909_v54  ;;  %v3911_v28 = vsub.f32 %v5068_v15, %v3909_v54  ;;  %v3912_v7 = vsub.f32 %v6599_v39, %v3909_v54  ;;  %v3913_v62 = vsub.f32 %v6613_v52, %v3909_v54 }
 0x210   : > { %v3914_v22 = vsub.f32 %v5070_v19, %v3909_v54  ;;  %v3915_v16 = vsub.f32 %v5072_v11, %v3909_v54  ;;  %v3916_v47 = vsub.f32 %v5069_v10, %v3909_v54  ;;  %v3917_v24 = vsub.f32 %v5071_v57, %v3909_v54 }
 0x211   : > { %v3918_v36 = vsub.f32 %v6591_v1, %v3909_v54  ;;  %v3919_v56 = vsub.f32 %v6595_v8, %v3909_v54  ;;  %v3920_v33 = vsub.f32 %v6589_v23, %v3909_v54  ;;  %v3921_v37 = vsub.f32 %v6593_v5, %v3909_v54 }
 0x212   : > { %v3922_v38 = vsub.f32 %v6620_v0, %v3909_v54  ;;  %v3923_v2 = vsub.f32 %v5088_v26, %v3909_v54  ;;  %v3924_v15 = vsub.f32 %v6616_v49, %v3909_v54  ;;  %v3925_v39 = vsub.f32 %v6624_v18, %v3909_v54 }
 0x213   : > { %v3927_v52 = vmul.f32 %v3910_v25, %v3910_v25  ;;  %v3928_v6 = vmul.f32 %v3911_v28, %v3911_v28  ;;  %v3929_v31 = vmul.f32 %v3912_v7, %v3912_v7  ;;  %v3930_v29 = vmul.f32 %v3913_v62, %v3913_v62 }
 0x214   : > { %v3931_v1 = vmul.f32 %v3914_v22, %v3914_v22  ;;  %v3932_v8 = vmul.f32 %v3915_v16, %v3915_v16  ;;  %v3933_v23 = vmul.f32 %v3916_v47, %v3916_v47  ;;  %v3934_v5 = vmul.f32 %v3917_v24, %v3917_v24 }
 0x215   : > { %v3943_v14 = vadd.f32 %v3928_v6, %v3927_v52  ;;  %v3935_v0 = vmul.f32 %v3918_v36, %v3918_v36  ;;  %v3936_v10 = vmul.f32 %v3919_v56, %v3919_v56  ;;  %v3937_v35 = vmul.f32 %v3920_v33, %v3920_v33 }
 0x216   : > { %v3938_v53 = vmul.f32 %v3921_v37, %v3921_v37  ;;  %v3939_v42 = vmul.f32 %v3922_v38, %v3922_v38  ;;  %v3940_v57 = vmul.f32 %v3923_v2, %v3923_v2  ;;  %v3941_v20 = vmul.f32 %v3924_v15, %v3924_v15 }
 0x217   : > { %v3944_v58 = vadd.f32 %v3943_v14, %v3929_v31  ;;  %v3942_v3 = vmul.f32 %v3925_v39, %v3925_v39 }
 0x219   : > { %v3945_v9 = vadd.f32 %v3944_v58, %v3930_v29 }
 0x21b   : > { %v3946_v30 = vadd.f32 %v3945_v9, %v3931_v1 }
 0x21d   : > { %v3947_v21 = vadd.f32 %v3946_v30, %v3932_v8 }
 0x21f   : > { %v3948_v60 = vadd.f32 %v3947_v21, %v3933_v23 }
 0x221   : > { %v3949_v26 = vadd.f32 %v3948_v60, %v3934_v5 }
 0x223   : > { %v3950_v49 = vadd.f32 %v3949_v26, %v3935_v0 }
 0x225   : > { %v3951_v18 = vadd.f32 %v3950_v49, %v3936_v10 }
 0x227   : > { %v3952_v19 = vadd.f32 %v3951_v18, %v3937_v35 }
 0x229   : > { %v3953_v4 = vadd.f32 %v3952_v19, %v3938_v53 }
 0x22b   : > { %v3954_v50 = vadd.f32 %v3953_v4, %v3939_v42 }
 0x22d   : > { %v3955_v11 = vadd.f32 %v3954_v50, %v3940_v57 }
 0x22f   : > { %v3956_v17 = vadd.f32 %v3955_v11, %v3941_v20 }
 0x231   : > { %v3957_v27 = vadd.f32 %v3956_v17, %v3942_v3 }
 0x233   : > { %v3958_v63 = vrot.slane %v3957_v27, 4 }
 0x235   : > { %v3959_v46 = vadd.f32 %v3958_v63, %v3957_v27 }
 0x237   : > { %v3960_v40 = vrot.slane %v3959_v46, 2 }
 0x239   : > { %v3961_v32 = vadd.f32 %v3960_v40, %v3959_v46 }
 0x23b   : > { %v3962_v59 = vrot.slane %v3961_v32, 1 }
 0x23d   : > { %v3963_v43 = vadd.f32 %v3962_v59, %v3961_v32 }
 0x23f   : > { %3964 = vst [vmem:[%s6655_s14 + $0x1] sm:$0x1] %v3963_v43 }
 0x240 PF: > { %s18_s28 = sadd.s32 1, %s5387_s28   ;;  %s6705_s24 = smov %s5379_s26 }
 0x241   : > { %p15_p0 = scmp.ge.s32.totalorder %s18_s28, 6   ;;  %s6706_s25 = smov %s5383_s27 }
 0x242   : > { %s6707_s26 = smov %s6710_s29  ;;  %s6708_s27 = smov %s6714_s30 }
 0x243   :  { %17 = sbr.rel (!%p15_p0) target bundleno = 3 (0x3), region = 95 }

</bundles_post_ra>
